<compile_context>
chip_gen: v7x
topology: tpu7x:2x2x1
jax: 0.10.0
libtpu: 0.0.40
codegen_flags: <defaults>
</compile_context>

<pallas_src>
import jax
import jax.numpy as jnp
from jax.experimental import pallas as pl
from jax.experimental.pallas import tpu as pltpu


def se_gate_mul_kernel(xg_ref, w_ref, b_ref, xm_ref, o_ref):
    # xg_ref: [Cin, 1]   squeeze input x291 (f32)
    # w_ref : [TC, Cin]  1x1-conv weight tile, bf16 (native layout, no transpose)
    # b_ref : [TC, 1]    f32
    # xm_ref: [TC, HW]   x289 tile, channel-major
    # o_ref : [TC, HW]
    s = jnp.maximum(xg_ref[...].astype(jnp.float32), 0.0)            # ReLU
    g = jnp.dot(w_ref[...], s.astype(jnp.bfloat16),
                preferred_element_type=jnp.float32)                  # [TC, 1] GEMV on MXU
    g = g + b_ref[...].astype(jnp.float32)
    g = jax.nn.sigmoid(g)                                            # sigmoid (EUP)
    o_ref[...] = (xm_ref[...].astype(jnp.float32) * g).astype(o_ref.dtype)


def se_gate_mul(x291, x289, weight, bias, *, block_c=1512):
    """x291: [1, Cin, 1, 1], x289: [1, Cout, H, W],
       weight: [Cout, Cin, 1, 1] (ideally already bf16), bias: [Cout]
       ->  [1, Cout, H, W]"""
    n, cin, _, _ = x291.shape
    nb, cout, h, w = x289.shape
    assert n == 1 and nb == 1
    hw = h * w

    # Free reshapes of contiguous data — no HBM copies.
    xg = x291.reshape(cin, 1)              # [Cin, 1]
    wm = weight.reshape(cout, cin)         # [Cout, Cin]  (native layout)
    b2 = bias.reshape(cout, 1)             # [Cout, 1]
    xm = x289.reshape(cout, hw)            # [Cout, HW]   (channel-major)

    if wm.dtype != jnp.bfloat16:
        # One-time cast; in a real model the SE weight should be stored bf16
        # so this never sits in the hot path.
        wm = wm.astype(jnp.bfloat16)

    # Prefer an even, 8-aligned divisor of Cout so every grid step is identical
    # (for Cout=3024: 1008, 1512, 3024 are valid; default 1512 -> grid of 2).
    block_c = min(block_c, cout)
    if cout % block_c != 0:
        block_c_div = 0
        for d in range(block_c, 0, -1):
            if cout % d == 0 and (d % 8 == 0 or d == cout):
                block_c_div = d
                break
        block_c = block_c_div if block_c_div else max(8, (block_c // 8) * 8)
    grid_c = pl.cdiv(cout, block_c)

    cost = pl.CostEstimate(
        flops=2 * cout * cin + cout * hw,
        transcendentals=cout,
        bytes_accessed=(cout * cin * wm.dtype.itemsize       # weight (bf16)
                        + cout * hw * x289.dtype.itemsize    # xm read
                        + cout * hw * x289.dtype.itemsize    # out write
                        + cout * 4                            # bias
                        + cin * 4 * grid_c),                  # gate input (replicated)
    )

    out_flat = pl.pallas_call(
        se_gate_mul_kernel,
        out_shape=jax.ShapeDtypeStruct((cout, hw), x289.dtype),
        grid=(grid_c,),
        in_specs=[
            pl.BlockSpec((cin, 1), lambda i: (0, 0)),          # gate input, replicated
            pl.BlockSpec((block_c, cin), lambda i: (i, 0)),    # weight tile (bf16)
            pl.BlockSpec((block_c, 1), lambda i: (i, 0)),      # bias tile
            pl.BlockSpec((block_c, hw), lambda i: (i, 0)),     # x289 tile
        ],
        out_specs=pl.BlockSpec((block_c, hw), lambda i: (i, 0)),
        compiler_params=pltpu.CompilerParams(
            dimension_semantics=("parallel",),   # independent Cout blocks -> 2-TC split on v7x
        ),
        cost_estimate=cost,
    )(xg, wm, b2, xm)

    return out_flat.reshape(1, cout, h, w)       # free reshape back to NCHW


def reference(x291, x289, weight, bias):
    # Pure-f32 reference matching the PyTorch module.
    s = jnp.maximum(x291.reshape(1, -1), 0.0)
    g = s @ weight.reshape(weight.shape[0], -1).T + bias[None, :]
    g = jax.nn.sigmoid(g)                        # [1, Cout]
    return x289 * g[:, :, None, None]


if __name__ == "__main__":
    key = jax.random.PRNGKey(0)
    k1, k2, k3, k4 = jax.random.split(key, 4)

    CIN, COUT, H, W = 308, 3024, 7, 7

    x291 = jax.random.normal(k1, (1, CIN, 1, 1), dtype=jnp.float32)
    x289 = jax.random.normal(k2, (1, COUT, H, W), dtype=jnp.float32)
    weight = jax.random.normal(k3, (COUT, CIN, 1, 1), dtype=jnp.float32) * 0.02
    bias = jax.random.normal(k4, (COUT,), dtype=jnp.float32) * 0.02

    # One-time weight cast outside the hot path (would be done at model init).
    weight_bf16 = jax.block_until_ready(weight.astype(jnp.bfloat16))

    out = jax.block_until_ready(se_gate_mul(x291, x289, weight_bf16, bias))
    ref = jax.block_until_ready(reference(x291, x289, weight, bias))

    assert out.shape == (1, COUT, H, W)
    # bf16 weight path on the gate: tolerance relaxed vs the f32 module reference.
    assert jnp.allclose(out, ref, atol=1e-2, rtol=1e-2)

    print("KERNEL_OK")
</pallas_src>

<mosaic_0001>
module attributes {stable_mosaic.version = 11 : i64} {
  func.func @se_gate_mul_kernel(%arg0: i32, %arg1: memref<308x1xf32, #tpu.memory_space<vmem>>, %arg2: memref<1512x308xbf16, #tpu.memory_space<vmem>>, %arg3: memref<1512x1xf32, #tpu.memory_space<vmem>>, %arg4: memref<1512x49xf32, #tpu.memory_space<vmem>>, %arg5: memref<1512x49xf32, #tpu.memory_space<vmem>>) attributes {dimension_semantics = [#tpu.dimension_semantics<parallel>], iteration_bounds = array<i64: 2>, scalar_prefetch = 0 : i64, scratch_operands = 0 : i64, tpu.core_type = #tpu.core_type<tc>, window_params = [{pipeline_mode = #tpu.pipeline_mode<synchronous>, transform_indices = @transform_0, window_bounds = array<i64: 308, 1>}, {transform_indices = @transform_1, window_bounds = array<i64: 1512, 308>}, {transform_indices = @transform_2, window_bounds = array<i64: 1512, 1>}, {transform_indices = @transform_3, window_bounds = array<i64: 1512, 49>}, {transform_indices = @transform_4, window_bounds = array<i64: 1512, 49>}]} {
    %c0 = arith.constant 0 : index
    %c0_0 = arith.constant 0 : index
    %0 = vector.load %arg1[%c0, %c0_0] : memref<308x1xf32, #tpu.memory_space<vmem>>, vector<308x1xf32>
    %cst = arith.constant 0.000000e+00 : f32
    %1 = vector.broadcast %cst : f32 to vector<308x1xf32>
    %2 = arith.maximumf %0, %1 : vector<308x1xf32>
    %c0_1 = arith.constant 0 : index
    %c0_2 = arith.constant 0 : index
    %3 = vector.load %arg2[%c0_1, %c0_2] : memref<1512x308xbf16, #tpu.memory_space<vmem>>, vector<1512x308xbf16>
    %4 = arith.truncf %2 : vector<308x1xf32> to vector<308x1xbf16>
    %cst_3 = arith.constant dense<0.000000e+00> : vector<1512x1xf32>
    %5 = tpu.matmul %3, %4, %cst_3 {dimension_numbers = #tpu.dot_dimension_numbers<[1], [0], [0], [1], [0, 0, 1, 1], [], []>} : vector<1512x308xbf16>, vector<308x1xbf16>, vector<1512x1xf32> -> vector<1512x1xf32>
    %c0_4 = arith.constant 0 : index
    %c0_5 = arith.constant 0 : index
    %6 = vector.load %arg3[%c0_4, %c0_5] : memref<1512x1xf32, #tpu.memory_space<vmem>>, vector<1512x1xf32>
    %7 = arith.addf %5, %6 : vector<1512x1xf32>
    %8 = arith.negf %7 : vector<1512x1xf32>
    %9 = math.exp %8 : vector<1512x1xf32>
    %cst_6 = arith.constant 1.000000e+00 : f32
    %10 = vector.broadcast %cst_6 : f32 to vector<1512x1xf32>
    %11 = arith.addf %10, %9 : vector<1512x1xf32>
    %12 = arith.divf %10, %11 : vector<1512x1xf32>
    %c0_7 = arith.constant 0 : index
    %c0_8 = arith.constant 0 : index
    %13 = vector.load %arg4[%c0_7, %c0_8] : memref<1512x49xf32, #tpu.memory_space<vmem>>, vector<1512x49xf32>
    %14 = vector.broadcast %12 : vector<1512x1xf32> to vector<1512x49xf32>
    %15 = arith.mulf %13, %14 : vector<1512x49xf32>
    %c0_9 = arith.constant 0 : index
    %c0_10 = arith.constant 0 : index
    %16 = vector.load %arg5[%c0_9, %c0_10] : memref<1512x49xf32, #tpu.memory_space<vmem>>, vector<1512x49xf32>
    tpu.vector_store %arg5[%c0_9, %c0_10], %15 {strides = array<i32>} : memref<1512x49xf32, #tpu.memory_space<vmem>>, vector<1512x49xf32>,
    return
  }
  func.func @transform_0(%arg0: i32) -> (i32, i32) {
    %c0_i32 = arith.constant 0 : i32
    %c0_i32_0 = arith.constant 0 : i32
    %c0_i32_1 = arith.constant 0 : i32
    return %c0_i32, %c0_i32_0 : i32, i32
  }
  func.func @transform_1(%arg0: i32) -> (i32, i32) {
    %c0_i32 = arith.constant 0 : i32
    %c0_i32_0 = arith.constant 0 : i32
    return %arg0, %c0_i32 : i32, i32
  }
  func.func @transform_2(%arg0: i32) -> (i32, i32) {
    %c0_i32 = arith.constant 0 : i32
    %c0_i32_0 = arith.constant 0 : i32
    return %arg0, %c0_i32 : i32, i32
  }
  func.func @transform_3(%arg0: i32) -> (i32, i32) {
    %c0_i32 = arith.constant 0 : i32
    %c0_i32_0 = arith.constant 0 : i32
    return %arg0, %c0_i32 : i32, i32
  }
  func.func @transform_4(%arg0: i32) -> (i32, i32) {
    %c0_i32 = arith.constant 0 : i32
    %c0_i32_0 = arith.constant 0 : i32
    return %arg0, %c0_i32 : i32, i32
  }
}

</mosaic_0001>

<bundles_post_ra>
// kernel: tpu_custom_call.1
= control target key start
LH: loop header
LB: loop body
LE: loop exit
PB: predicated region body
PF: predicated region fallthrough
CT: control target
= control target key end

     0   :  { %s9565_s15 = smov 0   ;;  %s11643_s0 = inlined_call_operand.vmem [shape: f32[308,1], index: 0, kind: input, shape index: {}]   ;;  %s11644_s1 = inlined_call_operand.vmem [shape: bf16[3024,308], index: 1, kind: input, shape index: {}]   ;;  %s11645_s2 = inlined_call_operand.vmem [shape: f32[3024,1], index: 2, kind: input, shape index: {}]   ;;  %s11646_s3 = inlined_call_operand.vmem [shape: f32[3024,49], index: 3, kind: input, shape index: {}]   ;;  %s11647_s4 = inlined_call_operand.vmem [shape: f32[3024,49], index: 4, kind: output, shape index: {}]  }
   0x1 LB: > { %s6935_s16 = sadd.s32 4294967295, %s9535_s15   ;;  %p6939_p0 = scmp.ge.s32.totalorder %s9535_s15, 1  ;;  %s9535_s15 = sphi %s9565_s15, %s14_s15  }
   0x2   : > { %p186_p1 = scmp.lt.s32.totalorder %s9535_s15, 3 }
   0x4   : > { %p187_p2 = pnand %p6939_p0, %p186_p1 }
   0x5   : > { %v249_v0 = vld [vmem:[%s11643_s0] sm:$0xff] (!%p187_p2)  ;;  %v250_v1 = vld [vmem:[%s11643_s0 + $0x8] sm:$0xff] (!%p187_p2)  ;;  %v251_v2 = vld [vmem:[%s11643_s0 + $0x10] sm:$0xff] (!%p187_p2)  ;;  %v9537_v3 = vmov (!%p187_p2), 0   ;;  %v9538_v8 = vmov (!%p187_p2), 0.0   ;;  %s223_s29 = smul.u32 (!%p187_p2), 189, %s6935_s16 }
   0x6   : > { %190 = sbr.rel (%p187_p2) target bundleno = 1199 (0x4af), region = 36  ;;  %2624 = vmatprep.subr.bf16.mxu1 (!%p187_p2), %v9537_v3  ;;  %v288_v4 = vmax.f32 (!%p187_p2), %v249_v0, 0.0  ;;  %v289_v5 = vmax.f32 (!%p187_p2), %v250_v1, 0.0  ;;  %v252_v6 = vld [vmem:[%s11643_s0 + $0x18] sm:$0xff] (!%p187_p2)  ;;  %v290_v7 = vmax.f32 (!%p187_p2), %v251_v2, 0.0  ;;  %7614 = vmatprep.subr.bf16.mxu0 (!%p187_p2), %v9538_v8  ;;  %v253_v10 = vld [vmem:[%s11643_s0 + $0x20] sm:$0xff] (!%p187_p2) }
   0x7   : > { %v291_v9 = vmax.f32 (!%p187_p2), %v252_v6, 0.0  ;;  %v254_v11 = vld [vmem:[%s11643_s0 + $0x28] sm:$0xff] (!%p187_p2)  ;;  %8392 = vset.pattern.permute.xlu0 (!%p187_p2), %v9537_v3  ;;  %8393 = vset.pattern.permute.xlu1 (!%p187_p2), %v9537_v3  ;;  %v292_v14 = vmax.f32 (!%p187_p2), %v253_v10, 0.0  ;;  %v255_v16 = vld [vmem:[%s11643_s0 + $0x30] sm:$0xff] (!%p187_p2)  ;;  %v256_v17 = vld [vmem:[%s11643_s0 + $0x38] sm:$0xff] (!%p187_p2)  ;;  %p224_p3 = scmp.lt.s32.totalorder (!%p187_p2), %s223_s29, 377 }
   0x8   : > { %v705_v12 = vpack.c.bf16 (!%p187_p2), %v289_v5, %v288_v4  ;;  %v293_v15 = vmax.f32 (!%p187_p2), %v254_v11, 0.0  ;;  %v281_v18 = vld [vmem:[%s11643_s0 + $0x100] sm:$0xff] (!%p187_p2)  ;;  %v282_v19 = vld [vmem:[%s11643_s0 + $0x108] sm:$0xff] (!%p187_p2)  ;;  %v294_v21 = vmax.f32 (!%p187_p2), %v255_v16, 0.0  ;;  %v295_v22 = vmax.f32 (!%p187_p2), %v256_v17, 0.0  ;;  %v283_v24 = vld [vmem:[%s11643_s0 + $0x110] sm:$0xff] (!%p187_p2) }
   0x9   : > { %v706_v13 = vpack.c.bf16 (!%p187_p2), %v291_v9, %v290_v7  ;;  %v320_v23 = vmax.f32 (!%p187_p2), %v281_v18, 0.0  ;;  %v284_v25 = vld [vmem:[%s11643_s0 + $0x118] sm:$0xff] (!%p187_p2)  ;;  %v257_v26 = vld [vmem:[%s11643_s0 + $0x40] sm:$0xff] (!%p187_p2)  ;;  %v258_v27 = vld [vmem:[%s11643_s0 + $0x48] sm:$0xff] (!%p187_p2)  ;;  %v321_v28 = vmax.f32 (!%p187_p2), %v282_v19, 0.0  ;;  %v322_v29 = vmax.f32 (!%p187_p2), %v283_v24, 0.0 }
   0xa   : > { %2625 = vmatpush1.bf16.msra.mxu1 (!%p187_p2), %v705_v12  ;;  %v707_v20 = vpack.c.bf16 (!%p187_p2), %v293_v15, %v292_v14  ;;  %v323_v30 = vmax.f32 (!%p187_p2), %v284_v25, 0.0  ;;  %v285_v31 = vld [vmem:[%s11643_s0 + $0x120] sm:$0xff] (!%p187_p2)  ;;  %v286_v32 = vld [vmem:[%s11643_s0 + $0x128] sm:$0xff] (!%p187_p2)  ;;  %v287_v34 = vld [vmem:[%s11643_s0 + $0x130] sm:$0xf] (!%p187_p2)  ;;  %v708_v35 = vpack.c.bf16 (!%p187_p2), %v295_v22, %v294_v21  ;;  %v296_v36 = vmax.f32 (!%p187_p2), %v257_v26, 0.0 }
   0xb   : > { %2626 = vmatprep.subr.bf16.mxu1 (!%p187_p2), %v9537_v3  ;;  %v721_v33 = vpack.c.bf16 (!%p187_p2), %v321_v28, %v320_v23  ;;  %v297_v37 = vmax.f32 (!%p187_p2), %v258_v27, 0.0  ;;  %v259_v38 = vld [vmem:[%s11643_s0 + $0x50] sm:$0xff] (!%p187_p2)  ;;  %v260_v39 = vld [vmem:[%s11643_s0 + $0x58] sm:$0xff] (!%p187_p2)  ;;  %v324_v41 = vmax.f32 (!%p187_p2), %v285_v31, 0.0  ;;  %v325_v42 = vmax.f32 (!%p187_p2), %v286_v32, 0.0  ;;  %v261_v46 = vld [vmem:[%s11643_s0 + $0x60] sm:$0xff] (!%p187_p2) }
   0xc   : > { %v722_v40 = vpack.c.bf16 (!%p187_p2), %v323_v30, %v322_v29  ;;  %v326_v43 = vmax.f32 (!%p187_p2), %v287_v34, 0.0  ;;  %v298_v44 = vmax.f32 (!%p187_p2), %v259_v38, 0.0  ;;  %v299_v45 = vmax.f32 (!%p187_p2), %v260_v39, 0.0  ;;  %v262_v49 = vld [vmem:[%s11643_s0 + $0x68] sm:$0xff] (!%p187_p2)  ;;  %v263_v55 = vld [vmem:[%s11643_s0 + $0x70] sm:$0xff] (!%p187_p2)  ;;  %v264_v56 = vld [vmem:[%s11643_s0 + $0x78] sm:$0xff] (!%p187_p2) }
   0xd   : > { %s11649_s29 = smov (!%p224_p3, %s223_s29), 377  ;;  %7615 = vmatpush3.bf16.msra.mxu0 %v721_v33  ;;  %vm9539_vm0 = vmmov 0   ;;  %v709_v47 = vpack.c.bf16 %v297_v37, %v296_v36  ;;  %v723_v50 = vpack.c.bf16 %v325_v42, %v324_v41  ;;  %vm2620_vm1 = vcmask 1041408   ;;  %v265_v58 = vld [vmem:[%s11643_s0 + $0x80] sm:$0xff]  ;;  %v266_v63 = vld [vmem:[%s11643_s0 + $0x88] sm:$0xff]  ;;  %v267_v4 = vld [vmem:[%s11643_s0 + $0x90] sm:$0xff] }
   0xe   : > { %2627 = vmatpush1.bf16.msra.mxu1 %v706_v13  ;;  %s8380_s6 = smul.u32 12, %s11649_s29  ;;  %7616 = vmatprep.subr.bf16.mxu0 %v9538_v8  ;;  %v724_v51 = vpack.c.bf16 %v326_v43, %v326_v43  ;;  %v710_v52 = vpack.c.bf16 %v299_v45, %v298_v44  ;;  %v300_v53 = vmax.f32 %v261_v46, 0.0  ;;  %v301_v54 = vmax.f32 %v262_v49, 0.0  ;;  %v268_v5 = vld [vmem:[%s11643_s0 + $0x98] sm:$0xff]  ;;  %v269_v11 = vld [vmem:[%s11643_s0 + $0xa0] sm:$0xff]  ;;  %v270_v12 = vld [vmem:[%s11643_s0 + $0xa8] sm:$0xff] }
   0xf   : > { %2628 = vmatprep.subr.bf16.mxu1 %v9537_v3  ;;  %7622 = vmatprep.mubr.msk.bf16.mxu0 %vm9539_vm0, %v9538_v8  ;;  %v302_v60 = vmax.f32 %v263_v55, 0.0  ;;  %v303_v61 = vmax.f32 %v264_v56, 0.0  ;;  %vm2334_vm2 = vcmask 424960   ;;  %v304_v1 = vmax.f32 %v265_v58, 0.0  ;;  %v271_v16 = vld [vmem:[%s11643_s0 + $0xb0] sm:$0xff]  ;;  %v272_v17 = vld [vmem:[%s11643_s0 + $0xb8] sm:$0xff] }
  0x10   : > { %s9645_s9 = scalar_lea.vmem %s11644_s1, %s8380_s6  ;;  %v2622_v57 = vsel %vm2620_vm1, %v724_v51, 0  ;;  %v711_v59 = vpack.c.bf16 %v301_v54, %v300_v53  ;;  %v305_v2 = vmax.f32 %v266_v63, 0.0  ;;  %v306_v6 = vmax.f32 %v267_v4, 0.0  ;;  %v273_v21 = vld [vmem:[%s11643_s0 + $0xc0] sm:$0xff]  ;;  %v274_v23 = vld [vmem:[%s11643_s0 + $0xc8] sm:$0xff]  ;;  %v275_v27 = vld [vmem:[%s11643_s0 + $0xd0] sm:$0xff] }
  0x11   : > { %v8396_v48 = vld [vmem:[%s9645_s9 + $0x4] ss:$12 sps:$4 sm:$0xff]   ;;  %7617 = vmatpush3.bf16.msra.mxu0 %v722_v40  ;;  %v8397_v62 = vld [vmem:[%s9645_s9 + $0x8] ss:$12 sps:$4 sm:$0xff]   ;;  %v712_v0 = vpack.c.bf16 %v303_v61, %v302_v60  ;;  %v307_v7 = vmax.f32 %v268_v5, 0.0  ;;  %v308_v14 = vmax.f32 %v269_v11, 0.0 }
  0x12   : > { %2629 = vmatpush1.bf16.msra.mxu1 %v707_v20  ;;  %7618 = vmatprep.subr.bf16.mxu0 %v9538_v8  ;;  %v713_v9 = vpack.c.bf16 %v305_v2, %v304_v1  ;;  %v8400_v10 = vld [vmem:[%s9645_s9 + $0x20] ss:$12 sps:$4 sm:$0xff]   ;;  %v309_v15 = vmax.f32 %v270_v12, 0.0  ;;  %v310_v19 = vmax.f32 %v271_v16, 0.0  ;;  %v311_v20 = vmax.f32 %v272_v17, 0.0  ;;  %v276_v28 = vld [vmem:[%s11643_s0 + $0xd8] sm:$0xff] }
  0x13   : > { %2630 = vmatprep.subr.bf16.mxu1 %v9537_v3  ;;  %2656 = vmatprep.mubr.bf16.mxu1 %v8396_v48  ;;  %v714_v13 = vpack.c.bf16 %v307_v7, %v306_v6  ;;  %v8404_v22 = vld [vmem:[%s9645_s9 + $0x38] ss:$12 sps:$4 sm:$0xff]   ;;  %v312_v24 = vmax.f32 %v273_v21, 0.0  ;;  %v313_v26 = vmax.f32 %v274_v23, 0.0  ;;  %v314_v29 = vmax.f32 %v275_v27, 0.0  ;;  %v278_v34 = vld [vmem:[%s11643_s0 + $0xe8] sm:$0xff] }
  0x14   : > { %v715_v18 = vpack.c.bf16 %v309_v15, %v308_v14  ;;  %v716_v25 = vpack.c.bf16 %v311_v20, %v310_v19  ;;  %v315_v31 = vmax.f32 %v276_v28, 0.0  ;;  %v8408_v32 = vld [vmem:[%s9645_s9 + $0x50] ss:$12 sps:$4 sm:$0xff]   ;;  %v277_v33 = vld [vmem:[%s11643_s0 + $0xe0] sm:$0xff]  ;;  %v317_v37 = vmax.f32 %v278_v34, 0.0  ;;  %s9917_s28 = sshll.u32 %s11649_s29, 3 }
  0x15   : > { %7619 = vmatpush3.bf16.msra.mxu0 %v723_v50  ;;  %v717_v30 = vpack.c.bf16 %v313_v26, %v312_v24  ;;  %v316_v36 = vmax.f32 %v277_v33, 0.0  ;;  %v279_v38 = vld [vmem:[%s11643_s0 + $0xf0] sm:$0xff]  ;;  %v280_v39 = vld [vmem:[%s11643_s0 + $0xf8] sm:$0xff]  ;;  %v8394_v45 = vld [vmem:[%s9645_s9] ss:$12 sps:$4 sm:$0xff]   ;;  %s9928_s6 = scalar_lea.vmem %s11645_s2, %s9917_s28  ;;  %s10208_s8 = scalar_lea.vmem %s11646_s3, %s9917_s28  ;;  %vm6665_vm3 = vcmask 400384  }
  0x16   : > { %2631 = vmatpush1.bf16.msra.mxu1 %v708_v35  ;;  %7620 = vmatprep.subr.bf16.mxu0 %v9538_v8  ;;  %v718_v35 = vpack.c.bf16 %v315_v31, %v314_v29  ;;  %v8412_v40 = vld [vmem:[%s9645_s9 + $0x68] ss:$12 sps:$4 sm:$0xff]   ;;  %v318_v42 = vmax.f32 %v279_v38, 0.0  ;;  %v319_v43 = vmax.f32 %v280_v39, 0.0  ;;  %v8401_v48 = vld [vmem:[%s9645_s9 + $0x18] ss:$12 sps:$4 sm:$0xff]   ;;  %s10223_s12 = scalar_lea.vmem %s11647_s4, %s9917_s28 }
  0x17   : > { %2632 = vmatprep.subr.bf16.mxu1 %v9537_v3  ;;  %v719_v41 = vpack.c.bf16 %v317_v37, %v316_v36  ;;  %v8398_v46 = vld [vmem:[%s9645_s9 + $0x1c] ss:$12 sps:$4 sm:$0xff]   ;;  %v8420_v49 = vld [vmem:[%s9645_s9 + $0x98] ss:$12 sps:$4 sm:$0xff]   ;;  %v8413_v56 = vld [vmem:[%s9645_s9 + $0x60] ss:$12 sps:$4 sm:$0xff]  }
  0x18   : > { %v720_v44 = vpack.c.bf16 %v319_v43, %v318_v42  ;;  %v8405_v50 = vld [vmem:[%s9645_s9 + $0x30] ss:$12 sps:$4 sm:$0xff]   ;;  %v8406_v51 = vld [vmem:[%s9645_s9 + $0x4c] ss:$12 sps:$4 sm:$0xff]   ;;  %v8409_v53 = vld [vmem:[%s9645_s9 + $0x48] ss:$12 sps:$4 sm:$0xff]  }
  0x19   : > { %7621 = vmatpush3.bf16.msra.mxu0 %v2622_v57  ;;  %v8410_v54 = vld [vmem:[%s9645_s9 + $0x64] ss:$12 sps:$4 sm:$0xff]   ;;  %v8428_v55 = vld [vmem:[%s9645_s9 + $0xc8] ss:$12 sps:$4 sm:$0xff]   ;;  %v8432_v58 = vld [vmem:[%s9645_s9 + $0xe0] ss:$12 sps:$4 sm:$0xff]  }
  0x1a   : > { %2633 = vmatpush1.bf16.msra.mxu1 %v709_v47  ;;  %v8416_v47 = vld [vmem:[%s9645_s9 + $0x80] ss:$12 sps:$4 sm:$0xff]   ;;  %v8414_v57 = vld [vmem:[%s9645_s9 + $0x7c] ss:$12 sps:$4 sm:$0xff]   ;;  %v8436_v61 = vld [vmem:[%s9645_s9 + $0xf8] ss:$12 sps:$4 sm:$0xff]  }
  0x1b   : > { %2634 = vmatprep.subr.bf16.mxu1 %v9537_v3  ;;  %v8418_v60 = vld [vmem:[%s9645_s9 + $0x94] ss:$12 sps:$4 sm:$0xff]   ;;  %v8422_v63 = vld [vmem:[%s9645_s9 + $0xac] ss:$12 sps:$4 sm:$0xff]   ;;  %v8426_v2 = vld [vmem:[%s9645_s9 + $0xc4] ss:$12 sps:$4 sm:$0xff]  }
  0x1c   : > { %7623 = vmatmul.mubr.msk.bf16.vlgmr.msra.gmra.mrb[0].mxu0 %vm2334_vm2, %v8397_v62  ;;  %v8421_v62 = vld [vmem:[%s9645_s9 + $0x90] ss:$12 sps:$4 sm:$0xff]   ;;  %v8425_v1 = vld [vmem:[%s9645_s9 + $0xa8] ss:$12 sps:$4 sm:$0xff]   ;;  %v8429_v5 = vld [vmem:[%s9645_s9 + $0xc0] ss:$12 sps:$4 sm:$0xff]  }
  0x1d   : > { %7626 = vmatprep.mubr.msk.bf16.mxu0 %vm9539_vm0, %v9538_v8  ;;  %v8444_v4 = vld [vmem:[%s9645_s9 + $0x128] ss:$12 sps:$4 sm:$0xff]   ;;  %v8448_v7 = vld [vmem:[%s9645_s9 + $0x140] ss:$12 sps:$4 sm:$0xff]   ;;  %v8452_v11 = vld [vmem:[%s9645_s9 + $0x158] ss:$12 sps:$4 sm:$0xff]  }
  0x1e   : > { %2635 = vmatpush1.bf16.msra.mxu1 %v710_v52  ;;  %v8424_v52 = vld [vmem:[%s9645_s9 + $0xb0] ss:$12 sps:$4 sm:$0xff]   ;;  %v8441_v15 = vld [vmem:[%s9645_s9 + $0x108] ss:$12 sps:$4 sm:$0xff]   ;;  %v8464_v20 = vld [vmem:[%s9645_s9 + $0x1a0] ss:$12 sps:$4 sm:$0xff]  }
  0x1f   : > { %2636 = vmatprep.subr.bf16.mxu1 %v9537_v3  ;;  %v8430_v6 = vld [vmem:[%s9645_s9 + $0xdc] ss:$12 sps:$4 sm:$0xff]   ;;  %v8442_v16 = vld [vmem:[%s9645_s9 + $0x124] ss:$12 sps:$4 sm:$0xff]   ;;  %v8466_v34 = vld [vmem:[%s9645_s9 + $0x1b4] ss:$12 sps:$4 sm:$0xff]  }
  0x20   : > { %v8437_v12 = vld [vmem:[%s9645_s9 + $0xf0] ss:$12 sps:$4 sm:$0xff]   ;;  %v8460_v17 = vld [vmem:[%s9645_s9 + $0x188] ss:$12 sps:$4 sm:$0xff]   ;;  %v8449_v21 = vld [vmem:[%s9645_s9 + $0x138] ss:$12 sps:$4 sm:$0xff]  }
  0x21   : > { %v8456_v14 = vld [vmem:[%s9645_s9 + $0x170] ss:$12 sps:$4 sm:$0xff]   ;;  %v8468_v23 = vld [vmem:[%s9645_s9 + $0x1b8] ss:$12 sps:$4 sm:$0xff]   ;;  %v8457_v27 = vld [vmem:[%s9645_s9 + $0x168] ss:$12 sps:$4 sm:$0xff]  }
  0x22   : > { %2637 = vmatpush1.bf16.msra.mxu1 %v711_v59  ;;  %v8417_v59 = vld [vmem:[%s9645_s9 + $0x78] ss:$12 sps:$4 sm:$0xff]   ;;  %v8446_v19 = vld [vmem:[%s9645_s9 + $0x13c] ss:$12 sps:$4 sm:$0xff]   ;;  %v8477_v42 = vld [vmem:[%s9645_s9 + $0x1e0] ss:$12 sps:$4 sm:$0xff]  }
  0x23   : > { %2638 = vmatprep.subr.bf16.mxu1 %v9537_v3  ;;  %v8453_v24 = vld [vmem:[%s9645_s9 + $0x150] ss:$12 sps:$4 sm:$0xff]   ;;  %v8476_v29 = vld [vmem:[%s9645_s9 + $0x1e8] ss:$12 sps:$4 sm:$0xff]   ;;  %v8465_v33 = vld [vmem:[%s9645_s9 + $0x198] ss:$12 sps:$4 sm:$0xff]  }
  0x24   : > { %7627 = vmatmul.mubr.msk.bf16.gmra.mrb[4].mxu0 %vm2334_vm2, %v8400_v10  ;;  %v8434_v10 = vld [vmem:[%s9645_s9 + $0xf4] ss:$12 sps:$4 sm:$0xff]   ;;  %v8472_v26 = vld [vmem:[%s9645_s9 + $0x1d0] ss:$12 sps:$4 sm:$0xff]   ;;  %v8470_v37 = vld [vmem:[%s9645_s9 + $0x1cc] ss:$12 sps:$4 sm:$0xff]  }
  0x25   : > { %7630 = vmatprep.mubr.msk.bf16.mxu0 %vm9539_vm0, %v9538_v8  ;;  %v8458_v28 = vld [vmem:[%s9645_s9 + $0x184] ss:$12 sps:$4 sm:$0xff]   ;;  %v8462_v31 = vld [vmem:[%s9645_s9 + $0x19c] ss:$12 sps:$4 sm:$0xff]  }
  0x26   : > { %2639 = vmatpush1.bf16.msra.mxu1 %v712_v0  ;;  %v8440_v0 = vld [vmem:[%s9645_s9 + $0x110] ss:$12 sps:$4 sm:$0xff]   ;;  %v8473_v39 = vld [vmem:[%s9645_s9 + $0x1c8] ss:$12 sps:$4 sm:$0xff]  }
  0x27   : > { %2640 = vmatprep.subr.bf16.mxu1 %v9537_v3  ;;  %v8469_v36 = vld [vmem:[%s9645_s9 + $0x1b0] ss:$12 sps:$4 sm:$0xff]  }
  0x28   : > { %v8488_v38 = vld [vmem:[%s9645_s9 + $0x230] ss:$12 sps:$4 sm:$0xff]  }
  0x29   : > { %v8478_v43 = vld [vmem:[%s9645_s9 + $0x1fc] ss:$12 sps:$4 sm:$0xff]  }
  0x2a   : > { %2641 = vmatpush1.bf16.msra.mxu1 %v713_v9  ;;  %v8433_v9 = vld [vmem:[%s9645_s9 + $0xd8] ss:$12 sps:$4 sm:$0xff]  }
  0x2b   : > { %2642 = vmatprep.subr.bf16.mxu1 %v9537_v3 }
  0x2c   : > { %7631 = vmatmul.mubr.msk.bf16.gmra.mrb[8].mxu0 %vm2334_vm2, %v8404_v22  ;;  %v8450_v22 = vld [vmem:[%s9645_s9 + $0x154] ss:$12 sps:$4 sm:$0xff]  }
  0x2d   : > { %7634 = vmatprep.mubr.msk.bf16.mxu0 %vm9539_vm0, %v9538_v8 }
  0x2e   : > { %2643 = vmatpush1.bf16.msra.mxu1 %v714_v13  ;;  %v8438_v13 = vld [vmem:[%s9645_s9 + $0x10c] ss:$12 sps:$4 sm:$0xff]  }
  0x2f   : > { %2644 = vmatprep.subr.bf16.mxu1 %v9537_v3 }
  0x32   : > { %2645 = vmatpush1.bf16.msra.mxu1 %v715_v18  ;;  %v8445_v18 = vld [vmem:[%s9645_s9 + $0x120] ss:$12 sps:$4 sm:$0xff]  }
  0x33   : > { %2646 = vmatprep.subr.bf16.mxu1 %v9537_v3 }
  0x34   : > { %7635 = vmatmul.mubr.msk.bf16.gmra.mrb[12].mxu0 %vm2334_vm2, %v8408_v32  ;;  %v8480_v32 = vld [vmem:[%s9645_s9 + $0x200] ss:$12 sps:$4 sm:$0xff]  }
  0x35   : > { %7638 = vmatprep.mubr.msk.bf16.mxu0 %vm9539_vm0, %v9538_v8 }
  0x36   : > { %2647 = vmatpush1.bf16.msra.mxu1 %v716_v25  ;;  %v8454_v25 = vld [vmem:[%s9645_s9 + $0x16c] ss:$12 sps:$4 sm:$0xff]  }
  0x37   : > { %2648 = vmatprep.subr.bf16.mxu1 %v9537_v3 }
  0x3a   : > { %2649 = vmatpush1.bf16.msra.mxu1 %v717_v30  ;;  %v8461_v30 = vld [vmem:[%s9645_s9 + $0x180] ss:$12 sps:$4 sm:$0xff]  }
  0x3b   : > { %2650 = vmatprep.subr.bf16.mxu1 %v9537_v3 }
  0x3c   : > { %7639 = vmatmul.mubr.msk.bf16.gmra.mrb[16].mxu0 %vm2334_vm2, %v8412_v40  ;;  %v8474_v40 = vld [vmem:[%s9645_s9 + $0x1e4] ss:$12 sps:$4 sm:$0xff]  }
  0x3d   : > { %7642 = vmatprep.mubr.msk.bf16.mxu0 %vm9539_vm0, %v9538_v8 }
  0x3e   : > { %2651 = vmatpush1.bf16.msra.mxu1 %v718_v35  ;;  %v8484_v35 = vld [vmem:[%s9645_s9 + $0x218] ss:$12 sps:$4 sm:$0xff]  }
  0x3f   : > { %2652 = vmatprep.subr.bf16.mxu1 %v9537_v3 }
  0x42   : > { %2653 = vmatpush1.bf16.msra.mxu1 %v719_v41  ;;  %v8492_v41 = vld [vmem:[%s9645_s9 + $0x248] ss:$12 sps:$4 sm:$0xff]  }
  0x43   : > { %2654 = vmatprep.subr.bf16.mxu1 %v9537_v3  ;;  %v8402_v3 = vld [vmem:[%s9645_s9 + $0x34] ss:$12 sps:$4 sm:$0xff]  }
  0x44   : > { %7643 = vmatmul.mubr.msk.bf16.gmra.mrb[20].mxu0 %vm2334_vm2, %v8416_v47  ;;  %v8500_v47 = vld [vmem:[%s9645_s9 + $0x278] ss:$12 sps:$4 sm:$0xff]  }
  0x45   : > { %7646 = vmatprep.mubr.msk.bf16.mxu0 %vm9539_vm0, %v9538_v8 }
  0x46   : > { %2655 = vmatpush1.bf16.msra.mxu1 %v720_v44  ;;  %v8496_v44 = vld [vmem:[%s9645_s9 + $0x260] ss:$12 sps:$4 sm:$0xff]  }
  0x49   : > { %2657 = vmatmul.mubr.bf16.vlgmr.msra.gmra.mrb[0].mxu1 %v8394_v45  ;;  %v8481_v45 = vld [vmem:[%s9645_s9 + $0x1f8] ss:$12 sps:$4 sm:$0xff]  }
  0x4a   : > { %2664 = vmatprep.mubr.bf16.mxu1 %v8398_v46  ;;  %v8482_v46 = vld [vmem:[%s9645_s9 + $0x214] ss:$12 sps:$4 sm:$0xff]  }
  0x4c   : > { %7647 = vmatmul.mubr.msk.bf16.gmra.mrb[24].mxu0 %vm2334_vm2, %v8420_v49  ;;  %v8486_v49 = vld [vmem:[%s9645_s9 + $0x22c] ss:$12 sps:$4 sm:$0xff]  }
  0x4d   : > { %7650 = vmatprep.mubr.msk.bf16.mxu0 %vm9539_vm0, %v9538_v8 }
  0x51   : > { %2665 = vmatmul.mubr.bf16.gmra.mrb[4].mxu1 %v8401_v48  ;;  %v8485_v48 = vld [vmem:[%s9645_s9 + $0x210] ss:$12 sps:$4 sm:$0xff]  }
  0x52   : > { %2672 = vmatprep.mubr.bf16.mxu1 %v8402_v3 }
  0x54   : > { %7651 = vmatmul.mubr.msk.bf16.gmra.mrb[28].mxu0 %vm2334_vm2, %v8424_v52 }
  0x55   : > { %7654 = vmatprep.mubr.msk.bf16.mxu0 %vm9539_vm0, %v9538_v8 }
  0x59   : > { %2673 = vmatmul.mubr.bf16.gmra.mrb[8].mxu1 %v8405_v50 }
  0x5a   : > { %2680 = vmatprep.mubr.bf16.mxu1 %v8406_v51  ;;  %v8504_v51 = vld [vmem:[%s9645_s9 + $0x290] ss:$12 sps:$4 sm:$0xff]  }
  0x5c   : > { %7655 = vmatmul.mubr.msk.bf16.gmra.mrb[32].mxu0 %vm2334_vm2, %v8428_v55 }
  0x5d   : > { %7658 = vmatprep.mubr.msk.bf16.mxu0 %vm9539_vm0, %v9538_v8 }
  0x61   : > { %2681 = vmatmul.mubr.bf16.gmra.mrb[12].mxu1 %v8409_v53 }
  0x62   : > { %2688 = vmatprep.mubr.bf16.mxu1 %v8410_v54  ;;  %v8489_v54 = vld [vmem:[%s9645_s9 + $0x228] ss:$12 sps:$4 sm:$0xff]  }
  0x64   : > { %7659 = vmatmul.mubr.msk.bf16.gmra.mrb[36].mxu0 %vm2334_vm2, %v8432_v58  ;;  %v8508_v58 = vld [vmem:[%s9645_s9 + $0x2a8] ss:$12 sps:$4 sm:$0xff]  }
  0x65   : > { %7662 = vmatprep.mubr.msk.bf16.mxu0 %vm9539_vm0, %v9538_v8 }
  0x69   : > { %2689 = vmatmul.mubr.bf16.gmra.mrb[16].mxu1 %v8413_v56  ;;  %v8490_v56 = vld [vmem:[%s9645_s9 + $0x244] ss:$12 sps:$4 sm:$0xff]  }
  0x6a   : > { %2696 = vmatprep.mubr.bf16.mxu1 %v8414_v57 }
  0x6c   : > { %7663 = vmatmul.mubr.msk.bf16.gmra.mrb[40].mxu0 %vm2334_vm2, %v8436_v61  ;;  %v8493_v61 = vld [vmem:[%s9645_s9 + $0x240] ss:$12 sps:$4 sm:$0xff]  }
  0x6d   : > { %7666 = vmatprep.mubr.msk.bf16.mxu0 %vm9539_vm0, %v9538_v8 }
  0x71   : > { %2697 = vmatmul.mubr.bf16.gmra.mrb[20].mxu1 %v8417_v59 }
  0x72   : > { %2704 = vmatprep.mubr.bf16.mxu1 %v8418_v60 }
  0x74   : > { %7667 = vmatmul.mubr.msk.bf16.gmra.mrb[44].mxu0 %vm2334_vm2, %v8440_v0 }
  0x75   : > { %7670 = vmatprep.mubr.msk.bf16.mxu0 %vm9539_vm0, %v9538_v8 }
  0x79   : > { %2705 = vmatmul.mubr.bf16.gmra.mrb[24].mxu1 %v8421_v62 }
  0x7a   : > { %2712 = vmatprep.mubr.bf16.mxu1 %v8422_v63  ;;  %v8494_v63 = vld [vmem:[%s9645_s9 + $0x25c] ss:$12 sps:$4 sm:$0xff]  }
  0x7c   : > { %7671 = vmatmul.mubr.msk.bf16.gmra.mrb[48].mxu0 %vm2334_vm2, %v8444_v4 }
  0x7d   : > { %7674 = vmatprep.mubr.msk.bf16.mxu0 %vm9539_vm0, %v9538_v8 }
  0x81   : > { %2713 = vmatmul.mubr.bf16.gmra.mrb[28].mxu1 %v8425_v1  ;;  %v8512_v1 = vld [vmem:[%s9645_s9 + $0x2c0] ss:$12 sps:$4 sm:$0xff]  }
  0x82   : > { %2720 = vmatprep.mubr.bf16.mxu1 %v8426_v2 }
  0x84   : > { %7675 = vmatmul.mubr.msk.bf16.gmra.mrb[52].mxu0 %vm2334_vm2, %v8448_v7  ;;  %v8498_v7 = vld [vmem:[%s9645_s9 + $0x274] ss:$12 sps:$4 sm:$0xff]  }
  0x85   : > { %7678 = vmatprep.mubr.msk.bf16.mxu0 %vm9539_vm0, %v9538_v8 }
  0x89   : > { %2721 = vmatmul.mubr.bf16.gmra.mrb[32].mxu1 %v8429_v5  ;;  %v8497_v5 = vld [vmem:[%s9645_s9 + $0x258] ss:$12 sps:$4 sm:$0xff]  }
  0x8a   : > { %2728 = vmatprep.mubr.bf16.mxu1 %v8430_v6 }
  0x8c   : > { %7679 = vmatmul.mubr.msk.bf16.gmra.mrb[56].mxu0 %vm2334_vm2, %v8452_v11 }
  0x8d   : > { %7682 = vmatprep.mubr.msk.bf16.mxu0 %vm9539_vm0, %v9538_v8 }
  0x91   : > { %2729 = vmatmul.mubr.bf16.gmra.mrb[36].mxu1 %v8433_v9 }
  0x92   : > { %2736 = vmatprep.mubr.bf16.mxu1 %v8434_v10  ;;  %v8516_v10 = vld [vmem:[%s9645_s9 + $0x2d8] ss:$12 sps:$4 sm:$0xff]  }
  0x94   : > { %7683 = vmatmul.mubr.msk.bf16.gmra.mrb[60].mxu0 %vm2334_vm2, %v8456_v14 }
  0x95   : > { %7686 = vmatprep.mubr.msk.bf16.mxu0 %vm9539_vm0, %v9538_v8 }
  0x99   : > { %2737 = vmatmul.mubr.bf16.gmra.mrb[40].mxu1 %v8437_v12 }
  0x9a   : > { %2744 = vmatprep.mubr.bf16.mxu1 %v8438_v13  ;;  %v8501_v13 = vld [vmem:[%s9645_s9 + $0x270] ss:$12 sps:$4 sm:$0xff]  }
  0x9c   : > { %7687 = vmatmul.mubr.msk.bf16.gmra.mrb[64].mxu0 %vm2334_vm2, %v8460_v17  ;;  %v8520_v17 = vld [vmem:[%s9645_s9 + $0x2f0] ss:$12 sps:$4 sm:$0xff]  }
  0x9d   : > { %7690 = vmatprep.mubr.msk.bf16.mxu0 %vm9539_vm0, %v9538_v8 }
  0xa1   : > { %2745 = vmatmul.mubr.bf16.gmra.mrb[44].mxu1 %v8441_v15  ;;  %v8502_v15 = vld [vmem:[%s9645_s9 + $0x28c] ss:$12 sps:$4 sm:$0xff]  }
  0xa2   : > { %2752 = vmatprep.mubr.bf16.mxu1 %v8442_v16 }
  0xa4   : > { %7691 = vmatmul.mubr.msk.bf16.gmra.mrb[68].mxu0 %vm2334_vm2, %v8464_v20  ;;  %v725_v20 = vld [vmem:[%s9928_s6] sm:$0xff] }
  0xa5   : > { %7694 = vmatprep.mubr.msk.bf16.mxu0 %vm9539_vm0, %v9538_v8 }
  0xa9   : > { %2753 = vmatmul.mubr.bf16.gmra.mrb[48].mxu1 %v8445_v18 }
  0xaa   : > { %2760 = vmatprep.mubr.bf16.mxu1 %v8446_v19 }
  0xac   : > { %7695 = vmatmul.mubr.msk.bf16.gmra.mrb[72].mxu0 %vm2334_vm2, %v8468_v23 }
  0xad   : > { %7698 = vmatprep.mubr.msk.bf16.mxu0 %vm9539_vm0, %v9538_v8 }
  0xb1   : > { %2761 = vmatmul.mubr.bf16.gmra.mrb[52].mxu1 %v8449_v21 }
  0xb2   : > { %2768 = vmatprep.mubr.bf16.mxu1 %v8450_v22  ;;  %v726_v22 = vld [vmem:[%s9928_s6 + $0x8] sm:$0xff] }
  0xb4   : > { %7699 = vmatmul.mubr.msk.bf16.gmra.mrb[76].mxu0 %vm2334_vm2, %v8472_v26 }
  0xb5   : > { %7702 = vmatprep.mubr.msk.bf16.mxu0 %vm9539_vm0, %v9538_v8 }
  0xb9   : > { %2769 = vmatmul.mubr.bf16.gmra.mrb[56].mxu1 %v8453_v24 }
  0xba   : > { %2776 = vmatprep.mubr.bf16.mxu1 %v8454_v25  ;;  %v8505_v25 = vld [vmem:[%s9645_s9 + $0x288] ss:$12 sps:$4 sm:$0xff]  }
  0xbc   : > { %7703 = vmatmul.mubr.msk.bf16.gmra.mrb[80].mxu0 %vm2334_vm2, %v8476_v29 }
  0xbd   : > { %7706 = vmatprep.mubr.msk.bf16.mxu0 %vm9539_vm0, %v9538_v8 }
  0xc1   : > { %2777 = vmatmul.mubr.bf16.gmra.mrb[60].mxu1 %v8457_v27 }
  0xc2   : > { %2784 = vmatprep.mubr.bf16.mxu1 %v8458_v28  ;;  %v8506_v28 = vld [vmem:[%s9645_s9 + $0x2a4] ss:$12 sps:$4 sm:$0xff]  }
  0xc4   : > { %7707 = vmatmul.mubr.msk.bf16.gmra.mrb[84].mxu0 %vm2334_vm2, %v8480_v32 }
  0xc5   : > { %7710 = vmatprep.mubr.msk.bf16.mxu0 %vm9539_vm0, %v9538_v8 }
  0xc9   : > { %2785 = vmatmul.mubr.bf16.gmra.mrb[64].mxu1 %v8461_v30  ;;  %v8524_v30 = vld [vmem:[%s9645_s9 + $0x308] ss:$12 sps:$4 sm:$0xff]  }
  0xca   : > { %2792 = vmatprep.mubr.bf16.mxu1 %v8462_v31 }
  0xcc   : > { %7711 = vmatmul.mubr.msk.bf16.gmra.mrb[88].mxu0 %vm2334_vm2, %v8484_v35 }
  0xcd   : > { %7714 = vmatprep.mubr.msk.bf16.mxu0 %vm9539_vm0, %v9538_v8 }
  0xd1   : > { %2793 = vmatmul.mubr.bf16.gmra.mrb[68].mxu1 %v8465_v33 }
  0xd2   : > { %2800 = vmatprep.mubr.bf16.mxu1 %v8466_v34 }
  0xd4   : > { %7715 = vmatmul.mubr.msk.bf16.gmra.mrb[92].mxu0 %vm2334_vm2, %v8488_v38  ;;  %v727_v38 = vld [vmem:[%s9928_s6 + $0x10] sm:$0xff] }
  0xd5   : > { %7718 = vmatprep.mubr.msk.bf16.mxu0 %vm9539_vm0, %v9538_v8 }
  0xd9   : > { %2801 = vmatmul.mubr.bf16.gmra.mrb[72].mxu1 %v8469_v36 }
  0xda   : > { %2808 = vmatprep.mubr.bf16.mxu1 %v8470_v37 }
  0xdc   : > { %7719 = vmatmul.mubr.msk.bf16.gmra.mrb[96].mxu0 %vm2334_vm2, %v8492_v41  ;;  %v728_v41 = vld [vmem:[%s9928_s6 + $0x18] sm:$0xff] }
  0xdd   : > { %7722 = vmatprep.mubr.msk.bf16.mxu0 %vm9539_vm0, %v9538_v8 }
  0xe1   : > { %2809 = vmatmul.mubr.bf16.gmra.mrb[76].mxu1 %v8473_v39 }
  0xe2   : > { %2816 = vmatprep.mubr.bf16.mxu1 %v8474_v40 }
  0xe4   : > { %7723 = vmatmul.mubr.msk.bf16.gmra.mrb[100].mxu0 %vm2334_vm2, %v8496_v44  ;;  %v8509_v44 = vld [vmem:[%s9645_s9 + $0x2a0] ss:$12 sps:$4 sm:$0xff]  }
  0xe5   : > { %7726 = vmatprep.mubr.msk.bf16.mxu0 %vm9539_vm0, %v9538_v8 }
  0xe9   : > { %2817 = vmatmul.mubr.bf16.gmra.mrb[80].mxu1 %v8477_v42 }
  0xea   : > { %2824 = vmatprep.mubr.bf16.mxu1 %v8478_v43 }
  0xec   : > { %7727 = vmatmul.mubr.msk.bf16.gmra.mrb[104].mxu0 %vm2334_vm2, %v8500_v47  ;;  %v8510_v47 = vld [vmem:[%s9645_s9 + $0x2bc] ss:$12 sps:$4 sm:$0xff]  }
  0xed   : > { %7730 = vmatprep.mubr.msk.bf16.mxu0 %vm9539_vm0, %v9538_v8 }
  0xef   : > { %v9877_v3 = vpop.f32.mrb[0].mxu0 }
  0xf0   : > { %v7624_v50 = vpop.f32.mrb[1].mxu0 }
  0xf1   : > { %2825 = vmatmul.mubr.bf16.gmra.mrb[84].mxu1 %v8481_v45  ;;  %v9881_v52 = vpop.f32.mrb[2].mxu0 }
  0xf2   : > { %2832 = vmatprep.mubr.bf16.mxu1 %v8482_v46  ;;  %v7625_v53 = vpop.f32.mrb[3].mxu0 }
  0xf4   : > { %7731 = vmatmul.mubr.msk.bf16.gmra.mrb[108].mxu0 %vm2334_vm2, %v8504_v51 }
  0xf5   : > { %7734 = vmatprep.mubr.msk.bf16.mxu0 %vm9539_vm0, %v9538_v8 }
  0xf7   : > { %v9887_v55 = vpop.f32.mrb[4].mxu0 }
  0xf8   : > { %v7628_v57 = vpop.f32.mrb[5].mxu0 }
  0xf9   : > { %2833 = vmatmul.mubr.bf16.gmra.mrb[88].mxu1 %v8485_v48  ;;  %v9891_v59 = vpop.f32.mrb[6].mxu0  ;;  %v729_v57 = vld [vmem:[%s9928_s6 + $0x20] sm:$0xff] }
  0xfa   : > { %2840 = vmatprep.mubr.bf16.mxu1 %v8486_v49  ;;  %v7629_v60 = vpop.f32.mrb[7].mxu0 }
  0xfb   : > { %v730_v60 = vld [vmem:[%s9928_s6 + $0x28] sm:$0xff] }
  0xfc   : > { %7735 = vmatmul.mubr.msk.bf16.gmra.mrb[112].mxu0 %vm2334_vm2, %v8508_v58 }
  0xfd   : > { %7738 = vmatprep.mubr.msk.bf16.mxu0 %vm9539_vm0, %v9538_v8 }
  0xff   : > { %v9897_v62 = vpop.f32.mrb[8].mxu0 }
 0x100   : > { %v7632_v0 = vpop.f32.mrb[9].mxu0 }
 0x101   : > { %2841 = vmatmul.mubr.bf16.gmra.mrb[92].mxu1 %v8489_v54  ;;  %v9901_v2 = vpop.f32.mrb[10].mxu0 }
 0x102   : > { %2848 = vmatprep.mubr.bf16.mxu1 %v8490_v56  ;;  %v7633_v4 = vpop.f32.mrb[11].mxu0 }
 0x103   : > { %v8514_v4 = vld [vmem:[%s9645_s9 + $0x2d4] ss:$12 sps:$4 sm:$0xff]  }
 0x104   : > { %7739 = vmatmul.mubr.msk.bf16.gmra.mrb[116].mxu0 %vm2334_vm2, %v8512_v1  ;;  %v8513_v1 = vld [vmem:[%s9645_s9 + $0x2b8] ss:$12 sps:$4 sm:$0xff]  }
 0x105   : > { %7742 = vmatprep.mubr.msk.bf16.mxu0 %vm9539_vm0, %v9538_v8 }
 0x107   : > { %v9907_v6 = vpop.f32.mrb[12].mxu0 }
 0x108   : > { %v7636_v9 = vpop.f32.mrb[13].mxu0 }
 0x109   : > { %2849 = vmatmul.mubr.bf16.gmra.mrb[96].mxu1 %v8493_v61  ;;  %v9911_v11 = vpop.f32.mrb[14].mxu0 }
 0x10a   : > { %2856 = vmatprep.mubr.bf16.mxu1 %v8494_v63  ;;  %v7637_v12 = vpop.f32.mrb[15].mxu0 }
 0x10c   : > { %7743 = vmatmul.mubr.msk.bf16.gmra.mrb[120].mxu0 %vm2334_vm2, %v8516_v10  ;;  %v8532_v10 = vld [vmem:[%s9645_s9 + $0x338] ss:$12 sps:$4 sm:$0xff]  }
 0x10d   : > { %7746 = vmatprep.mubr.msk.bf16.mxu0 %vm9539_vm0, %v9538_v8 }
 0x10f   : > { %v9920_v14 = vpop.f32.mrb[16].mxu0 }
 0x110   : > { %v7640_v16 = vpop.f32.mrb[17].mxu0 }
 0x111   : > { %2857 = vmatmul.mubr.bf16.gmra.mrb[100].mxu1 %v8497_v5  ;;  %v9930_v18 = vpop.f32.mrb[18].mxu0 }
 0x112   : > { %2864 = vmatprep.mubr.bf16.mxu1 %v8498_v7  ;;  %v7641_v19 = vpop.f32.mrb[19].mxu0 }
 0x114   : > { %7747 = vmatmul.mubr.msk.bf16.gmra.mrb[124].mxu0 %vm2334_vm2, %v8520_v17 }
 0x115   : > { %7750 = vmatprep.mubr.msk.bf16.mxu0 %vm9539_vm0, %v9538_v8 }
 0x117   : > { %v9938_v26 = vpop.f32.mrb[20].mxu0 }
 0x118   : > { %v7644_v29 = vpop.f32.mrb[21].mxu0 }
 0x119   : > { %2865 = vmatmul.mubr.bf16.gmra.mrb[104].mxu1 %v8501_v13  ;;  %v9943_v34 = vpop.f32.mrb[22].mxu0 }
 0x11a   : > { %2872 = vmatprep.mubr.bf16.mxu1 %v8502_v15  ;;  %v7645_v35 = vpop.f32.mrb[23].mxu0 }
 0x11c   : > { %v2658_v21 = vpop.f32.mrb[0].mxu1  ;;  %7751 = vmatmul.mubr.msk.bf16.gmra.mrb[128].mxu0 %vm2334_vm2, %v8524_v30  ;;  %v8518_v30 = vld [vmem:[%s9645_s9 + $0x2ec] ss:$12 sps:$4 sm:$0xff]  }
 0x11d   : > { %v2659_v23 = vadd.f32 %v2658_v21, %v725_v20  ;;  %v2660_v24 = vpop.f32.mrb[1].mxu1  ;;  %7754 = vmatprep.mubr.msk.bf16.mxu0 %vm9539_vm0, %v9538_v8 }
 0x11e   : > { %v2661_v27 = vpop.f32.mrb[2].mxu1 }
 0x11f   : > { %v3451_v31 = vadd.f32 %v9877_v3, %v2659_v23  ;;  %v2662_v32 = vadd.f32 %v2661_v27, %v726_v22  ;;  %v2663_v33 = vpop.f32.mrb[3].mxu1  ;;  %v9952_v45 = vpop.f32.mrb[24].mxu0  ;;  %v8528_v3 = vld [vmem:[%s9645_s9 + $0x320] ss:$12 sps:$4 sm:$0xff]   ;;  %v731_v23 = vld [vmem:[%s9928_s6 + $0x30] sm:$0xff] }
 0x120   : > { %v7648_v48 = vpop.f32.mrb[25].mxu0 }
 0x121   : > { %v7324_v36 = vmul.f32 -1.442695, %v3451_v31  ;;  %v3454_v37 = vadd.f32 %v9881_v52, %v2662_v32  ;;  %2873 = vmatmul.mubr.bf16.gmra.mrb[108].mxu1 %v8505_v25  ;;  %v9957_v52 = vpop.f32.mrb[26].mxu0  ;;  %v732_v25 = vld [vmem:[%s9928_s6 + $0x38] sm:$0xff]  ;;  %v733_v48 = vld [vmem:[%s9928_s6 + $0x40] sm:$0xff] }
 0x122   : > { %2880 = vmatprep.mubr.bf16.mxu1 %v8506_v28  ;;  %v7649_v53 = vpop.f32.mrb[27].mxu0 }
 0x123   : > { %8773 = vpow2.f32 %v7324_v36  ;;  %v7325_v39 = vmul.f32 -1.442695, %v3454_v37  ;;  %v8536_v36 = vld [vmem:[%s9645_s9 + $0x350] ss:$12 sps:$4 sm:$0xff]   ;;  %v8521_v53 = vld [vmem:[%s9645_s9 + $0x2e8] ss:$12 sps:$4 sm:$0xff]  }
 0x124   : > { %v2666_v40 = vpop.f32.mrb[4].mxu1  ;;  %7755 = vmatmul.mubr.msk.bf16.gmra.mrb[132].mxu0 %vm2334_vm2, %v8528_v3 }
 0x125   : > { %8775 = vpow2.f32 %v7325_v39  ;;  %v2667_v42 = vadd.f32 %v2666_v40, %v727_v38  ;;  %v2668_v43 = vpop.f32.mrb[5].mxu1  ;;  %7758 = vmatprep.mubr.msk.bf16.mxu0 %vm9539_vm0, %v9538_v8 }
 0x126   : > { %v2669_v46 = vpop.f32.mrb[6].mxu1 }
 0x127   : > { %v3459_v49 = vadd.f32 %v9887_v55, %v2667_v42  ;;  %v2670_v50 = vadd.f32 %v2669_v46, %v728_v41  ;;  %v2671_v51 = vpop.f32.mrb[7].mxu1 }
 0x129   : > { %v7326_v54 = vmul.f32 -1.442695, %v3459_v49  ;;  %v3462_v56 = vadd.f32 %v9891_v59, %v2670_v50  ;;  %2881 = vmatmul.mubr.bf16.gmra.mrb[112].mxu1 %v8509_v44  ;;  %v9967_v59 = vpop.f32.mrb[28].mxu0  ;;  %v734_v49 = vld [vmem:[%s9928_s6 + $0x48] sm:$0xff] }
 0x12a   : > { %2888 = vmatprep.mubr.bf16.mxu1 %v8510_v47  ;;  %v7652_v9 = vpop.f32.mrb[29].mxu0 }
 0x12b   : > { %8777 = vpow2.f32 %v7326_v54  ;;  %v7327_v58 = vmul.f32 -1.442695, %v3462_v56  ;;  %v9971_v17 = vpop.f32.mrb[30].mxu0  ;;  %v8522_v54 = vld [vmem:[%s9645_s9 + $0x304] ss:$12 sps:$4 sm:$0xff]  }
 0x12c   : > { %v2674_v55 = vpop.f32.mrb[8].mxu1  ;;  %v7653_v20 = vpop.f32.mrb[31].mxu0  ;;  %7759 = vmatmul.mubr.msk.bf16.gmra.mrb[136].mxu0 %vm2334_vm2, %v8532_v10 }
 0x12d   : > { %v8774_v61 = vpop.eup %8773  ;;  %8779 = vpow2.f32 %v7327_v58  ;;  %v2675_v63 = vadd.f32 %v2674_v55, %v729_v57  ;;  %v2676_v0 = vpop.f32.mrb[9].mxu1  ;;  %7762 = vmatprep.mubr.msk.bf16.mxu0 %vm9539_vm0, %v9538_v8 }
 0x12e   : > { %v4775_v5 = vadd.f32 1.0, %v8774_v61  ;;  %v2677_v7 = vpop.f32.mrb[10].mxu1  ;;  %v8540_v61 = vld [vmem:[%s9645_s9 + $0x368] ss:$12 sps:$4 sm:$0xff]  }
 0x12f   : > { %v8776_v12 = vpop.eup %8775  ;;  %v3467_v13 = vadd.f32 %v9897_v62, %v2675_v63  ;;  %v2678_v15 = vadd.f32 %v2677_v7, %v730_v60  ;;  %v2679_v16 = vpop.f32.mrb[11].mxu1 }
 0x130   : > { %8781 = vrcp.f32 %v4775_v5  ;;  %v4776_v19 = vadd.f32 1.0, %v8776_v12  ;;  %v9981_v31 = vpop.f32.mrb[32].mxu0 }
 0x131   : > { %v7328_v21 = vmul.f32 -1.442695, %v3467_v13  ;;  %v3470_v22 = vadd.f32 %v9901_v2, %v2678_v15  ;;  %2889 = vmatmul.mubr.bf16.gmra.mrb[116].mxu1 %v8513_v1  ;;  %v8517_v2 = vld [vmem:[%s9645_s9 + $0x2d0] ss:$12 sps:$4 sm:$0xff]   ;;  %v7656_v35 = vpop.f32.mrb[33].mxu0 }
 0x132   : > { %2896 = vmatprep.mubr.bf16.mxu1 %v8514_v4  ;;  %v9985_v41 = vpop.f32.mrb[34].mxu0  ;;  %v735_v15 = vld [vmem:[%s9928_s6 + $0x50] sm:$0xff] }
 0x133   : > { %8783 = vpow2.f32 %v7328_v21  ;;  %v7329_v62 = vmul.f32 -1.442695, %v3470_v22  ;;  %v7657_v43 = vpop.f32.mrb[35].mxu0  ;;  %v8525_v22 = vld [vmem:[%s9645_s9 + $0x300] ss:$12 sps:$4 sm:$0xff]  }
 0x134   : > { %8785 = vrcp.f32 %v4776_v19  ;;  %v2682_v24 = vpop.f32.mrb[12].mxu1  ;;  %7763 = vmatmul.mubr.msk.bf16.gmra.mrb[140].mxu0 %vm2334_vm2, %v8536_v36  ;;  %v736_v19 = vld [vmem:[%s9928_s6 + $0x58] sm:$0xff] }
 0x135   : > { %v8778_v27 = vpop.eup %8777  ;;  %8787 = vpow2.f32 %v7329_v62  ;;  %v2683_v28 = vadd.f32 %v2682_v24, %v731_v23  ;;  %v2684_v29 = vpop.f32.mrb[13].mxu1  ;;  %7766 = vmatprep.mubr.msk.bf16.mxu0 %vm9539_vm0, %v9538_v8  ;;  %v8526_v23 = vld [vmem:[%s9645_s9 + $0x31c] ss:$12 sps:$4 sm:$0xff]  }
 0x136   : > { %v4777_v32 = vadd.f32 1.0, %v8778_v27  ;;  %v2685_v33 = vpop.f32.mrb[14].mxu1  ;;  %v8544_v29 = vld [vmem:[%s9645_s9 + $0x380] ss:$12 sps:$4 sm:$0xff]  }
 0x137   : > { %v8780_v37 = vpop.eup %8779  ;;  %v3475_v38 = vadd.f32 %v9907_v6, %v2683_v28  ;;  %v2686_v39 = vadd.f32 %v2685_v33, %v732_v25  ;;  %v2687_v40 = vpop.f32.mrb[15].mxu1 }
 0x138   : > { %8789 = vrcp.f32 %v4777_v32  ;;  %v4778_v42 = vadd.f32 1.0, %v8780_v37  ;;  %v9995_v56 = vpop.f32.mrb[36].mxu0 }
 0x139   : > { %v7330_v44 = vmul.f32 -1.442695, %v3475_v38  ;;  %v3478_v46 = vadd.f32 %v9911_v11, %v2686_v39  ;;  %2897 = vmatmul.mubr.bf16.gmra.mrb[120].mxu1 %v8517_v2  ;;  %v7660_v60 = vpop.f32.mrb[37].mxu0 }
 0x13a   : > { %v8782_v47 = vpop.eup %8781  ;;  %2904 = vmatprep.mubr.bf16.mxu1 %v8518_v30  ;;  %v9999_v5 = vpop.f32.mrb[38].mxu0 }
 0x13b   : > { %8791 = vpow2.f32 %v7330_v44  ;;  %v7331_v6 = vmul.f32 -1.442695, %v3478_v46  ;;  %5533 = vperm.xlu0 %8392, %v8782_v47   ;;  %v7661_v9 = vpop.f32.mrb[39].mxu0  ;;  %v738_v46 = vld [vmem:[%s9928_s6 + $0x68] sm:$0xff] }
 0x13c   : > { %8793 = vrcp.f32 %v4778_v42  ;;  %v2690_v3 = vpop.f32.mrb[16].mxu1  ;;  %7767 = vmatmul.mubr.msk.bf16.gmra.mrb[144].mxu0 %vm2334_vm2, %v8540_v61  ;;  %v737_v42 = vld [vmem:[%s9928_s6 + $0x60] sm:$0xff] }
 0x13d   : > { %v8784_v50 = vpop.eup %8783  ;;  %8795 = vpow2.f32 %v7331_v6  ;;  %v2691_v11 = vadd.f32 %v2690_v3, %v733_v48  ;;  %v2692_v51 = vpop.f32.mrb[17].mxu1  ;;  %7770 = vmatprep.mubr.msk.bf16.mxu0 %vm9539_vm0, %v9538_v8  ;;  %v8529_v6 = vld [vmem:[%s9645_s9 + $0x318] ss:$12 sps:$4 sm:$0xff]   ;;  %v8530_v3 = vld [vmem:[%s9645_s9 + $0x334] ss:$12 sps:$4 sm:$0xff]  }
 0x13e   : > { %v8786_v57 = vpop.eup %8785  ;;  %v4779_v58 = vadd.f32 1.0, %v8784_v50  ;;  %v2693_v55 = vpop.f32.mrb[18].mxu1 }
 0x13f   : > { %v8788_v63 = vpop.eup %8787  ;;  %v3483_v0 = vadd.f32 %v9920_v14, %v2691_v11  ;;  %v2694_v1 = vadd.f32 %v2693_v55, %v734_v49  ;;  %v2695_v4 = vpop.f32.mrb[19].mxu1  ;;  %5538 = vperm.xlu0 %8392, %v8786_v57  }
 0x140   : > { %8797 = vrcp.f32 %v4779_v58  ;;  %v4780_v7 = vadd.f32 1.0, %v8788_v63  ;;  %v10009_v62 = vpop.f32.mrb[40].mxu0 }
 0x141   : > { %v7332_v10 = vmul.f32 -1.442695, %v3483_v0  ;;  %v3486_v12 = vadd.f32 %v9930_v18, %v2694_v1  ;;  %2905 = vmatmul.mubr.bf16.gmra.mrb[124].mxu1 %v8521_v53  ;;  %v7664_v28 = vpop.f32.mrb[41].mxu0  ;;  %v8548_v53 = vld [vmem:[%s9645_s9 + $0x398] ss:$12 sps:$4 sm:$0xff]  }
 0x142   : > { %v8790_v13 = vpop.eup %8789  ;;  %8799 = vrcp.f32 %v4780_v7  ;;  %2912 = vmatprep.mubr.bf16.mxu1 %v8522_v54  ;;  %v10013_v35 = vpop.f32.mrb[42].mxu0  ;;  %v739_v7 = vld [vmem:[%s9928_s6 + $0x70] sm:$0xff] }
 0x143   : > { %8801 = vpow2.f32 %v7332_v10  ;;  %v7333_v14 = vmul.f32 -1.442695, %v3486_v12  ;;  %5543 = vperm.xlu1 %8393, %v8790_v13   ;;  %v7665_v37 = vpop.f32.mrb[43].mxu0  ;;  %v740_v12 = vld [vmem:[%s9928_s6 + $0x78] sm:$0xff] }
 0x144   : > { %v2698_v16 = vpop.f32.mrb[20].mxu1  ;;  %7771 = vmatmul.mubr.msk.bf16.gmra.mrb[148].mxu0 %vm2334_vm2, %v8544_v29 }
 0x145   : > { %v8792_v20 = vpop.eup %8791  ;;  %8803 = vpow2.f32 %v7333_v14  ;;  %v2699_v18 = vadd.f32 %v2698_v16, %v735_v15  ;;  %v2700_v21 = vpop.f32.mrb[21].mxu1  ;;  %7774 = vmatprep.mubr.msk.bf16.mxu0 %vm9539_vm0, %v9538_v8  ;;  %v8533_v14 = vld [vmem:[%s9645_s9 + $0x330] ss:$12 sps:$4 sm:$0xff]   ;;  %v8534_v16 = vld [vmem:[%s9645_s9 + $0x34c] ss:$12 sps:$4 sm:$0xff]  }
 0x146   : > { %v8794_v24 = vpop.eup %8793  ;;  %v4781_v25 = vadd.f32 1.0, %v8792_v20  ;;  %v2701_v27 = vpop.f32.mrb[22].mxu1 }
 0x147   : > { %v8796_v2 = vpop.eup %8795  ;;  %v3491_v30 = vadd.f32 %v9938_v26, %v2699_v18  ;;  %v2702_v32 = vadd.f32 %v2701_v27, %v736_v19  ;;  %v2703_v33 = vpop.f32.mrb[23].mxu1  ;;  %5548 = vperm.xlu1 %8393, %v8794_v24  }
 0x148   : > { %8805 = vrcp.f32 %v4781_v25  ;;  %v4782_v36 = vadd.f32 1.0, %v8796_v2  ;;  %v10023_v49 = vpop.f32.mrb[44].mxu0 }
 0x149   : > { %v7334_v38 = vmul.f32 -1.442695, %v3491_v30  ;;  %v3494_v39 = vadd.f32 %v9943_v34, %v2702_v32  ;;  %2913 = vmatmul.mubr.bf16.gmra.mrb[128].mxu1 %v8525_v22  ;;  %v7668_v51 = vpop.f32.mrb[45].mxu0  ;;  %v8552_v22 = vld [vmem:[%s9645_s9 + $0x3b0] ss:$12 sps:$4 sm:$0xff]  }
 0x14a   : > { %v8798_v40 = vpop.eup %8797  ;;  %8807 = vrcp.f32 %v4782_v36  ;;  %2920 = vmatprep.mubr.bf16.mxu1 %v8526_v23  ;;  %v10027_v60 = vpop.f32.mrb[46].mxu0  ;;  %v741_v36 = vld [vmem:[%s9928_s6 + $0x80] sm:$0xff] }
 0x14b   : > { %8809 = vpow2.f32 %v7334_v38  ;;  %v7335_v26 = vmul.f32 -1.442695, %v3494_v39  ;;  %5553 = vperm.xlu0 %8392, %v8798_v40   ;;  %v7669_v63 = vpop.f32.mrb[47].mxu0  ;;  %v742_v39 = vld [vmem:[%s9928_s6 + $0x88] sm:$0xff] }
 0x14c   : > { %v8800_v43 = vpop.eup %8799  ;;  %v2706_v44 = vpop.f32.mrb[24].mxu1  ;;  %7775 = vmatmul.mubr.msk.bf16.gmra.mrb[152].mxu0 %vm2334_vm2, %v8548_v53 }
 0x14d   : > { %v8802_v34 = vpop.eup %8801  ;;  %8811 = vpow2.f32 %v7335_v26  ;;  %v2707_v47 = vadd.f32 %v2706_v44, %v737_v42  ;;  %v2708_v48 = vpop.f32.mrb[25].mxu1  ;;  %5558 = vperm.xlu1 %8393, %v8800_v43   ;;  %7778 = vmatprep.mubr.msk.bf16.mxu0 %vm9539_vm0, %v9538_v8  ;;  %v8537_v26 = vld [vmem:[%s9645_s9 + $0x348] ss:$12 sps:$4 sm:$0xff]   ;;  %v8538_v43 = vld [vmem:[%s9645_s9 + $0x364] ss:$12 sps:$4 sm:$0xff]  }
 0x14e   : > { %v4783_v50 = vadd.f32 1.0, %v8802_v34  ;;  %v2709_v11 = vpop.f32.mrb[26].mxu1  ;;  %v8556_v48 = vld [vmem:[%s9645_s9 + $0x3c8] ss:$12 sps:$4 sm:$0xff]  }
 0x14f   : > { %v8804_v54 = vpop.eup %8803  ;;  %v3499_v57 = vadd.f32 %v9952_v45, %v2707_v47  ;;  %v2710_v58 = vadd.f32 %v2709_v11, %v738_v46  ;;  %v2711_v55 = vpop.f32.mrb[27].mxu1 }
 0x150   : > { %8813 = vrcp.f32 %v4783_v50  ;;  %v4784_v61 = vadd.f32 1.0, %v8804_v54  ;;  %v10037_v19 = vpop.f32.mrb[48].mxu0 }
 0x151   : > { %v7336_v0 = vmul.f32 -1.442695, %v3499_v57  ;;  %v3502_v1 = vadd.f32 %v9957_v52, %v2710_v58  ;;  %2921 = vmatmul.mubr.bf16.gmra.mrb[132].mxu1 %v8529_v6  ;;  %v7672_v21 = vpop.f32.mrb[49].mxu0 }
 0x152   : > { %v8806_v4 = vpop.eup %8805  ;;  %8815 = vrcp.f32 %v4784_v61  ;;  %2928 = vmatprep.mubr.bf16.mxu1 %v8530_v3  ;;  %v10041_v28 = vpop.f32.mrb[50].mxu0  ;;  %v743_v61 = vld [vmem:[%s9928_s6 + $0x90] sm:$0xff] }
 0x153   : > { %8817 = vpow2.f32 %v7336_v0  ;;  %v7337_v45 = vmul.f32 -1.442695, %v3502_v1  ;;  %5563 = vperm.xlu0 %8392, %v8806_v4   ;;  %v7673_v2 = vpop.f32.mrb[51].mxu0  ;;  %v744_v1 = vld [vmem:[%s9928_s6 + $0x98] sm:$0xff] }
 0x154   : > { %v8808_v9 = vpop.eup %8807  ;;  %v2714_v10 = vpop.f32.mrb[28].mxu1  ;;  %7779 = vmatmul.mubr.msk.bf16.gmra.mrb[156].mxu0 %vm2334_vm2, %v8552_v22 }
 0x155   : > { %v8810_v52 = vpop.eup %8809  ;;  %8819 = vpow2.f32 %v7337_v45  ;;  %v2715_v13 = vadd.f32 %v2714_v10, %v739_v7  ;;  %v2716_v15 = vpop.f32.mrb[29].mxu1  ;;  %5568 = vperm.xlu1 %8393, %v8808_v9   ;;  %7782 = vmatprep.mubr.msk.bf16.mxu0 %vm9539_vm0, %v9538_v8  ;;  %v8541_v45 = vld [vmem:[%s9645_s9 + $0x360] ss:$12 sps:$4 sm:$0xff]   ;;  %v8542_v9 = vld [vmem:[%s9645_s9 + $0x37c] ss:$12 sps:$4 sm:$0xff]  }
 0x156   : > { %v4785_v20 = vadd.f32 1.0, %v8810_v52  ;;  %v2717_v18 = vpop.f32.mrb[30].mxu1  ;;  %v8560_v15 = vld [vmem:[%s9645_s9 + $0x3e0] ss:$12 sps:$4 sm:$0xff]  }
 0x157   : > { %v8812_v23 = vpop.eup %8811  ;;  %v3507_v24 = vadd.f32 %v9967_v59, %v2715_v13  ;;  %v2718_v25 = vadd.f32 %v2717_v18, %v740_v12  ;;  %v2719_v27 = vpop.f32.mrb[31].mxu1 }
 0x158   : > { %8821 = vrcp.f32 %v4785_v20  ;;  %v4786_v29 = vadd.f32 1.0, %v8812_v23  ;;  %v10051_v44 = vpop.f32.mrb[52].mxu0 }
 0x159   : > { %v7338_v30 = vmul.f32 -1.442695, %v3507_v24  ;;  %v3510_v32 = vadd.f32 %v9971_v17, %v2718_v25  ;;  %2929 = vmatmul.mubr.bf16.gmra.mrb[136].mxu1 %v8533_v14  ;;  %v7676_v47 = vpop.f32.mrb[53].mxu0 }
 0x15a   : > { %v8814_v33 = vpop.eup %8813  ;;  %8823 = vrcp.f32 %v4786_v29  ;;  %2936 = vmatprep.mubr.bf16.mxu1 %v8534_v16  ;;  %v10055_v51 = vpop.f32.mrb[54].mxu0  ;;  %v745_v29 = vld [vmem:[%s9928_s6 + $0xa0] sm:$0xff] }
 0x15b   : > { %8825 = vpow2.f32 %v7338_v30  ;;  %v7339_v59 = vmul.f32 -1.442695, %v3510_v32  ;;  %5573 = vperm.xlu0 %8392, %v8814_v33   ;;  %v7677_v54 = vpop.f32.mrb[55].mxu0  ;;  %v746_v32 = vld [vmem:[%s9928_s6 + $0xa8] sm:$0xff] }
 0x15c   : > { %v8816_v37 = vpop.eup %8815  ;;  %v2722_v38 = vpop.f32.mrb[32].mxu1  ;;  %7783 = vmatmul.mubr.msk.bf16.gmra.mrb[160].mxu0 %vm2334_vm2, %v8556_v48 }
 0x15d   : > { %v8818_v17 = vpop.eup %8817  ;;  %8827 = vpow2.f32 %v7339_v59  ;;  %v2723_v40 = vadd.f32 %v2722_v38, %v741_v36  ;;  %v2724_v42 = vpop.f32.mrb[33].mxu1  ;;  %5578 = vperm.xlu1 %8393, %v8816_v37   ;;  %7786 = vmatprep.mubr.msk.bf16.mxu0 %vm9539_vm0, %v9538_v8  ;;  %v8545_v59 = vld [vmem:[%s9645_s9 + $0x378] ss:$12 sps:$4 sm:$0xff]   ;;  %v8546_v37 = vld [vmem:[%s9645_s9 + $0x394] ss:$12 sps:$4 sm:$0xff]  }
 0x15e   : > { %v4787_v46 = vadd.f32 1.0, %v8818_v17  ;;  %v2725_v34 = vpop.f32.mrb[34].mxu1  ;;  %v8564_v42 = vld [vmem:[%s9645_s9 + $0x3f8] ss:$12 sps:$4 sm:$0xff]  }
 0x15f   : > { %v8820_v6 = vpop.eup %8819  ;;  %v3515_v3 = vadd.f32 %v9981_v31, %v2723_v40  ;;  %v2726_v50 = vadd.f32 %v2725_v34, %v742_v39  ;;  %v2727_v11 = vpop.f32.mrb[35].mxu1 }
 0x160   : > { %8829 = vrcp.f32 %v4787_v46  ;;  %v4788_v53 = vadd.f32 1.0, %v8820_v6  ;;  %v10065_v10 = vpop.f32.mrb[56].mxu0 }
 0x161   : > { %v7340_v57 = vmul.f32 -1.442695, %v3515_v3  ;;  %v3518_v58 = vadd.f32 %v9985_v41, %v2726_v50  ;;  %2937 = vmatmul.mubr.bf16.gmra.mrb[140].mxu1 %v8537_v26  ;;  %v7680_v13 = vpop.f32.mrb[57].mxu0 }
 0x162   : > { %v8822_v55 = vpop.eup %8821  ;;  %8831 = vrcp.f32 %v4788_v53  ;;  %2944 = vmatprep.mubr.bf16.mxu1 %v8538_v43  ;;  %v10069_v21 = vpop.f32.mrb[58].mxu0  ;;  %v747_v53 = vld [vmem:[%s9928_s6 + $0xb0] sm:$0xff] }
 0x163   : > { %8833 = vpow2.f32 %v7340_v57  ;;  %v7341_v31 = vmul.f32 -1.442695, %v3518_v58  ;;  %5583 = vperm.xlu0 %8392, %v8822_v55   ;;  %v7681_v23 = vpop.f32.mrb[59].mxu0  ;;  %v748_v58 = vld [vmem:[%s9928_s6 + $0xb8] sm:$0xff] }
 0x164   : > { %v8824_v63 = vpop.eup %8823  ;;  %v2730_v0 = vpop.f32.mrb[36].mxu1  ;;  %7787 = vmatmul.mubr.msk.bf16.gmra.mrb[164].mxu0 %vm2334_vm2, %v8560_v15 }
 0x165   : > { %v8826_v41 = vpop.eup %8825  ;;  %8835 = vpow2.f32 %v7341_v31  ;;  %v2731_v4 = vadd.f32 %v2730_v0, %v743_v61  ;;  %v2732_v7 = vpop.f32.mrb[37].mxu1  ;;  %5588 = vperm.xlu1 %8393, %v8824_v63   ;;  %7790 = vmatprep.mubr.msk.bf16.mxu0 %vm9539_vm0, %v9538_v8  ;;  %v8549_v31 = vld [vmem:[%s9645_s9 + $0x390] ss:$12 sps:$4 sm:$0xff]   ;;  %v8550_v63 = vld [vmem:[%s9645_s9 + $0x3ac] ss:$12 sps:$4 sm:$0xff]  }
 0x166   : > { %v4789_v12 = vadd.f32 1.0, %v8826_v41  ;;  %v2733_v52 = vpop.f32.mrb[38].mxu1  ;;  %v8568_v7 = vld [vmem:[%s9645_s9 + $0x410] ss:$12 sps:$4 sm:$0xff]  }
 0x167   : > { %v8828_v14 = vpop.eup %8827  ;;  %v3523_v16 = vadd.f32 %v9995_v56, %v2731_v4  ;;  %v2734_v20 = vadd.f32 %v2733_v52, %v744_v1  ;;  %v2735_v18 = vpop.f32.mrb[39].mxu1 }
 0x168   : > { %8837 = vrcp.f32 %v4789_v12  ;;  %v4790_v22 = vadd.f32 1.0, %v8828_v14  ;;  %v10079_v38 = vpop.f32.mrb[60].mxu0 }
 0x169   : > { %v7342_v24 = vmul.f32 -1.442695, %v3523_v16  ;;  %v3526_v25 = vadd.f32 %v9999_v5, %v2734_v20  ;;  %2945 = vmatmul.mubr.bf16.gmra.mrb[144].mxu1 %v8541_v45  ;;  %v7684_v40 = vpop.f32.mrb[61].mxu0 }
 0x16a   : > { %v8830_v27 = vpop.eup %8829  ;;  %8839 = vrcp.f32 %v4790_v22  ;;  %2952 = vmatprep.mubr.bf16.mxu1 %v8542_v9  ;;  %v10083_v47 = vpop.f32.mrb[62].mxu0  ;;  %v749_v22 = vld [vmem:[%s9928_s6 + $0xc0] sm:$0xff] }
 0x16b   : > { %8841 = vpow2.f32 %v7342_v24  ;;  %v7343_v56 = vmul.f32 -1.442695, %v3526_v25  ;;  %5593 = vperm.xlu0 %8392, %v8830_v27   ;;  %v7685_v6 = vpop.f32.mrb[63].mxu0  ;;  %v750_v25 = vld [vmem:[%s9928_s6 + $0xc8] sm:$0xff] }
 0x16c   : > { %v8832_v2 = vpop.eup %8831  ;;  %v2738_v30 = vpop.f32.mrb[40].mxu1  ;;  %7791 = vmatmul.mubr.msk.bf16.gmra.mrb[168].mxu0 %vm2334_vm2, %v8564_v42 }
 0x16d   : > { %v8834_v5 = vpop.eup %8833  ;;  %8843 = vpow2.f32 %v7343_v56  ;;  %v2739_v33 = vadd.f32 %v2738_v30, %v745_v29  ;;  %v2740_v36 = vpop.f32.mrb[41].mxu1  ;;  %5598 = vperm.xlu1 %8393, %v8832_v2   ;;  %7794 = vmatprep.mubr.msk.bf16.mxu0 %vm9539_vm0, %v9538_v8  ;;  %v8553_v56 = vld [vmem:[%s9645_s9 + $0x3a8] ss:$12 sps:$4 sm:$0xff]   ;;  %v8554_v2 = vld [vmem:[%s9645_s9 + $0x3c4] ss:$12 sps:$4 sm:$0xff]  }
 0x16e   : > { %v4791_v39 = vadd.f32 1.0, %v8834_v5  ;;  %v2741_v17 = vpop.f32.mrb[42].mxu1  ;;  %v8572_v36 = vld [vmem:[%s9645_s9 + $0x428] ss:$12 sps:$4 sm:$0xff]  }
 0x16f   : > { %v8836_v26 = vpop.eup %8835  ;;  %v3531_v43 = vadd.f32 %v10009_v62, %v2739_v33  ;;  %v2742_v46 = vadd.f32 %v2741_v17, %v746_v32  ;;  %v2743_v34 = vpop.f32.mrb[43].mxu1 }
 0x170   : > { %8845 = vrcp.f32 %v4791_v39  ;;  %v4792_v48 = vadd.f32 1.0, %v8836_v26  ;;  %v10093_v0 = vpop.f32.mrb[64].mxu0 }
 0x171   : > { %v7344_v3 = vmul.f32 -1.442695, %v3531_v43  ;;  %v3534_v50 = vadd.f32 %v10013_v35, %v2742_v46  ;;  %2953 = vmatmul.mubr.bf16.gmra.mrb[148].mxu1 %v8545_v59  ;;  %v7688_v4 = vpop.f32.mrb[65].mxu0 }
 0x172   : > { %v8838_v11 = vpop.eup %8837  ;;  %8847 = vrcp.f32 %v4792_v48  ;;  %2960 = vmatprep.mubr.bf16.mxu1 %v8546_v37  ;;  %v10097_v13 = vpop.f32.mrb[66].mxu0  ;;  %v751_v48 = vld [vmem:[%s9928_s6 + $0xd0] sm:$0xff] }
 0x173   : > { %8849 = vpow2.f32 %v7344_v3  ;;  %v7345_v62 = vmul.f32 -1.442695, %v3534_v50  ;;  %5603 = vperm.xlu0 %8392, %v8838_v11   ;;  %v7689_v14 = vpop.f32.mrb[67].mxu0  ;;  %v752_v50 = vld [vmem:[%s9928_s6 + $0xd8] sm:$0xff] }
 0x174   : > { %v8840_v54 = vpop.eup %8839  ;;  %v2746_v57 = vpop.f32.mrb[44].mxu1  ;;  %7795 = vmatmul.mubr.msk.bf16.gmra.mrb[172].mxu0 %vm2334_vm2, %v8568_v7 }
 0x175   : > { %v8842_v35 = vpop.eup %8841  ;;  %8851 = vpow2.f32 %v7345_v62  ;;  %v2747_v55 = vadd.f32 %v2746_v57, %v747_v53  ;;  %v2748_v61 = vpop.f32.mrb[45].mxu1  ;;  %5608 = vperm.xlu1 %8393, %v8840_v54   ;;  %7798 = vmatprep.mubr.msk.bf16.mxu0 %vm9539_vm0, %v9538_v8  ;;  %v8557_v62 = vld [vmem:[%s9645_s9 + $0x3c0] ss:$12 sps:$4 sm:$0xff]   ;;  %v8558_v54 = vld [vmem:[%s9645_s9 + $0x3dc] ss:$12 sps:$4 sm:$0xff]  }
 0x176   : > { %v4793_v1 = vadd.f32 1.0, %v8842_v35  ;;  %v2749_v41 = vpop.f32.mrb[46].mxu1  ;;  %v8576_v61 = vld [vmem:[%s9645_s9 + $0x440] ss:$12 sps:$4 sm:$0xff]  }
 0x177   : > { %v8844_v45 = vpop.eup %8843  ;;  %v3539_v9 = vadd.f32 %v10023_v49, %v2747_v55  ;;  %v2750_v12 = vadd.f32 %v2749_v41, %v748_v58  ;;  %v2751_v52 = vpop.f32.mrb[47].mxu1 }
 0x178   : > { %8853 = vrcp.f32 %v4793_v1  ;;  %v4794_v15 = vadd.f32 1.0, %v8844_v45  ;;  %v10107_v30 = vpop.f32.mrb[68].mxu0 }
 0x179   : > { %v7346_v16 = vmul.f32 -1.442695, %v3539_v9  ;;  %v3542_v20 = vadd.f32 %v10027_v60, %v2750_v12  ;;  %2961 = vmatmul.mubr.bf16.gmra.mrb[152].mxu1 %v8549_v31  ;;  %v7692_v33 = vpop.f32.mrb[69].mxu0 }
 0x17a   : > { %v8846_v18 = vpop.eup %8845  ;;  %8855 = vrcp.f32 %v4794_v15  ;;  %2968 = vmatprep.mubr.bf16.mxu1 %v8550_v63  ;;  %v10111_v40 = vpop.f32.mrb[70].mxu0  ;;  %v753_v15 = vld [vmem:[%s9928_s6 + $0xe0] sm:$0xff] }
 0x17b   : > { %8857 = vpow2.f32 %v7346_v16  ;;  %v7347_v49 = vmul.f32 -1.442695, %v3542_v20  ;;  %5613 = vperm.xlu0 %8392, %v8846_v18   ;;  %v7693_v26 = vpop.f32.mrb[71].mxu0  ;;  %v754_v20 = vld [vmem:[%s9928_s6 + $0xe8] sm:$0xff] }
 0x17c   : > { %v8848_v23 = vpop.eup %8847  ;;  %v2754_v24 = vpop.f32.mrb[48].mxu1  ;;  %7799 = vmatmul.mubr.msk.bf16.gmra.mrb[176].mxu0 %vm2334_vm2, %v8572_v36 }
 0x17d   : > { %v8850_v60 = vpop.eup %8849  ;;  %8859 = vpow2.f32 %v7347_v49  ;;  %v2755_v27 = vadd.f32 %v2754_v24, %v749_v22  ;;  %v2756_v29 = vpop.f32.mrb[49].mxu1  ;;  %5618 = vperm.xlu1 %8393, %v8848_v23   ;;  %7802 = vmatprep.mubr.msk.bf16.mxu0 %vm9539_vm0, %v9538_v8  ;;  %v8561_v49 = vld [vmem:[%s9645_s9 + $0x3d8] ss:$12 sps:$4 sm:$0xff]   ;;  %v8562_v23 = vld [vmem:[%s9645_s9 + $0x3f4] ss:$12 sps:$4 sm:$0xff]  }
 0x17e   : > { %v4795_v32 = vadd.f32 1.0, %v8850_v60  ;;  %v2757_v5 = vpop.f32.mrb[50].mxu1  ;;  %v8580_v29 = vld [vmem:[%s9645_s9 + $0x458] ss:$12 sps:$4 sm:$0xff]  }
 0x17f   : > { %v8852_v59 = vpop.eup %8851  ;;  %v3547_v37 = vadd.f32 %v10037_v19, %v2755_v27  ;;  %v2758_v39 = vadd.f32 %v2757_v5, %v750_v25  ;;  %v2759_v17 = vpop.f32.mrb[51].mxu1 }
 0x180   : > { %8861 = vrcp.f32 %v4795_v32  ;;  %v4796_v42 = vadd.f32 1.0, %v8852_v59  ;;  %v10121_v57 = vpop.f32.mrb[72].mxu0 }
 0x181   : > { %v7348_v43 = vmul.f32 -1.442695, %v3547_v37  ;;  %v3550_v46 = vadd.f32 %v10041_v28, %v2758_v39  ;;  %2969 = vmatmul.mubr.bf16.gmra.mrb[156].mxu1 %v8553_v56  ;;  %v7696_v55 = vpop.f32.mrb[73].mxu0 }
 0x182   : > { %v8854_v34 = vpop.eup %8853  ;;  %8863 = vrcp.f32 %v4796_v42  ;;  %2976 = vmatprep.mubr.bf16.mxu1 %v8554_v2  ;;  %v10125_v4 = vpop.f32.mrb[74].mxu0  ;;  %v755_v42 = vld [vmem:[%s9928_s6 + $0xf0] sm:$0xff] }
 0x183   : > { %8865 = vpow2.f32 %v7348_v43  ;;  %v7349_v19 = vmul.f32 -1.442695, %v3550_v46  ;;  %5623 = vperm.xlu0 %8392, %v8854_v34   ;;  %v7697_v45 = vpop.f32.mrb[75].mxu0  ;;  %v756_v46 = vld [vmem:[%s9928_s6 + $0xf8] sm:$0xff] }
 0x184   : > { %v8856_v6 = vpop.eup %8855  ;;  %v2762_v3 = vpop.f32.mrb[52].mxu1  ;;  %7803 = vmatmul.mubr.msk.bf16.gmra.mrb[180].mxu0 %vm2334_vm2, %v8576_v61 }
 0x185   : > { %v8858_v28 = vpop.eup %8857  ;;  %8867 = vpow2.f32 %v7349_v19  ;;  %v2763_v11 = vadd.f32 %v2762_v3, %v751_v48  ;;  %v2764_v53 = vpop.f32.mrb[53].mxu1  ;;  %5628 = vperm.xlu1 %8393, %v8856_v6   ;;  %7806 = vmatprep.mubr.msk.bf16.mxu0 %vm9539_vm0, %v9538_v8  ;;  %v8565_v19 = vld [vmem:[%s9645_s9 + $0x3f0] ss:$12 sps:$4 sm:$0xff]   ;;  %v8566_v6 = vld [vmem:[%s9645_s9 + $0x40c] ss:$12 sps:$4 sm:$0xff]  }
 0x186   : > { %v4797_v58 = vadd.f32 1.0, %v8858_v28  ;;  %v2765_v35 = vpop.f32.mrb[54].mxu1  ;;  %v8584_v53 = vld [vmem:[%s9645_s9 + $0x470] ss:$12 sps:$4 sm:$0xff]  }
 0x187   : > { %v8860_v31 = vpop.eup %8859  ;;  %v3555_v63 = vadd.f32 %v10051_v44, %v2763_v11  ;;  %v2766_v1 = vadd.f32 %v2765_v35, %v752_v50  ;;  %v2767_v41 = vpop.f32.mrb[55].mxu1 }
 0x188   : > { %8869 = vrcp.f32 %v4797_v58  ;;  %v4798_v7 = vadd.f32 1.0, %v8860_v31  ;;  %v10135_v24 = vpop.f32.mrb[76].mxu0 }
 0x189   : > { %v7350_v9 = vmul.f32 -1.442695, %v3555_v63  ;;  %v3558_v12 = vadd.f32 %v10055_v51, %v2766_v1  ;;  %2977 = vmatmul.mubr.bf16.gmra.mrb[160].mxu1 %v8557_v62  ;;  %v7700_v27 = vpop.f32.mrb[77].mxu0 }
 0x18a   : > { %v8862_v52 = vpop.eup %8861  ;;  %8871 = vrcp.f32 %v4798_v7  ;;  %2984 = vmatprep.mubr.bf16.mxu1 %v8558_v54  ;;  %v10139_v33 = vpop.f32.mrb[78].mxu0  ;;  %v757_v7 = vld [vmem:[%s9928_s6 + $0x100] sm:$0xff] }
 0x18b   : > { %8873 = vpow2.f32 %v7350_v9  ;;  %v7351_v44 = vmul.f32 -1.442695, %v3558_v12  ;;  %5633 = vperm.xlu0 %8392, %v8862_v52   ;;  %v7701_v59 = vpop.f32.mrb[79].mxu0  ;;  %v758_v12 = vld [vmem:[%s9928_s6 + $0x108] sm:$0xff] }
 0x18c   : > { %v8864_v14 = vpop.eup %8863  ;;  %v2770_v16 = vpop.f32.mrb[56].mxu1  ;;  %7807 = vmatmul.mubr.msk.bf16.gmra.mrb[184].mxu0 %vm2334_vm2, %v8580_v29 }
 0x18d   : > { %v8866_v51 = vpop.eup %8865  ;;  %8875 = vpow2.f32 %v7351_v44  ;;  %v2771_v18 = vadd.f32 %v2770_v16, %v753_v15  ;;  %v2772_v22 = vpop.f32.mrb[57].mxu1  ;;  %5638 = vperm.xlu1 %8393, %v8864_v14   ;;  %7810 = vmatprep.mubr.msk.bf16.mxu0 %vm9539_vm0, %v9538_v8  ;;  %v8569_v44 = vld [vmem:[%s9645_s9 + $0x408] ss:$12 sps:$4 sm:$0xff]   ;;  %v8570_v14 = vld [vmem:[%s9645_s9 + $0x424] ss:$12 sps:$4 sm:$0xff]  }
 0x18e   : > { %v4799_v25 = vadd.f32 1.0, %v8866_v51  ;;  %v2773_v60 = vpop.f32.mrb[58].mxu1  ;;  %v8588_v22 = vld [vmem:[%s9645_s9 + $0x488] ss:$12 sps:$4 sm:$0xff]  }
 0x18f   : > { %v8868_v56 = vpop.eup %8867  ;;  %v3563_v2 = vadd.f32 %v10065_v10, %v2771_v18  ;;  %v2774_v32 = vadd.f32 %v2773_v60, %v754_v20  ;;  %v2775_v5 = vpop.f32.mrb[59].mxu1 }
 0x190   : > { %8877 = vrcp.f32 %v4799_v25  ;;  %v4800_v36 = vadd.f32 1.0, %v8868_v56  ;;  %v10149_v3 = vpop.f32.mrb[80].mxu0 }
 0x191   : > { %v7352_v37 = vmul.f32 -1.442695, %v3563_v2  ;;  %v3566_v39 = vadd.f32 %v10069_v21, %v2774_v32  ;;  %2985 = vmatmul.mubr.bf16.gmra.mrb[164].mxu1 %v8561_v49  ;;  %v7704_v11 = vpop.f32.mrb[81].mxu0 }
 0x192   : > { %v8870_v17 = vpop.eup %8869  ;;  %8879 = vrcp.f32 %v4800_v36  ;;  %2992 = vmatprep.mubr.bf16.mxu1 %v8562_v23  ;;  %v10153_v55 = vpop.f32.mrb[82].mxu0  ;;  %v759_v36 = vld [vmem:[%s9928_s6 + $0x110] sm:$0xff] }
 0x193   : > { %8881 = vpow2.f32 %v7352_v37  ;;  %v7353_v10 = vmul.f32 -1.442695, %v3566_v39  ;;  %5643 = vperm.xlu0 %8392, %v8870_v17   ;;  %v7705_v31 = vpop.f32.mrb[83].mxu0  ;;  %v760_v39 = vld [vmem:[%s9928_s6 + $0x118] sm:$0xff] }
 0x194   : > { %v8872_v26 = vpop.eup %8871  ;;  %v2778_v43 = vpop.f32.mrb[60].mxu1  ;;  %7811 = vmatmul.mubr.msk.bf16.gmra.mrb[188].mxu0 %vm2334_vm2, %v8584_v53 }
 0x195   : > { %v8874_v21 = vpop.eup %8873  ;;  %8883 = vpow2.f32 %v7353_v10  ;;  %v2779_v34 = vadd.f32 %v2778_v43, %v755_v42  ;;  %v2780_v48 = vpop.f32.mrb[61].mxu1  ;;  %5648 = vperm.xlu1 %8393, %v8872_v26   ;;  %7814 = vmatprep.mubr.msk.bf16.mxu0 %vm9539_vm0, %v9538_v8  ;;  %v8573_v10 = vld [vmem:[%s9645_s9 + $0x420] ss:$12 sps:$4 sm:$0xff]   ;;  %v8574_v26 = vld [vmem:[%s9645_s9 + $0x43c] ss:$12 sps:$4 sm:$0xff]  }
 0x196   : > { %v4801_v50 = vadd.f32 1.0, %v8874_v21  ;;  %v2781_v28 = vpop.f32.mrb[62].mxu1  ;;  %v8592_v48 = vld [vmem:[%s9645_s9 + $0x4a0] ss:$12 sps:$4 sm:$0xff]  }
 0x197   : > { %v8876_v62 = vpop.eup %8875  ;;  %v3571_v54 = vadd.f32 %v10079_v38, %v2779_v34  ;;  %v2782_v58 = vadd.f32 %v2781_v28, %v756_v46  ;;  %v2783_v35 = vpop.f32.mrb[63].mxu1 }
 0x198   : > { %8885 = vrcp.f32 %v4801_v50  ;;  %v4802_v61 = vadd.f32 1.0, %v8876_v62  ;;  %v10163_v16 = vpop.f32.mrb[84].mxu0 }
 0x199   : > { %v7354_v63 = vmul.f32 -1.442695, %v3571_v54  ;;  %v3574_v1 = vadd.f32 %v10083_v47, %v2782_v58  ;;  %2993 = vmatmul.mubr.bf16.gmra.mrb[168].mxu1 %v8565_v19  ;;  %v7708_v18 = vpop.f32.mrb[85].mxu0 }
 0x19a   : > { %v8878_v41 = vpop.eup %8877  ;;  %8887 = vrcp.f32 %v4802_v61  ;;  %3000 = vmatprep.mubr.bf16.mxu1 %v8566_v6  ;;  %v10167_v27 = vpop.f32.mrb[86].mxu0  ;;  %v761_v61 = vld [vmem:[%s9928_s6 + $0x120] sm:$0xff] }
 0x19b   : > { %8889 = vpow2.f32 %v7354_v63  ;;  %v7355_v38 = vmul.f32 -1.442695, %v3574_v1  ;;  %5653 = vperm.xlu0 %8392, %v8878_v41   ;;  %v7709_v56 = vpop.f32.mrb[87].mxu0  ;;  %v762_v1 = vld [vmem:[%s9928_s6 + $0x128] sm:$0xff] }
 0x19c   : > { %v8880_v45 = vpop.eup %8879  ;;  %v2786_v9 = vpop.f32.mrb[64].mxu1  ;;  %7815 = vmatmul.mubr.msk.bf16.gmra.mrb[192].mxu0 %vm2334_vm2, %v8588_v22 }
 0x19d   : > { %v8882_v47 = vpop.eup %8881  ;;  %8891 = vpow2.f32 %v7355_v38  ;;  %v2787_v52 = vadd.f32 %v2786_v9, %v757_v7  ;;  %v2788_v15 = vpop.f32.mrb[65].mxu1  ;;  %5658 = vperm.xlu1 %8393, %v8880_v45   ;;  %7818 = vmatprep.mubr.msk.bf16.mxu0 %vm9539_vm0, %v9538_v8  ;;  %v8577_v38 = vld [vmem:[%s9645_s9 + $0x438] ss:$12 sps:$4 sm:$0xff]   ;;  %v8578_v45 = vld [vmem:[%s9645_s9 + $0x454] ss:$12 sps:$4 sm:$0xff]  }
 0x19e   : > { %v4803_v20 = vadd.f32 1.0, %v8882_v47  ;;  %v2789_v51 = vpop.f32.mrb[66].mxu1  ;;  %v8596_v15 = vld [vmem:[%s9645_s9 + $0x4b8] ss:$12 sps:$4 sm:$0xff]  }
 0x19f   : > { %v8884_v49 = vpop.eup %8883  ;;  %v3579_v23 = vadd.f32 %v10093_v0, %v2787_v52  ;;  %v2790_v25 = vadd.f32 %v2789_v51, %v758_v12  ;;  %v2791_v60 = vpop.f32.mrb[67].mxu1 }
 0x1a0   : > { %8893 = vrcp.f32 %v4803_v20  ;;  %v4804_v29 = vadd.f32 1.0, %v8884_v49  ;;  %v10177_v43 = vpop.f32.mrb[88].mxu0 }
 0x1a1   : > { %v7356_v2 = vmul.f32 -1.442695, %v3579_v23  ;;  %v3582_v32 = vadd.f32 %v10097_v13, %v2790_v25  ;;  %3001 = vmatmul.mubr.bf16.gmra.mrb[172].mxu1 %v8569_v44  ;;  %v7712_v34 = vpop.f32.mrb[89].mxu0 }
 0x1a2   : > { %v8886_v5 = vpop.eup %8885  ;;  %8895 = vrcp.f32 %v4804_v29  ;;  %3008 = vmatprep.mubr.bf16.mxu1 %v8570_v14  ;;  %v10181_v11 = vpop.f32.mrb[90].mxu0  ;;  %v763_v29 = vld [vmem:[%s9928_s6 + $0x130] sm:$0xff] }
 0x1a3   : > { %8897 = vpow2.f32 %v7356_v2  ;;  %v7357_v0 = vmul.f32 -1.442695, %v3582_v32  ;;  %5663 = vperm.xlu0 %8392, %v8886_v5   ;;  %v7713_v62 = vpop.f32.mrb[91].mxu0 }
 0x1a4   : > { %v8888_v59 = vpop.eup %8887  ;;  %v2794_v37 = vpop.f32.mrb[68].mxu1  ;;  %7819 = vmatmul.mubr.msk.bf16.gmra.mrb[196].mxu0 %vm2334_vm2, %v8592_v48  ;;  %v765_v62 = vld [vmem:[%s9928_s6 + $0x140] sm:$0xff] }
 0x1a5   : > { %v8890_v13 = vpop.eup %8889  ;;  %8899 = vpow2.f32 %v7357_v0  ;;  %v2795_v17 = vadd.f32 %v2794_v37, %v759_v36  ;;  %v2796_v42 = vpop.f32.mrb[69].mxu1  ;;  %5668 = vperm.xlu1 %8393, %v8888_v59   ;;  %7822 = vmatprep.mubr.msk.bf16.mxu0 %vm9539_vm0, %v9538_v8  ;;  %v8581_v0 = vld [vmem:[%s9645_s9 + $0x450] ss:$12 sps:$4 sm:$0xff]   ;;  %v8582_v59 = vld [vmem:[%s9645_s9 + $0x46c] ss:$12 sps:$4 sm:$0xff]  }
 0x1a6   : > { %v4805_v46 = vadd.f32 1.0, %v8890_v13  ;;  %v2797_v21 = vpop.f32.mrb[70].mxu1  ;;  %v8600_v42 = vld [vmem:[%s9645_s9 + $0x4d0] ss:$12 sps:$4 sm:$0xff]  }
 0x1a7   : > { %v8892_v19 = vpop.eup %8891  ;;  %v3587_v6 = vadd.f32 %v10107_v30, %v2795_v17  ;;  %v2798_v50 = vadd.f32 %v2797_v21, %v760_v39  ;;  %v2799_v28 = vpop.f32.mrb[71].mxu1 }
 0x1a8   : > { %8901 = vrcp.f32 %v4805_v46  ;;  %v4806_v53 = vadd.f32 1.0, %v8892_v19  ;;  %v10191_v9 = vpop.f32.mrb[92].mxu0  ;;  %v5342_v19 = vld [vmem:[%s10208_s8] sm:$0xff] }
 0x1a9   : > { %v7358_v54 = vmul.f32 -1.442695, %v3587_v6  ;;  %v3590_v58 = vadd.f32 %v10111_v40, %v2798_v50  ;;  %3009 = vmatmul.mubr.bf16.gmra.mrb[176].mxu1 %v8573_v10  ;;  %v7716_v52 = vpop.f32.mrb[93].mxu0 }
 0x1aa   : > { %v8894_v35 = vpop.eup %8893  ;;  %8903 = vrcp.f32 %v4806_v53  ;;  %3016 = vmatprep.mubr.bf16.mxu1 %v8574_v26  ;;  %v10195_v18 = vpop.f32.mrb[94].mxu0 }
 0x1ab   : > { %8905 = vpow2.f32 %v7358_v54  ;;  %v7359_v30 = vmul.f32 -1.442695, %v3590_v58  ;;  %5673 = vperm.xlu0 %8392, %v8894_v35   ;;  %v7717_v49 = vpop.f32.mrb[95].mxu0 }
 0x1ac   : > { %v8896_v31 = vpop.eup %8895  ;;  %v2802_v63 = vpop.f32.mrb[72].mxu1  ;;  %7823 = vmatmul.mubr.msk.bf16.gmra.mrb[200].mxu0 %vm2334_vm2, %v8596_v15  ;;  %v5344_v49 = vld [vmem:[%s10208_s8 + $0x10] sm:$0xff] }
 0x1ad   : > { %v8898_v40 = vpop.eup %8897  ;;  %8907 = vpow2.f32 %v7359_v30  ;;  %v2803_v41 = vadd.f32 %v2802_v63, %v761_v61  ;;  %v2804_v7 = vpop.f32.mrb[73].mxu1  ;;  %5678 = vperm.xlu1 %8393, %v8896_v31   ;;  %7826 = vmatprep.mubr.msk.bf16.mxu0 %vm9539_vm0, %v9538_v8  ;;  %v766_v61 = vld [vmem:[%s9928_s6 + $0x148] sm:$0xff] }
 0x1ae   : > { %v4807_v12 = vadd.f32 1.0, %v8898_v40  ;;  %v2805_v47 = vpop.f32.mrb[74].mxu1  ;;  %v5343_v30 = vld [vmem:[%s10208_s8 + $0x8] sm:$0xff] }
 0x1af   : > { %v8900_v44 = vpop.eup %8899  ;;  %v3595_v14 = vadd.f32 %v10121_v57, %v2803_v41  ;;  %v2806_v20 = vadd.f32 %v2805_v47, %v762_v1  ;;  %v2807_v51 = vpop.f32.mrb[75].mxu1  ;;  %v8585_v40 = vld [vmem:[%s9645_s9 + $0x468] ss:$12 sps:$4 sm:$0xff]  }
 0x1b0   : > { %8909 = vrcp.f32 %v4807_v12  ;;  %v4808_v22 = vadd.f32 1.0, %v8900_v44  ;;  %v10211_v37 = vpop.f32.mrb[96].mxu0  ;;  %v8586_v12 = vld [vmem:[%s9645_s9 + $0x484] ss:$12 sps:$4 sm:$0xff]   ;;  %v8604_v47 = vld [vmem:[%s9645_s9 + $0x4e8] ss:$12 sps:$4 sm:$0xff]  }
 0x1b1   : > { %v7360_v23 = vmul.f32 -1.442695, %v3595_v14  ;;  %v3598_v25 = vadd.f32 %v10125_v4, %v2806_v20  ;;  %3017 = vmatmul.mubr.bf16.gmra.mrb[180].mxu1 %v8577_v38  ;;  %v764_v4 = vld [vmem:[%s9928_s6 + $0x138] sm:$0xff]  ;;  %v7720_v17 = vpop.f32.mrb[97].mxu0 }
 0x1b2   : > { %v8902_v60 = vpop.eup %8901  ;;  %8911 = vrcp.f32 %v4808_v22  ;;  %3024 = vmatprep.mubr.bf16.mxu1 %v8578_v45  ;;  %v10215_v34 = vpop.f32.mrb[98].mxu0 }
 0x1b3   : > { %8913 = vpow2.f32 %v7360_v23  ;;  %v7361_v57 = vmul.f32 -1.442695, %v3598_v25  ;;  %5683 = vperm.xlu0 %8392, %v8902_v60   ;;  %v7721_v6 = vpop.f32.mrb[99].mxu0 }
 0x1b4   : > { %v8904_v56 = vpop.eup %8903  ;;  %v2810_v2 = vpop.f32.mrb[76].mxu1  ;;  %7827 = vmatmul.mubr.msk.bf16.gmra.mrb[204].mxu0 %vm2334_vm2, %v8600_v42 }
 0x1b5   : > { %v8906_v32 = vpop.eup %8905  ;;  %8915 = vpow2.f32 %v7361_v57  ;;  %v2811_v5 = vadd.f32 %v2810_v2, %v763_v29  ;;  %v2812_v36 = vpop.f32.mrb[77].mxu1  ;;  %5688 = vperm.xlu1 %8393, %v8904_v56   ;;  %7830 = vmatprep.mubr.msk.bf16.mxu0 %vm9539_vm0, %v9538_v8  ;;  %v767_v56 = vld [vmem:[%s9928_s6 + $0x150] sm:$0xff] }
 0x1b6   : > { %v4809_v39 = vadd.f32 1.0, %v8906_v32  ;;  %v2813_v13 = vpop.f32.mrb[78].mxu1  ;;  %v5345_v36 = vld [vmem:[%s10208_s8 + $0x18] sm:$0xff] }
 0x1b7   : > { %v8908_v10 = vpop.eup %8907  ;;  %v3603_v26 = vadd.f32 %v10135_v24, %v2811_v5  ;;  %v2814_v46 = vadd.f32 %v2813_v13, %v764_v4  ;;  %v2815_v21 = vpop.f32.mrb[79].mxu1  ;;  %v768_v5 = vld [vmem:[%s9928_s6 + $0x158] sm:$0xff]  ;;  %v8589_v13 = vld [vmem:[%s9645_s9 + $0x480] ss:$12 sps:$4 sm:$0xff]  }
 0x1b8   : > { %8917 = vrcp.f32 %v4809_v39  ;;  %v4810_v48 = vadd.f32 1.0, %v8908_v10  ;;  %v10234_v41 = vpop.f32.mrb[100].mxu0  ;;  %v8608_v21 = vld [vmem:[%s9645_s9 + $0x500] ss:$12 sps:$4 sm:$0xff]  }
 0x1b9   : > { %v7362_v50 = vmul.f32 -1.442695, %v3603_v26  ;;  %v3606_v28 = vadd.f32 %v10139_v33, %v2814_v46  ;;  %3025 = vmatmul.mubr.bf16.gmra.mrb[184].mxu1 %v8581_v0  ;;  %v7724_v51 = vpop.f32.mrb[101].mxu0  ;;  %v8590_v46 = vld [vmem:[%s9645_s9 + $0x49c] ss:$12 sps:$4 sm:$0xff]  }
 0x1ba   : > { %v8910_v53 = vpop.eup %8909  ;;  %8919 = vrcp.f32 %v4810_v48  ;;  %v5534_v24 = vpop.permute.xlu0 %5533  ;;  %3032 = vmatprep.mubr.bf16.mxu1 %v8582_v59 }
 0x1bb   : > { %8921 = vpow2.f32 %v7362_v50  ;;  %v7363_v33 = vmul.f32 -1.442695, %v3606_v28  ;;  %v6476_v54 = vmul.f32 %v5534_v24, %v5342_v19  ;;  %5693 = vperm.xlu0 %8392, %v8910_v53   ;;  %v10240_v23 = vpop.f32.mrb[102].mxu0 }
 0x1bc   : > { %v8912_v58 = vpop.eup %8911  ;;  %v2818_v35 = vpop.f32.mrb[80].mxu1  ;;  %7831 = vmatmul.mubr.msk.bf16.gmra.mrb[208].mxu0 %vm2334_vm2, %v8604_v47 }
 0x1bd   : > { %v8914_v31 = vpop.eup %8913  ;;  %8923 = vpow2.f32 %v7363_v33  ;;  %6666 = vst.msk [vmem:[%s10223_s12] sm:$0xff] %vm6665_vm3, %v6476_v54  ;;  %v2819_v63 = vadd.f32 %v2818_v35, %v765_v62  ;;  %v2820_v1 = vpop.f32.mrb[81].mxu1  ;;  %5698 = vperm.xlu1 %8393, %v8912_v58   ;;  %7834 = vmatprep.mubr.msk.bf16.mxu0 %vm9539_vm0, %v9538_v8  ;;  %v5346_v62 = vld [vmem:[%s10208_s8 + $0x20] sm:$0xff] }
 0x1be   : > { %v4811_v7 = vadd.f32 1.0, %v8914_v31  ;;  %v2821_v38 = vpop.f32.mrb[82].mxu1  ;;  %v5539_v45 = vpop.permute.xlu0 %5538  ;;  %v5347_v31 = vld [vmem:[%s10208_s8 + $0x28] sm:$0xff] }
 0x1bf   : > { %v8916_v52 = vpop.eup %8915  ;;  %v3611_v15 = vadd.f32 %v10149_v3, %v2819_v63  ;;  %v2822_v44 = vadd.f32 %v2821_v38, %v766_v61  ;;  %v6477_v14 = vmul.f32 %v5539_v45, %v5343_v30  ;;  %v2823_v20 = vpop.f32.mrb[83].mxu1  ;;  %v769_v30 = vld [vmem:[%s9928_s6 + $0x160] sm:$0xff]  ;;  %v770_v38 = vld [vmem:[%s9928_s6 + $0x168] sm:$0xff] }
 0x1c0   : > { %8925 = vrcp.f32 %v4811_v7  ;;  %v4812_v22 = vadd.f32 1.0, %v8916_v52  ;;  %v7725_v29 = vpop.f32.mrb[103].mxu0 }
 0x1c1   : > { %v7364_v25 = vmul.f32 -1.442695, %v3611_v15  ;;  %v3614_v60 = vadd.f32 %v10153_v55, %v2822_v44  ;;  %6667 = vst.msk [vmem:[%s10223_s12 + $0x8] sm:$0xff] %vm6665_vm3, %v6477_v14  ;;  %3033 = vmatmul.mubr.bf16.gmra.mrb[188].mxu1 %v8585_v40  ;;  %v10254_v17 = vpop.f32.mrb[104].mxu0  ;;  %v8593_v15 = vld [vmem:[%s9645_s9 + $0x498] ss:$12 sps:$4 sm:$0xff]  }
 0x1c2   : > { %v8918_v3 = vpop.eup %8917  ;;  %8927 = vrcp.f32 %v4812_v22  ;;  %v5544_v57 = vpop.permute.xlu1 %5543  ;;  %3040 = vmatprep.mubr.bf16.mxu1 %v8586_v12  ;;  %v8594_v44 = vld [vmem:[%s9645_s9 + $0x4b4] ss:$12 sps:$4 sm:$0xff]  }
 0x1c3   : > { %8929 = vpow2.f32 %v7364_v25  ;;  %v7365_v2 = vmul.f32 -1.442695, %v3614_v60  ;;  %v6478_v4 = vmul.f32 %v5544_v57, %v5344_v49  ;;  %5703 = vperm.xlu0 %8392, %v8918_v3   ;;  %v7728_v53 = vpop.f32.mrb[105].mxu0  ;;  %v8612_v49 = vld [vmem:[%s9645_s9 + $0x518] ss:$12 sps:$4 sm:$0xff]  }
 0x1c4   : > { %v8920_v55 = vpop.eup %8919  ;;  %v2826_v32 = vpop.f32.mrb[84].mxu1  ;;  %7835 = vmatmul.mubr.msk.bf16.gmra.mrb[212].mxu0 %vm2334_vm2, %v8608_v21 }
 0x1c5   : > { %v8922_v0 = vpop.eup %8921  ;;  %8931 = vpow2.f32 %v7365_v2  ;;  %6668 = vst.msk [vmem:[%s10223_s12 + $0x10] sm:$0xff] %vm6665_vm3, %v6478_v4  ;;  %v2827_v59 = vadd.f32 %v2826_v32, %v767_v56  ;;  %v2828_v39 = vpop.f32.mrb[85].mxu1  ;;  %5708 = vperm.xlu1 %8393, %v8920_v55   ;;  %7838 = vmatprep.mubr.msk.bf16.mxu0 %vm9539_vm0, %v9538_v8  ;;  %v5348_v2 = vld [vmem:[%s10208_s8 + $0x30] sm:$0xff] }
 0x1c6   : > { %v4813_v42 = vadd.f32 1.0, %v8922_v0  ;;  %v2829_v10 = vpop.f32.mrb[86].mxu1  ;;  %v5549_v26 = vpop.permute.xlu1 %5548  ;;  %v5349_v0 = vld [vmem:[%s10208_s8 + $0x38] sm:$0xff] }
 0x1c7   : > { %v8924_v48 = vpop.eup %8923  ;;  %v3619_v19 = vadd.f32 %v10163_v16, %v2827_v59  ;;  %v2830_v6 = vadd.f32 %v2829_v10, %v768_v5  ;;  %v6479_v50 = vmul.f32 %v5549_v26, %v5345_v36  ;;  %v2831_v28 = vpop.f32.mrb[87].mxu1  ;;  %v772_v10 = vld [vmem:[%s9928_s6 + $0x178] sm:$0xff] }
 0x1c8   : > { %8933 = vrcp.f32 %v4813_v42  ;;  %v4814_v24 = vadd.f32 1.0, %v8924_v48  ;;  %v10260_v33 = vpop.f32.mrb[106].mxu0 }
 0x1c9   : > { %v7366_v54 = vmul.f32 -1.442695, %v3619_v19  ;;  %v3622_v58 = vadd.f32 %v10167_v27, %v2830_v6  ;;  %6669 = vst.msk [vmem:[%s10223_s12 + $0x18] sm:$0xff] %vm6665_vm3, %v6479_v50  ;;  %3041 = vmatmul.mubr.bf16.gmra.mrb[192].mxu1 %v8589_v13  ;;  %v7729_v35 = vpop.f32.mrb[107].mxu0  ;;  %v8597_v19 = vld [vmem:[%s9645_s9 + $0x4b0] ss:$12 sps:$4 sm:$0xff]  }
 0x1ca   : > { %v8926_v16 = vpop.eup %8925  ;;  %8935 = vrcp.f32 %v4814_v24  ;;  %v5554_v61 = vpop.permute.xlu0 %5553  ;;  %3048 = vmatprep.mubr.bf16.mxu1 %v8590_v46  ;;  %v8598_v6 = vld [vmem:[%s9645_s9 + $0x4cc] ss:$12 sps:$4 sm:$0xff]  }
 0x1cb   : > { %8937 = vpow2.f32 %v7366_v54  ;;  %v7367_v63 = vmul.f32 -1.442695, %v3622_v58  ;;  %v6480_v1 = vmul.f32 %v5554_v61, %v5346_v62  ;;  %5713 = vperm.xlu0 %8392, %v8926_v16   ;;  %v10275_v14 = vpop.f32.mrb[108].mxu0  ;;  %v8616_v62 = vld [vmem:[%s9645_s9 + $0x530] ss:$12 sps:$4 sm:$0xff]  }
 0x1cc   : > { %v8928_v27 = vpop.eup %8927  ;;  %v2834_v40 = vpop.f32.mrb[88].mxu1  ;;  %7839 = vmatmul.mubr.msk.bf16.gmra.mrb[216].mxu0 %vm2334_vm2, %v8612_v49  ;;  %v8601_v49 = vld [vmem:[%s9645_s9 + $0x4c8] ss:$12 sps:$4 sm:$0xff]  }
 0x1cd   : > { %v5559_v7 = vpop.permute.xlu1 %5558  ;;  %v8930_v45 = vpop.eup %8929  ;;  %8939 = vpow2.f32 %v7367_v63  ;;  %6670 = vst.msk [vmem:[%s10223_s12 + $0x20] sm:$0xff] %vm6665_vm3, %v6480_v1  ;;  %v2835_v12 = vadd.f32 %v2834_v40, %v769_v30  ;;  %5718 = vperm.xlu1 %8393, %v8928_v27   ;;  %7842 = vmatprep.mubr.msk.bf16.mxu0 %vm9539_vm0, %v9538_v8 }
 0x1ce   : > { %v6481_v47 = vmul.f32 %v5559_v7, %v5347_v31  ;;  %v2836_v52 = vpop.f32.mrb[89].mxu1  ;;  %v4815_v20 = vadd.f32 1.0, %v8930_v45  ;;  %v7732_v22 = vpop.f32.mrb[109].mxu0  ;;  %v5350_v31 = vld [vmem:[%s10208_s8 + $0x40] sm:$0xff] }
 0x1cf   : > { %v2837_v51 = vpop.f32.mrb[90].mxu1  ;;  %v8932_v25 = vpop.eup %8931  ;;  %v3627_v60 = vadd.f32 %v10177_v43, %v2835_v12  ;;  %v771_v43 = vld [vmem:[%s9928_s6 + $0x170] sm:$0xff] }
 0x1d0   : > { %6671 = vst.msk [vmem:[%s10223_s12 + $0x28] sm:$0xff] %vm6665_vm3, %v6481_v47  ;;  %v2838_v29 = vadd.f32 %v2837_v51, %v770_v38  ;;  %v2839_v3 = vpop.f32.mrb[91].mxu1  ;;  %v10281_v57 = vpop.f32.mrb[110].mxu0  ;;  %8941 = vrcp.f32 %v4815_v20  ;;  %v4816_v56 = vadd.f32 1.0, %v8932_v25  ;;  %v5351_v38 = vld [vmem:[%s10208_s8 + $0x48] sm:$0xff] }
 0x1d1   : > { %v7733_v4 = vpop.f32.mrb[111].mxu0  ;;  %v7368_v55 = vmul.f32 -1.442695, %v3627_v60  ;;  %3049 = vmatmul.mubr.bf16.gmra.mrb[196].mxu1 %v8593_v15  ;;  %v774_v15 = vld [vmem:[%s9928_s6 + $0x188] sm:$0xff]  ;;  %v8602_v25 = vld [vmem:[%s9645_s9 + $0x4e4] ss:$12 sps:$4 sm:$0xff]  }
 0x1d2   : > { %v3630_v32 = vadd.f32 %v10181_v11, %v2838_v29  ;;  %v8934_v5 = vpop.eup %8933  ;;  %8943 = vrcp.f32 %v4816_v56  ;;  %v5564_v36 = vpop.permute.xlu0 %5563  ;;  %3056 = vmatprep.mubr.bf16.mxu1 %v8594_v44 }
 0x1d3   : > { %8945 = vpow2.f32 %v7368_v55  ;;  %v6482_v39 = vmul.f32 %v5564_v36, %v5348_v2  ;;  %5723 = vperm.xlu0 %8392, %v8934_v5   ;;  %v10295_v50 = vpop.f32.mrb[112].mxu0  ;;  %v8620_v2 = vld [vmem:[%s9645_s9 + $0x548] ss:$12 sps:$4 sm:$0xff]  }
 0x1d4   : > { %v7369_v59 = vmul.f32 -1.442695, %v3630_v32  ;;  %v8936_v11 = vpop.eup %8935  ;;  %v2842_v13 = vpop.f32.mrb[92].mxu1  ;;  %7843 = vmatmul.mubr.msk.bf16.gmra.mrb[220].mxu0 %vm2334_vm2, %v8616_v62  ;;  %v8605_v62 = vld [vmem:[%s9645_s9 + $0x4e0] ss:$12 sps:$4 sm:$0xff]  }
 0x1d5   : > { %v5569_v42 = vpop.permute.xlu1 %5568  ;;  %v8938_v26 = vpop.eup %8937  ;;  %6672 = vst.msk [vmem:[%s10223_s12 + $0x30] sm:$0xff] %vm6665_vm3, %v6482_v39  ;;  %v2843_v46 = vadd.f32 %v2842_v13, %v771_v43  ;;  %5728 = vperm.xlu1 %8393, %v8936_v11   ;;  %7846 = vmatprep.mubr.msk.bf16.mxu0 %vm9539_vm0, %v9538_v8 }
 0x1d6   : > { %8947 = vpow2.f32 %v7369_v59  ;;  %v6483_v21 = vmul.f32 %v5569_v42, %v5349_v0  ;;  %v2844_v48 = vpop.f32.mrb[93].mxu1  ;;  %v4817_v28 = vadd.f32 1.0, %v8938_v26  ;;  %v7736_v24 = vpop.f32.mrb[113].mxu0  ;;  %v5352_v0 = vld [vmem:[%s10208_s8 + $0x50] sm:$0xff] }
 0x1d7   : > { %v2845_v53 = vpop.f32.mrb[94].mxu1  ;;  %v8940_v54 = vpop.eup %8939  ;;  %v3635_v58 = vadd.f32 %v10191_v9, %v2843_v46  ;;  %v773_v9 = vld [vmem:[%s9928_s6 + $0x180] sm:$0xff] }
 0x1d8   : > { %6673 = vst.msk [vmem:[%s10223_s12 + $0x38] sm:$0xff] %vm6665_vm3, %v6483_v21  ;;  %v2846_v35 = vadd.f32 %v2845_v53, %v772_v10  ;;  %v2847_v16 = vpop.f32.mrb[95].mxu1  ;;  %v10301_v61 = vpop.f32.mrb[114].mxu0  ;;  %8949 = vrcp.f32 %v4817_v28  ;;  %v4818_v30 = vadd.f32 1.0, %v8940_v54  ;;  %v5353_v10 = vld [vmem:[%s10208_s8 + $0x58] sm:$0xff] }
 0x1d9   : > { %v7737_v63 = vpop.f32.mrb[115].mxu0  ;;  %v7370_v1 = vmul.f32 -1.442695, %v3635_v58  ;;  %3057 = vmatmul.mubr.bf16.gmra.mrb[200].mxu1 %v8597_v19  ;;  %v776_v19 = vld [vmem:[%s9928_s6 + $0x198] sm:$0xff] }
 0x1da   : > { %v3638_v27 = vadd.f32 %v10195_v18, %v2846_v35  ;;  %v8942_v40 = vpop.eup %8941  ;;  %8951 = vrcp.f32 %v4818_v30  ;;  %v5574_v7 = vpop.permute.xlu0 %5573  ;;  %3064 = vmatprep.mubr.bf16.mxu1 %v8598_v6  ;;  %v8606_v54 = vld [vmem:[%s9645_s9 + $0x4fc] ss:$12 sps:$4 sm:$0xff]  }
 0x1db   : > { %8953 = vpow2.f32 %v7370_v1  ;;  %v6484_v12 = vmul.f32 %v5574_v7, %v5350_v31  ;;  %5733 = vperm.xlu0 %8392, %v8942_v40   ;;  %v10315_v60 = vpop.f32.mrb[116].mxu0  ;;  %v8624_v31 = vld [vmem:[%s9645_s9 + $0x560] ss:$12 sps:$4 sm:$0xff]  }
 0x1dc   : > { %v7371_v45 = vmul.f32 -1.442695, %v3638_v27  ;;  %v8944_v18 = vpop.eup %8943  ;;  %v2850_v47 = vpop.f32.mrb[96].mxu1  ;;  %7847 = vmatmul.mubr.msk.bf16.gmra.mrb[224].mxu0 %vm2334_vm2, %v8620_v2  ;;  %v8609_v2 = vld [vmem:[%s9645_s9 + $0x4f8] ss:$12 sps:$4 sm:$0xff]  }
 0x1dd   : > { %v5579_v52 = vpop.permute.xlu1 %5578  ;;  %v8946_v44 = vpop.eup %8945  ;;  %6674 = vst.msk [vmem:[%s10223_s12 + $0x40] sm:$0xff] %vm6665_vm3, %v6484_v12  ;;  %v2851_v20 = vadd.f32 %v2850_v47, %v773_v9  ;;  %5738 = vperm.xlu1 %8393, %v8944_v18   ;;  %7850 = vmatprep.mubr.msk.bf16.mxu0 %vm9539_vm0, %v9538_v8 }
 0x1de   : > { %8955 = vpow2.f32 %v7371_v45  ;;  %v6485_v51 = vmul.f32 %v5579_v52, %v5351_v38  ;;  %v2852_v22 = vpop.f32.mrb[97].mxu1  ;;  %v4819_v29 = vadd.f32 1.0, %v8946_v44  ;;  %v7740_v56 = vpop.f32.mrb[117].mxu0  ;;  %v5354_v38 = vld [vmem:[%s10208_s8 + $0x60] sm:$0xff] }
 0x1df   : > { %v2853_v3 = vpop.f32.mrb[98].mxu1  ;;  %v3643_v55 = vadd.f32 %v10211_v37, %v2851_v20  ;;  %v10321_v36 = vpop.f32.mrb[118].mxu0  ;;  %v775_v37 = vld [vmem:[%s9928_s6 + $0x190] sm:$0xff] }
 0x1e0   : > { %v8948_v4 = vpop.eup %8947  ;;  %6675 = vst.msk [vmem:[%s10223_s12 + $0x48] sm:$0xff] %vm6665_vm3, %v6485_v51  ;;  %v2854_v32 = vadd.f32 %v2853_v3, %v774_v15  ;;  %v2855_v5 = vpop.f32.mrb[99].mxu1  ;;  %8957 = vrcp.f32 %v4819_v29  ;;  %v5355_v15 = vld [vmem:[%s10208_s8 + $0x68] sm:$0xff] }
 0x1e1   : > { %v4820_v43 = vadd.f32 1.0, %v8948_v4  ;;  %v7741_v59 = vpop.f32.mrb[119].mxu0  ;;  %v7372_v39 = vmul.f32 -1.442695, %v3643_v55  ;;  %3065 = vmatmul.mubr.bf16.gmra.mrb[204].mxu1 %v8601_v49  ;;  %v778_v49 = vld [vmem:[%s9928_s6 + $0x1a8] sm:$0xff] }
 0x1e2   : > { %v3646_v11 = vadd.f32 %v10215_v34, %v2854_v32  ;;  %v8950_v13 = vpop.eup %8949  ;;  %v5584_v42 = vpop.permute.xlu0 %5583  ;;  %3072 = vmatprep.mubr.bf16.mxu1 %v8602_v25  ;;  %v8610_v4 = vld [vmem:[%s9645_s9 + $0x514] ss:$12 sps:$4 sm:$0xff]  }
 0x1e3   : > { %8959 = vrcp.f32 %v4820_v43  ;;  %v6486_v46 = vmul.f32 %v5584_v42, %v5352_v0  ;;  %5743 = vperm.xlu0 %8392, %v8950_v13   ;;  %v10335_v58 = vpop.f32.mrb[120].mxu0  ;;  %v8628_v0 = vld [vmem:[%s9645_s9 + $0x578] ss:$12 sps:$4 sm:$0xff]  }
 0x1e4   : > { %8961 = vpow2.f32 %v7372_v39  ;;  %v7373_v26 = vmul.f32 -1.442695, %v3646_v11  ;;  %v8952_v34 = vpop.eup %8951  ;;  %v2858_v21 = vpop.f32.mrb[100].mxu1  ;;  %7851 = vmatmul.mubr.msk.bf16.gmra.mrb[228].mxu0 %vm2334_vm2, %v8624_v31  ;;  %v8613_v31 = vld [vmem:[%s9645_s9 + $0x510] ss:$12 sps:$4 sm:$0xff]  }
 0x1e5   : > { %v5589_v48 = vpop.permute.xlu1 %5588  ;;  %v8954_v6 = vpop.eup %8953  ;;  %6676 = vst.msk [vmem:[%s10223_s12 + $0x50] sm:$0xff] %vm6665_vm3, %v6486_v46  ;;  %v2859_v28 = vadd.f32 %v2858_v21, %v775_v37  ;;  %5748 = vperm.xlu1 %8393, %v8952_v34   ;;  %7854 = vmatprep.mubr.msk.bf16.mxu0 %vm9539_vm0, %v9538_v8 }
 0x1e6   : > { %8963 = vpow2.f32 %v7373_v26  ;;  %v6487_v53 = vmul.f32 %v5589_v48, %v5353_v10  ;;  %v2860_v24 = vpop.f32.mrb[101].mxu1  ;;  %v4821_v35 = vadd.f32 1.0, %v8954_v6  ;;  %v7744_v30 = vpop.f32.mrb[121].mxu0  ;;  %v5356_v10 = vld [vmem:[%s10208_s8 + $0x70] sm:$0xff] }
 0x1e7   : > { %v2861_v16 = vpop.f32.mrb[102].mxu1  ;;  %v3651_v1 = vadd.f32 %v10234_v41, %v2859_v28  ;;  %v10341_v7 = vpop.f32.mrb[122].mxu0  ;;  %v777_v41 = vld [vmem:[%s9928_s6 + $0x1a0] sm:$0xff] }
 0x1e8   : > { %v8956_v63 = vpop.eup %8955  ;;  %6677 = vst.msk [vmem:[%s10223_s12 + $0x58] sm:$0xff] %vm6665_vm3, %v6487_v53  ;;  %v2862_v27 = vadd.f32 %v2861_v16, %v776_v19  ;;  %v2863_v40 = vpop.f32.mrb[103].mxu1  ;;  %8965 = vrcp.f32 %v4821_v35  ;;  %v5357_v19 = vld [vmem:[%s10208_s8 + $0x78] sm:$0xff] }
 0x1e9   : > { %v4822_v9 = vadd.f32 1.0, %v8956_v63  ;;  %v7745_v45 = vpop.f32.mrb[123].mxu0  ;;  %v7374_v12 = vmul.f32 -1.442695, %v3651_v1  ;;  %3073 = vmatmul.mubr.bf16.gmra.mrb[208].mxu1 %v8605_v62  ;;  %v780_v62 = vld [vmem:[%s9928_s6 + $0x1b8] sm:$0xff] }
 0x1ea   : > { %v3654_v18 = vadd.f32 %v10240_v23, %v2862_v27  ;;  %v8958_v47 = vpop.eup %8957  ;;  %v5594_v52 = vpop.permute.xlu0 %5593  ;;  %3080 = vmatprep.mubr.bf16.mxu1 %v8606_v54  ;;  %v8614_v63 = vld [vmem:[%s9645_s9 + $0x52c] ss:$12 sps:$4 sm:$0xff]  }
 0x1eb   : > { %8967 = vrcp.f32 %v4822_v9  ;;  %v6488_v20 = vmul.f32 %v5594_v52, %v5354_v38  ;;  %5753 = vperm.xlu0 %8392, %v8958_v47   ;;  %v10355_v55 = vpop.f32.mrb[124].mxu0  ;;  %v8632_v38 = vld [vmem:[%s9645_s9 + $0x590] ss:$12 sps:$4 sm:$0xff]  }
 0x1ec   : > { %8969 = vpow2.f32 %v7374_v12  ;;  %v7375_v44 = vmul.f32 -1.442695, %v3654_v18  ;;  %v2866_v51 = vpop.f32.mrb[104].mxu1  ;;  %v5599_v22 = vpop.permute.xlu1 %5598  ;;  %7855 = vmatmul.mubr.msk.bf16.gmra.mrb[232].mxu0 %vm2334_vm2, %v8628_v0  ;;  %v8617_v0 = vld [vmem:[%s9645_s9 + $0x528] ss:$12 sps:$4 sm:$0xff]  }
 0x1ed   : > { %v8960_v23 = vpop.eup %8959  ;;  %6678 = vst.msk [vmem:[%s10223_s12 + $0x60] sm:$0xff] %vm6665_vm3, %v6488_v20  ;;  %v2867_v29 = vadd.f32 %v2866_v51, %v777_v41  ;;  %v6489_v3 = vmul.f32 %v5599_v22, %v5355_v15  ;;  %v2868_v56 = vpop.f32.mrb[105].mxu1  ;;  %7858 = vmatprep.mubr.msk.bf16.mxu0 %vm9539_vm0, %v9538_v8  ;;  %v5358_v15 = vld [vmem:[%s10208_s8 + $0x80] sm:$0xff] }
 0x1ee   : > { %v8962_v25 = vpop.eup %8961  ;;  %8971 = vpow2.f32 %v7375_v44  ;;  %5758 = vperm.xlu1 %8393, %v8960_v23   ;;  %v2869_v5 = vpop.f32.mrb[106].mxu1 }
 0x1ef   : > { %v4823_v32 = vadd.f32 1.0, %v8962_v25  ;;  %v7748_v43 = vpop.f32.mrb[125].mxu0  ;;  %v3659_v39 = vadd.f32 %v10254_v17, %v2867_v29  ;;  %6679 = vst.msk [vmem:[%s10223_s12 + $0x68] sm:$0xff] %vm6665_vm3, %v6489_v3  ;;  %v2870_v11 = vadd.f32 %v2869_v5, %v778_v49  ;;  %v2871_v13 = vpop.f32.mrb[107].mxu1  ;;  %v779_v17 = vld [vmem:[%s9928_s6 + $0x1b0] sm:$0xff]  ;;  %v5359_v49 = vld [vmem:[%s10208_s8 + $0x88] sm:$0xff] }
 0x1f0   : > { %v8964_v59 = vpop.eup %8963  ;;  %v10361_v42 = vpop.f32.mrb[126].mxu0 }
 0x1f1   : > { %8973 = vrcp.f32 %v4823_v32  ;;  %v4824_v37 = vadd.f32 1.0, %v8964_v59  ;;  %v7749_v26 = vpop.f32.mrb[127].mxu0  ;;  %v7376_v46 = vmul.f32 -1.442695, %v3659_v39  ;;  %v3662_v34 = vadd.f32 %v10260_v33, %v2870_v11  ;;  %3081 = vmatmul.mubr.bf16.gmra.mrb[212].mxu1 %v8609_v2  ;;  %v782_v2 = vld [vmem:[%s9928_s6 + $0x1c8] sm:$0xff] }
 0x1f2   : > { %v8966_v21 = vpop.eup %8965  ;;  %v5604_v48 = vpop.permute.xlu0 %5603  ;;  %3088 = vmatprep.mubr.bf16.mxu1 %v8610_v4  ;;  %v8618_v59 = vld [vmem:[%s9645_s9 + $0x544] ss:$12 sps:$4 sm:$0xff]  }
 0x1f3   : > { %8975 = vrcp.f32 %v4824_v37  ;;  %v7377_v6 = vmul.f32 -1.442695, %v3662_v34  ;;  %v6490_v28 = vmul.f32 %v5604_v48, %v5356_v10  ;;  %5763 = vperm.xlu0 %8392, %v8966_v21   ;;  %v10375_v1 = vpop.f32.mrb[128].mxu0  ;;  %v8636_v10 = vld [vmem:[%s9645_s9 + $0x5a8] ss:$12 sps:$4 sm:$0xff]  }
 0x1f4   : > { %8977 = vpow2.f32 %v7376_v46  ;;  %v2874_v53 = vpop.f32.mrb[108].mxu1  ;;  %v5609_v24 = vpop.permute.xlu1 %5608  ;;  %7859 = vmatmul.mubr.msk.bf16.gmra.mrb[236].mxu0 %vm2334_vm2, %v8632_v38  ;;  %v8621_v38 = vld [vmem:[%s9645_s9 + $0x540] ss:$12 sps:$4 sm:$0xff]  }
 0x1f5   : > { %v8968_v33 = vpop.eup %8967  ;;  %8979 = vpow2.f32 %v7377_v6  ;;  %6680 = vst.msk [vmem:[%s10223_s12 + $0x70] sm:$0xff] %vm6665_vm3, %v6490_v28  ;;  %v2875_v35 = vadd.f32 %v2874_v53, %v779_v17  ;;  %v6491_v16 = vmul.f32 %v5609_v24, %v5357_v19  ;;  %v2876_v30 = vpop.f32.mrb[109].mxu1  ;;  %7862 = vmatprep.mubr.msk.bf16.mxu0 %vm9539_vm0, %v9538_v8  ;;  %v5360_v19 = vld [vmem:[%s10208_s8 + $0x90] sm:$0xff] }
 0x1f6   : > { %v8970_v54 = vpop.eup %8969  ;;  %5768 = vperm.xlu1 %8393, %v8968_v33   ;;  %v2877_v40 = vpop.f32.mrb[110].mxu1 }
 0x1f7   : > { %v4825_v27 = vadd.f32 1.0, %v8970_v54  ;;  %v7752_v9 = vpop.f32.mrb[129].mxu0  ;;  %v3667_v12 = vadd.f32 %v10275_v14, %v2875_v35  ;;  %6681 = vst.msk [vmem:[%s10223_s12 + $0x78] sm:$0xff] %vm6665_vm3, %v6491_v16  ;;  %v2878_v18 = vadd.f32 %v2877_v40, %v780_v62  ;;  %v2879_v47 = vpop.f32.mrb[111].mxu1  ;;  %v781_v14 = vld [vmem:[%s9928_s6 + $0x1c0] sm:$0xff]  ;;  %v5361_v62 = vld [vmem:[%s10208_s8 + $0x98] sm:$0xff] }
 0x1f8   : > { %v8972_v45 = vpop.eup %8971  ;;  %v10381_v52 = vpop.f32.mrb[130].mxu0 }
 0x1f9   : > { %8981 = vrcp.f32 %v4825_v27  ;;  %v4826_v41 = vadd.f32 1.0, %v8972_v45  ;;  %v7753_v44 = vpop.f32.mrb[131].mxu0  ;;  %v7378_v20 = vmul.f32 -1.442695, %v3667_v12  ;;  %v3670_v23 = vadd.f32 %v10281_v57, %v2878_v18  ;;  %3089 = vmatmul.mubr.bf16.gmra.mrb[216].mxu1 %v8613_v31  ;;  %v784_v31 = vld [vmem:[%s9928_s6 + $0x1d8] sm:$0xff] }
 0x1fa   : > { %v5614_v22 = vpop.permute.xlu0 %5613  ;;  %3096 = vmatprep.mubr.bf16.mxu1 %v8614_v63  ;;  %v10395_v39 = vpop.f32.mrb[132].mxu0  ;;  %v8622_v45 = vld [vmem:[%s9645_s9 + $0x55c] ss:$12 sps:$4 sm:$0xff]  }
 0x1fb   : > { %v8974_v51 = vpop.eup %8973  ;;  %8983 = vrcp.f32 %v4826_v41  ;;  %v7379_v25 = vmul.f32 -1.442695, %v3670_v23  ;;  %v6492_v29 = vmul.f32 %v5614_v22, %v5358_v15  ;;  %v7756_v37 = vpop.f32.mrb[133].mxu0  ;;  %v8640_v15 = vld [vmem:[%s9645_s9 + $0x5c0] ss:$12 sps:$4 sm:$0xff]  }
 0x1fc   : > { %8985 = vpow2.f32 %v7378_v20  ;;  %5773 = vperm.xlu0 %8392, %v8974_v51   ;;  %v2882_v3 = vpop.f32.mrb[112].mxu1  ;;  %v5619_v56 = vpop.permute.xlu1 %5618  ;;  %7863 = vmatmul.mubr.msk.bf16.gmra.mrb[240].mxu0 %vm2334_vm2, %v8636_v10  ;;  %v8625_v10 = vld [vmem:[%s9645_s9 + $0x558] ss:$12 sps:$4 sm:$0xff]  }
 0x1fd   : > { %v8976_v57 = vpop.eup %8975  ;;  %8987 = vpow2.f32 %v7379_v25  ;;  %6682 = vst.msk [vmem:[%s10223_s12 + $0x80] sm:$0xff] %vm6665_vm3, %v6492_v29  ;;  %v2883_v32 = vadd.f32 %v2882_v3, %v781_v14  ;;  %v6493_v5 = vmul.f32 %v5619_v56, %v5359_v49  ;;  %v2884_v43 = vpop.f32.mrb[113].mxu1  ;;  %7866 = vmatprep.mubr.msk.bf16.mxu0 %vm9539_vm0, %v9538_v8  ;;  %v5362_v49 = vld [vmem:[%s10208_s8 + $0xa0] sm:$0xff] }
 0x1fe   : > { %v8978_v4 = vpop.eup %8977  ;;  %5778 = vperm.xlu1 %8393, %v8976_v57   ;;  %v2885_v13 = vpop.f32.mrb[114].mxu1 }
 0x1ff   : > { %v4827_v11 = vadd.f32 1.0, %v8978_v4  ;;  %v8980_v26 = vpop.eup %8979  ;;  %v3675_v46 = vadd.f32 %v10295_v50, %v2883_v32  ;;  %6683 = vst.msk [vmem:[%s10223_s12 + $0x88] sm:$0xff] %vm6665_vm3, %v6493_v5  ;;  %v2886_v34 = vadd.f32 %v2885_v13, %v782_v2  ;;  %v2887_v21 = vpop.f32.mrb[115].mxu1  ;;  %v783_v50 = vld [vmem:[%s9928_s6 + $0x1d0] sm:$0xff]  ;;  %v5363_v2 = vld [vmem:[%s10208_s8 + $0xa8] sm:$0xff] }
 0x200   : > { %v10401_v48 = vpop.f32.mrb[134].mxu0  ;;  %v4828_v17 = vadd.f32 1.0, %v8980_v26  ;;  %v8626_v26 = vld [vmem:[%s9645_s9 + $0x574] ss:$12 sps:$4 sm:$0xff]  }
 0x201   : > { %8989 = vrcp.f32 %v4827_v11  ;;  %v7757_v6 = vpop.f32.mrb[135].mxu0  ;;  %v7380_v28 = vmul.f32 -1.442695, %v3675_v46  ;;  %v3678_v33 = vadd.f32 %v10301_v61, %v2886_v34  ;;  %3097 = vmatmul.mubr.bf16.gmra.mrb[220].mxu1 %v8617_v0  ;;  %v786_v0 = vld [vmem:[%s9928_s6 + $0x1e8] sm:$0xff] }
 0x202   : > { %8991 = vrcp.f32 %v4828_v17  ;;  %v5624_v24 = vpop.permute.xlu0 %5623  ;;  %3104 = vmatprep.mubr.bf16.mxu1 %v8618_v59  ;;  %v10415_v12 = vpop.f32.mrb[136].mxu0 }
 0x203   : > { %v8982_v53 = vpop.eup %8981  ;;  %8993 = vpow2.f32 %v7380_v28  ;;  %v7381_v54 = vmul.f32 -1.442695, %v3678_v33  ;;  %v6494_v35 = vmul.f32 %v5624_v24, %v5360_v19  ;;  %v7760_v41 = vpop.f32.mrb[137].mxu0  ;;  %v8644_v19 = vld [vmem:[%s9645_s9 + $0x5d8] ss:$12 sps:$4 sm:$0xff]  }
 0x204   : > { %5783 = vperm.xlu0 %8392, %v8982_v53   ;;  %v2890_v16 = vpop.f32.mrb[116].mxu1  ;;  %v5629_v30 = vpop.permute.xlu1 %5628  ;;  %7867 = vmatmul.mubr.msk.bf16.gmra.mrb[244].mxu0 %vm2334_vm2, %v8640_v15  ;;  %v8629_v15 = vld [vmem:[%s9645_s9 + $0x570] ss:$12 sps:$4 sm:$0xff]  }
 0x205   : > { %v8984_v61 = vpop.eup %8983  ;;  %8995 = vpow2.f32 %v7381_v54  ;;  %6684 = vst.msk [vmem:[%s10223_s12 + $0x90] sm:$0xff] %vm6665_vm3, %v6494_v35  ;;  %v2891_v27 = vadd.f32 %v2890_v16, %v783_v50  ;;  %v6495_v40 = vmul.f32 %v5629_v30, %v5361_v62  ;;  %v2892_v9 = vpop.f32.mrb[117].mxu1  ;;  %7870 = vmatprep.mubr.msk.bf16.mxu0 %vm9539_vm0, %v9538_v8  ;;  %v5364_v62 = vld [vmem:[%s10208_s8 + $0xb0] sm:$0xff] }
 0x206   : > { %v8986_v63 = vpop.eup %8985  ;;  %5788 = vperm.xlu1 %8393, %v8984_v61   ;;  %v2893_v47 = vpop.f32.mrb[118].mxu1 }
 0x207   : > { %v4829_v18 = vadd.f32 1.0, %v8986_v63  ;;  %v8988_v44 = vpop.eup %8987  ;;  %v3683_v20 = vadd.f32 %v10315_v60, %v2891_v27  ;;  %6685 = vst.msk [vmem:[%s10223_s12 + $0x98] sm:$0xff] %vm6665_vm3, %v6495_v40  ;;  %v2894_v23 = vadd.f32 %v2893_v47, %v784_v31  ;;  %v2895_v51 = vpop.f32.mrb[119].mxu1  ;;  %v785_v60 = vld [vmem:[%s9928_s6 + $0x1e0] sm:$0xff]  ;;  %v5365_v31 = vld [vmem:[%s10208_s8 + $0xb8] sm:$0xff] }
 0x208   : > { %v10421_v22 = vpop.f32.mrb[138].mxu0  ;;  %v4830_v14 = vadd.f32 1.0, %v8988_v44  ;;  %v8630_v44 = vld [vmem:[%s9645_s9 + $0x58c] ss:$12 sps:$4 sm:$0xff]  }
 0x209   : > { %8997 = vrcp.f32 %v4829_v18  ;;  %v7761_v25 = vpop.f32.mrb[139].mxu0  ;;  %v7382_v29 = vmul.f32 -1.442695, %v3683_v20  ;;  %v3686_v57 = vadd.f32 %v10321_v36, %v2894_v23  ;;  %3105 = vmatmul.mubr.bf16.gmra.mrb[224].mxu1 %v8621_v38  ;;  %v788_v38 = vld [vmem:[%s9928_s6 + $0x1f8] sm:$0xff] }
 0x20a   : > { %8999 = vrcp.f32 %v4830_v14  ;;  %v5634_v56 = vpop.permute.xlu0 %5633  ;;  %3112 = vmatprep.mubr.bf16.mxu1 %v8622_v45  ;;  %v10435_v46 = vpop.f32.mrb[140].mxu0 }
 0x20b   : > { %v8990_v3 = vpop.eup %8989  ;;  %9001 = vpow2.f32 %v7382_v29  ;;  %v7383_v4 = vmul.f32 -1.442695, %v3686_v57  ;;  %v6496_v32 = vmul.f32 %v5634_v56, %v5362_v49  ;;  %v7764_v17 = vpop.f32.mrb[141].mxu0  ;;  %v8648_v49 = vld [vmem:[%s9645_s9 + $0x5f0] ss:$12 sps:$4 sm:$0xff]  }
 0x20c   : > { %5793 = vperm.xlu0 %8392, %v8990_v3   ;;  %v8992_v36 = vpop.eup %8991  ;;  %v2898_v5 = vpop.f32.mrb[120].mxu1  ;;  %7871 = vmatmul.mubr.msk.bf16.gmra.mrb[248].mxu0 %vm2334_vm2, %v8644_v19  ;;  %v8633_v19 = vld [vmem:[%s9645_s9 + $0x588] ss:$12 sps:$4 sm:$0xff]  }
 0x20d   : > { %v5639_v43 = vpop.permute.xlu1 %5638  ;;  %v8994_v59 = vpop.eup %8993  ;;  %9003 = vpow2.f32 %v7383_v4  ;;  %6686 = vst.msk [vmem:[%s10223_s12 + $0xa0] sm:$0xff] %vm6665_vm3, %v6496_v32  ;;  %v2899_v11 = vadd.f32 %v2898_v5, %v785_v60  ;;  %5798 = vperm.xlu1 %8393, %v8992_v36   ;;  %7874 = vmatprep.mubr.msk.bf16.mxu0 %vm9539_vm0, %v9538_v8 }
 0x20e   : > { %v6497_v13 = vmul.f32 %v5639_v43, %v5363_v2  ;;  %v2900_v37 = vpop.f32.mrb[121].mxu1  ;;  %v4831_v34 = vadd.f32 1.0, %v8994_v59  ;;  %v10441_v24 = vpop.f32.mrb[142].mxu0  ;;  %v5366_v2 = vld [vmem:[%s10208_s8 + $0xc0] sm:$0xff] }
 0x20f   : > { %v2901_v21 = vpop.f32.mrb[122].mxu1  ;;  %v8996_v6 = vpop.eup %8995  ;;  %v3691_v28 = vadd.f32 %v10335_v58, %v2899_v11  ;;  %v787_v58 = vld [vmem:[%s9928_s6 + $0x1f0] sm:$0xff] }
 0x210   : > { %6687 = vst.msk [vmem:[%s10223_s12 + $0xa8] sm:$0xff] %vm6665_vm3, %v6497_v13  ;;  %v2902_v33 = vadd.f32 %v2901_v21, %v786_v0  ;;  %v2903_v53 = vpop.f32.mrb[123].mxu1  ;;  %9005 = vrcp.f32 %v4831_v34  ;;  %v4832_v50 = vadd.f32 1.0, %v8996_v6  ;;  %v7765_v54 = vpop.f32.mrb[143].mxu0  ;;  %v5367_v0 = vld [vmem:[%s10208_s8 + $0xc8] sm:$0xff] }
 0x211   : > { %v7384_v35 = vmul.f32 -1.442695, %v3691_v28  ;;  %3113 = vmatmul.mubr.bf16.gmra.mrb[228].mxu1 %v8625_v10  ;;  %v10455_v20 = vpop.f32.mrb[144].mxu0  ;;  %v790_v10 = vld [vmem:[%s9928_s6 + $0x208] sm:$0xff]  ;;  %v8634_v6 = vld [vmem:[%s9645_s9 + $0x5a4] ss:$12 sps:$4 sm:$0xff]  }
 0x212   : > { %v3694_v61 = vadd.f32 %v10341_v7, %v2902_v33  ;;  %9007 = vrcp.f32 %v4832_v50  ;;  %v5644_v30 = vpop.permute.xlu0 %5643  ;;  %3120 = vmatprep.mubr.bf16.mxu1 %v8626_v26  ;;  %v7768_v14 = vpop.f32.mrb[145].mxu0 }
 0x213   : > { %v8998_v16 = vpop.eup %8997  ;;  %9009 = vpow2.f32 %v7384_v35  ;;  %v6498_v27 = vmul.f32 %v5644_v30, %v5364_v62  ;;  %v10461_v56 = vpop.f32.mrb[146].mxu0  ;;  %v8653_v62 = vld [vmem:[%s9645_s9 + $0x608] ss:$12 sps:$4 sm:$0xff]  }
 0x214   : > { %v7385_v63 = vmul.f32 -1.442695, %v3694_v61  ;;  %5803 = vperm.xlu0 %8392, %v8998_v16   ;;  %v9000_v7 = vpop.eup %8999  ;;  %v2906_v40 = vpop.f32.mrb[124].mxu1  ;;  %7875 = vmatmul.mubr.msk.bf16.gmra.mrb[252].mxu0 %vm2334_vm2, %v8648_v49  ;;  %v8637_v49 = vld [vmem:[%s9645_s9 + $0x5a0] ss:$12 sps:$4 sm:$0xff]  }
 0x215   : > { %v5649_v9 = vpop.permute.xlu1 %5648  ;;  %v9002_v45 = vpop.eup %9001  ;;  %6688 = vst.msk [vmem:[%s10223_s12 + $0xb0] sm:$0xff] %vm6665_vm3, %v6498_v27  ;;  %v2907_v18 = vadd.f32 %v2906_v40, %v787_v58  ;;  %5808 = vperm.xlu1 %8393, %v9000_v7   ;;  %7878 = vmatprep.mubr.msk.bf16.mxu0 %vm9539_vm0, %v9538_v8 }
 0x216   : > { %9011 = vpow2.f32 %v7385_v63  ;;  %v6499_v47 = vmul.f32 %v5649_v9, %v5365_v31  ;;  %v2908_v41 = vpop.f32.mrb[125].mxu1  ;;  %v4833_v23 = vadd.f32 1.0, %v9002_v45  ;;  %v7769_v4 = vpop.f32.mrb[147].mxu0  ;;  %v5368_v31 = vld [vmem:[%s10208_s8 + $0xd0] sm:$0xff] }
 0x217   : > { %v2909_v51 = vpop.f32.mrb[126].mxu1  ;;  %v9004_v25 = vpop.eup %9003  ;;  %v3699_v29 = vadd.f32 %v10355_v55, %v2907_v18  ;;  %v789_v55 = vld [vmem:[%s9928_s6 + $0x200] sm:$0xff] }
 0x218   : > { %6689 = vst.msk [vmem:[%s10223_s12 + $0xb8] sm:$0xff] %vm6665_vm3, %v6499_v47  ;;  %v2910_v57 = vadd.f32 %v2909_v51, %v788_v38  ;;  %v2911_v3 = vpop.f32.mrb[127].mxu1  ;;  %9013 = vrcp.f32 %v4833_v23  ;;  %v4834_v60 = vadd.f32 1.0, %v9004_v25  ;;  %v10475_v28 = vpop.f32.mrb[148].mxu0  ;;  %v5369_v38 = vld [vmem:[%s10208_s8 + $0xd8] sm:$0xff] }
 0x219   : > { %v7386_v32 = vmul.f32 -1.442695, %v3699_v29  ;;  %3121 = vmatmul.mubr.bf16.gmra.mrb[232].mxu1 %v8629_v15  ;;  %v7772_v50 = vpop.f32.mrb[149].mxu0  ;;  %v792_v15 = vld [vmem:[%s9928_s6 + $0x218] sm:$0xff] }
 0x21a   : > { %v3702_v36 = vadd.f32 %v10361_v42, %v2910_v57  ;;  %v9006_v5 = vpop.eup %9005  ;;  %9015 = vrcp.f32 %v4834_v60  ;;  %v5654_v43 = vpop.permute.xlu0 %5653  ;;  %3128 = vmatprep.mubr.bf16.mxu1 %v8630_v44  ;;  %v8638_v25 = vld [vmem:[%s9645_s9 + $0x5bc] ss:$12 sps:$4 sm:$0xff]  }
 0x21b   : > { %9017 = vpow2.f32 %v7386_v32  ;;  %v6500_v11 = vmul.f32 %v5654_v43, %v5366_v2  ;;  %5813 = vperm.xlu0 %8392, %v9006_v5   ;;  %v10481_v30 = vpop.f32.mrb[150].mxu0  ;;  %v8657_v2 = vld [vmem:[%s9645_s9 + $0x620] ss:$12 sps:$4 sm:$0xff]  }
 0x21c   : > { %v7387_v59 = vmul.f32 -1.442695, %v3702_v36  ;;  %v9008_v42 = vpop.eup %9007  ;;  %v2914_v13 = vpop.f32.mrb[128].mxu1  ;;  %7879 = vmatmul.mubr.msk.bf16.gmra.mrb[0].mxu0 %vm2334_vm2, %v8653_v62  ;;  %v8641_v62 = vld [vmem:[%s9645_s9 + $0x5b8] ss:$12 sps:$4 sm:$0xff]  }
 0x21d   : > { %v5659_v37 = vpop.permute.xlu1 %5658  ;;  %v9010_v26 = vpop.eup %9009  ;;  %6690 = vst.msk [vmem:[%s10223_s12 + $0xc0] sm:$0xff] %vm6665_vm3, %v6500_v11  ;;  %v2915_v34 = vadd.f32 %v2914_v13, %v789_v55  ;;  %5818 = vperm.xlu1 %8393, %v9008_v42   ;;  %7882 = vmatprep.mubr.msk.bf16.mxu0 %vm9539_vm0, %v9538_v8 }
 0x21e   : > { %9019 = vpow2.f32 %v7387_v59  ;;  %v6501_v21 = vmul.f32 %v5659_v37, %v5367_v0  ;;  %v2916_v17 = vpop.f32.mrb[129].mxu1  ;;  %v4835_v33 = vadd.f32 1.0, %v9010_v26  ;;  %v7773_v63 = vpop.f32.mrb[151].mxu0  ;;  %v5370_v0 = vld [vmem:[%s10208_s8 + $0xe0] sm:$0xff] }
 0x21f   : > { %v2917_v53 = vpop.f32.mrb[130].mxu1  ;;  %v3707_v35 = vadd.f32 %v10375_v1, %v2915_v34  ;;  %v791_v1 = vld [vmem:[%s9928_s6 + $0x210] sm:$0xff]  ;;  %v10495_v29 = vpop.f32.mrb[152].mxu0 }
 0x220   : > { %v9012_v54 = vpop.eup %9011  ;;  %6691 = vst.msk [vmem:[%s10223_s12 + $0xc8] sm:$0xff] %vm6665_vm3, %v6501_v21  ;;  %v2918_v61 = vadd.f32 %v2917_v53, %v790_v10  ;;  %v2919_v16 = vpop.f32.mrb[131].mxu1  ;;  %9021 = vrcp.f32 %v4835_v33  ;;  %v5371_v10 = vld [vmem:[%s10208_s8 + $0xe8] sm:$0xff] }
 0x221   : > { %v4836_v58 = vadd.f32 1.0, %v9012_v54  ;;  %v7388_v27 = vmul.f32 -1.442695, %v3707_v35  ;;  %3129 = vmatmul.mubr.bf16.gmra.mrb[236].mxu1 %v8633_v19  ;;  %v7776_v60 = vpop.f32.mrb[153].mxu0  ;;  %v794_v19 = vld [vmem:[%s9928_s6 + $0x228] sm:$0xff] }
 0x222   : > { %v3710_v7 = vadd.f32 %v10381_v52, %v2918_v61  ;;  %v9014_v40 = vpop.eup %9013  ;;  %v5664_v9 = vpop.permute.xlu0 %5663  ;;  %3136 = vmatprep.mubr.bf16.mxu1 %v8634_v6  ;;  %v8642_v54 = vld [vmem:[%s9645_s9 + $0x5d4] ss:$12 sps:$4 sm:$0xff]  }
 0x223   : > { %9023 = vrcp.f32 %v4836_v58  ;;  %v6502_v18 = vmul.f32 %v5664_v9, %v5368_v31  ;;  %5823 = vperm.xlu0 %8392, %v9014_v40   ;;  %v10501_v43 = vpop.f32.mrb[154].mxu0  ;;  %v8661_v31 = vld [vmem:[%s9645_s9 + $0x638] ss:$12 sps:$4 sm:$0xff]  }
 0x224   : > { %9025 = vpow2.f32 %v7388_v27  ;;  %v7389_v45 = vmul.f32 -1.442695, %v3710_v7  ;;  %v9016_v52 = vpop.eup %9015  ;;  %v2922_v47 = vpop.f32.mrb[132].mxu1  ;;  %7883 = vmatmul.mubr.msk.bf16.gmra.mrb[4].mxu0 %vm2334_vm2, %v8657_v2  ;;  %v8645_v2 = vld [vmem:[%s9645_s9 + $0x5d0] ss:$12 sps:$4 sm:$0xff]  }
 0x225   : > { %v5669_v41 = vpop.permute.xlu1 %5668  ;;  %v9018_v44 = vpop.eup %9017  ;;  %6692 = vst.msk [vmem:[%s10223_s12 + $0xd0] sm:$0xff] %vm6665_vm3, %v6502_v18  ;;  %v2923_v23 = vadd.f32 %v2922_v47, %v791_v1  ;;  %5828 = vperm.xlu1 %8393, %v9016_v52   ;;  %7886 = vmatprep.mubr.msk.bf16.mxu0 %vm9539_vm0, %v9538_v8 }
 0x226   : > { %9027 = vpow2.f32 %v7389_v45  ;;  %v6503_v51 = vmul.f32 %v5669_v41, %v5369_v38  ;;  %v2924_v14 = vpop.f32.mrb[133].mxu1  ;;  %v4837_v57 = vadd.f32 1.0, %v9018_v44  ;;  %v7777_v59 = vpop.f32.mrb[155].mxu0  ;;  %v5372_v38 = vld [vmem:[%s10208_s8 + $0xf0] sm:$0xff] }
 0x227   : > { %v2925_v3 = vpop.f32.mrb[134].mxu1  ;;  %v3715_v32 = vadd.f32 %v10395_v39, %v2923_v23  ;;  %v793_v39 = vld [vmem:[%s9928_s6 + $0x220] sm:$0xff]  ;;  %v10515_v35 = vpop.f32.mrb[156].mxu0 }
 0x228   : > { %v9020_v4 = vpop.eup %9019  ;;  %6693 = vst.msk [vmem:[%s10223_s12 + $0xd8] sm:$0xff] %vm6665_vm3, %v6503_v51  ;;  %v2926_v36 = vadd.f32 %v2925_v3, %v792_v15  ;;  %v2927_v5 = vpop.f32.mrb[135].mxu1  ;;  %9029 = vrcp.f32 %v4837_v57  ;;  %v5373_v15 = vld [vmem:[%s10208_s8 + $0xf8] sm:$0xff] }
 0x229   : > { %v4838_v55 = vadd.f32 1.0, %v9020_v4  ;;  %v7390_v11 = vmul.f32 -1.442695, %v3715_v32  ;;  %3137 = vmatmul.mubr.bf16.gmra.mrb[240].mxu1 %v8637_v49  ;;  %v7780_v58 = vpop.f32.mrb[157].mxu0  ;;  %v796_v49 = vld [vmem:[%s9928_s6 + $0x238] sm:$0xff] }
 0x22a   : > { %v3718_v42 = vadd.f32 %v10401_v48, %v2926_v36  ;;  %v9022_v13 = vpop.eup %9021  ;;  %v5674_v37 = vpop.permute.xlu0 %5673  ;;  %3144 = vmatprep.mubr.bf16.mxu1 %v8638_v25  ;;  %v8646_v4 = vld [vmem:[%s9645_s9 + $0x5ec] ss:$12 sps:$4 sm:$0xff]  }
 0x22b   : > { %9031 = vrcp.f32 %v4838_v55  ;;  %v6504_v34 = vmul.f32 %v5674_v37, %v5370_v0  ;;  %5833 = vperm.xlu0 %8392, %v9022_v13   ;;  %v10521_v9 = vpop.f32.mrb[158].mxu0  ;;  %v8665_v0 = vld [vmem:[%s9645_s9 + $0x650] ss:$12 sps:$4 sm:$0xff]  }
 0x22c   : > { %9033 = vpow2.f32 %v7390_v11  ;;  %v7391_v26 = vmul.f32 -1.442695, %v3718_v42  ;;  %v2930_v21 = vpop.f32.mrb[136].mxu1  ;;  %v5679_v17 = vpop.permute.xlu1 %5678  ;;  %7887 = vmatmul.mubr.msk.bf16.gmra.mrb[8].mxu0 %vm2334_vm2, %v8661_v31  ;;  %v8649_v31 = vld [vmem:[%s9645_s9 + $0x5e8] ss:$12 sps:$4 sm:$0xff]  }
 0x22d   : > { %v9024_v48 = vpop.eup %9023  ;;  %6694 = vst.msk [vmem:[%s10223_s12 + $0xe0] sm:$0xff] %vm6665_vm3, %v6504_v34  ;;  %v2931_v33 = vadd.f32 %v2930_v21, %v793_v39  ;;  %v6505_v53 = vmul.f32 %v5679_v17, %v5371_v10  ;;  %v2932_v50 = vpop.f32.mrb[137].mxu1  ;;  %7890 = vmatprep.mubr.msk.bf16.mxu0 %vm9539_vm0, %v9538_v8  ;;  %v5374_v10 = vld [vmem:[%s10208_s8 + $0x100] sm:$0xff] }
 0x22e   : > { %v9026_v6 = vpop.eup %9025  ;;  %9035 = vpow2.f32 %v7391_v26  ;;  %5838 = vperm.xlu1 %8393, %v9024_v48   ;;  %v2933_v16 = vpop.f32.mrb[138].mxu1 }
 0x22f   : > { %v4839_v61 = vadd.f32 1.0, %v9026_v6  ;;  %v3723_v27 = vadd.f32 %v10415_v12, %v2931_v33  ;;  %6695 = vst.msk [vmem:[%s10223_s12 + $0xe8] sm:$0xff] %vm6665_vm3, %v6505_v53  ;;  %v2934_v7 = vadd.f32 %v2933_v16, %v794_v19  ;;  %v2935_v40 = vpop.f32.mrb[139].mxu1  ;;  %v7781_v45 = vpop.f32.mrb[159].mxu0  ;;  %v795_v12 = vld [vmem:[%s9928_s6 + $0x230] sm:$0xff]  ;;  %v5375_v19 = vld [vmem:[%s10208_s8 + $0x108] sm:$0xff] }
 0x230   : > { %v9028_v63 = vpop.eup %9027  ;;  %v10535_v32 = vpop.f32.mrb[160].mxu0 }
 0x231   : > { %9037 = vrcp.f32 %v4839_v61  ;;  %v4840_v1 = vadd.f32 1.0, %v9028_v63  ;;  %v7392_v18 = vmul.f32 -1.442695, %v3723_v27  ;;  %v3726_v52 = vadd.f32 %v10421_v22, %v2934_v7  ;;  %3145 = vmatmul.mubr.bf16.gmra.mrb[244].mxu1 %v8641_v62  ;;  %v7784_v55 = vpop.f32.mrb[161].mxu0  ;;  %v798_v62 = vld [vmem:[%s9928_s6 + $0x248] sm:$0xff] }
 0x232   : > { %v9030_v47 = vpop.eup %9029  ;;  %v5684_v41 = vpop.permute.xlu0 %5683  ;;  %3152 = vmatprep.mubr.bf16.mxu1 %v8642_v54  ;;  %v8652_v63 = vld [vmem:[%s9645_s9 + $0x604] ss:$12 sps:$4 sm:$0xff]  }
 0x233   : > { %9039 = vrcp.f32 %v4840_v1  ;;  %v7393_v44 = vmul.f32 -1.442695, %v3726_v52  ;;  %v6506_v23 = vmul.f32 %v5684_v41, %v5372_v38  ;;  %5843 = vperm.xlu0 %8392, %v9030_v47   ;;  %v10541_v37 = vpop.f32.mrb[162].mxu0  ;;  %v8669_v38 = vld [vmem:[%s9645_s9 + $0x668] ss:$12 sps:$4 sm:$0xff]  }
 0x234   : > { %9041 = vpow2.f32 %v7392_v18  ;;  %v2938_v51 = vpop.f32.mrb[140].mxu1  ;;  %v5689_v14 = vpop.permute.xlu1 %5688  ;;  %7891 = vmatmul.mubr.msk.bf16.gmra.mrb[12].mxu0 %vm2334_vm2, %v8665_v0  ;;  %v8650_v0 = vld [vmem:[%s9645_s9 + $0x600] ss:$12 sps:$4 sm:$0xff]  }
 0x235   : > { %v9032_v22 = vpop.eup %9031  ;;  %9043 = vpow2.f32 %v7393_v44  ;;  %6696 = vst.msk [vmem:[%s10223_s12 + $0xf0] sm:$0xff] %vm6665_vm3, %v6506_v23  ;;  %v2939_v57 = vadd.f32 %v2938_v51, %v795_v12  ;;  %v6507_v3 = vmul.f32 %v5689_v14, %v5373_v15  ;;  %v2940_v60 = vpop.f32.mrb[141].mxu1  ;;  %7894 = vmatprep.mubr.msk.bf16.mxu0 %vm9539_vm0, %v9538_v8  ;;  %v5376_v15 = vld [vmem:[%s10208_s8 + $0x110] sm:$0xff] }
 0x236   : > { %v9034_v25 = vpop.eup %9033  ;;  %5848 = vperm.xlu1 %8393, %v9032_v22   ;;  %v2941_v5 = vpop.f32.mrb[142].mxu1 }
 0x237   : > { %v4841_v36 = vadd.f32 1.0, %v9034_v25  ;;  %v3731_v11 = vadd.f32 %v10435_v46, %v2939_v57  ;;  %6697 = vst.msk [vmem:[%s10223_s12 + $0xf8] sm:$0xff] %vm6665_vm3, %v6507_v3  ;;  %v2942_v42 = vadd.f32 %v2941_v5, %v796_v49  ;;  %v2943_v13 = vpop.f32.mrb[143].mxu1  ;;  %v7785_v26 = vpop.f32.mrb[163].mxu0  ;;  %v797_v46 = vld [vmem:[%s9928_s6 + $0x240] sm:$0xff]  ;;  %v5377_v49 = vld [vmem:[%s10208_s8 + $0x118] sm:$0xff] }
 0x238   : > { %v9036_v59 = vpop.eup %9035  ;;  %v10555_v27 = vpop.f32.mrb[164].mxu0 }
 0x239   : > { %9045 = vrcp.f32 %v4841_v36  ;;  %v4842_v39 = vadd.f32 1.0, %v9036_v59  ;;  %v7394_v34 = vmul.f32 -1.442695, %v3731_v11  ;;  %v3734_v48 = vadd.f32 %v10441_v24, %v2942_v42  ;;  %3153 = vmatmul.mubr.bf16.gmra.mrb[248].mxu1 %v8645_v2  ;;  %v7788_v1 = vpop.f32.mrb[165].mxu0  ;;  %v800_v2 = vld [vmem:[%s9928_s6 + $0x258] sm:$0xff] }
 0x23a   : > { %v5694_v17 = vpop.permute.xlu0 %5693  ;;  %3160 = vmatprep.mubr.bf16.mxu1 %v8646_v4  ;;  %v10561_v41 = vpop.f32.mrb[166].mxu0  ;;  %v8656_v59 = vld [vmem:[%s9645_s9 + $0x61c] ss:$12 sps:$4 sm:$0xff]  }
 0x23b   : > { %v9038_v21 = vpop.eup %9037  ;;  %9047 = vrcp.f32 %v4842_v39  ;;  %v7395_v6 = vmul.f32 -1.442695, %v3734_v48  ;;  %v6508_v33 = vmul.f32 %v5694_v17, %v5374_v10  ;;  %v7789_v44 = vpop.f32.mrb[167].mxu0  ;;  %v8673_v10 = vld [vmem:[%s9645_s9 + $0x680] ss:$12 sps:$4 sm:$0xff]  }
 0x23c   : > { %9049 = vpow2.f32 %v7394_v34  ;;  %5853 = vperm.xlu0 %8392, %v9038_v21   ;;  %v2946_v53 = vpop.f32.mrb[144].mxu1  ;;  %v5699_v50 = vpop.permute.xlu1 %5698  ;;  %7895 = vmatmul.mubr.msk.bf16.gmra.mrb[16].mxu0 %vm2334_vm2, %v8669_v38  ;;  %v8654_v38 = vld [vmem:[%s9645_s9 + $0x618] ss:$12 sps:$4 sm:$0xff]  }
 0x23d   : > { %v9040_v24 = vpop.eup %9039  ;;  %9051 = vpow2.f32 %v7395_v6  ;;  %6698 = vst.msk [vmem:[%s10223_s12 + $0x100] sm:$0xff] %vm6665_vm3, %v6508_v33  ;;  %v2947_v61 = vadd.f32 %v2946_v53, %v797_v46  ;;  %v6509_v16 = vmul.f32 %v5699_v50, %v5375_v19  ;;  %v2948_v58 = vpop.f32.mrb[145].mxu1  ;;  %7898 = vmatprep.mubr.msk.bf16.mxu0 %vm9539_vm0, %v9538_v8  ;;  %v5378_v19 = vld [vmem:[%s10208_s8 + $0x120] sm:$0xff] }
 0x23e   : > { %v9042_v54 = vpop.eup %9041  ;;  %5858 = vperm.xlu1 %8393, %v9040_v24   ;;  %v2949_v40 = vpop.f32.mrb[146].mxu1 }
 0x23f   : > { %v4843_v7 = vadd.f32 1.0, %v9042_v54  ;;  %v9044_v45 = vpop.eup %9043  ;;  %v3739_v18 = vadd.f32 %v10455_v20, %v2947_v61  ;;  %6699 = vst.msk [vmem:[%s10223_s12 + $0x108] sm:$0xff] %vm6665_vm3, %v6509_v16  ;;  %v2950_v52 = vadd.f32 %v2949_v40, %v798_v62  ;;  %v2951_v47 = vpop.f32.mrb[147].mxu1  ;;  %v799_v20 = vld [vmem:[%s9928_s6 + $0x250] sm:$0xff]  ;;  %v5379_v62 = vld [vmem:[%s10208_s8 + $0x128] sm:$0xff] }
 0x240   : > { %v4844_v12 = vadd.f32 1.0, %v9044_v45  ;;  %v10575_v11 = vpop.f32.mrb[168].mxu0  ;;  %v8660_v45 = vld [vmem:[%s9645_s9 + $0x634] ss:$12 sps:$4 sm:$0xff]  }
 0x241   : > { %9053 = vrcp.f32 %v4843_v7  ;;  %v7396_v23 = vmul.f32 -1.442695, %v3739_v18  ;;  %v3742_v22 = vadd.f32 %v10461_v56, %v2950_v52  ;;  %3161 = vmatmul.mubr.bf16.gmra.mrb[252].mxu1 %v8649_v31  ;;  %v7792_v39 = vpop.f32.mrb[169].mxu0  ;;  %v802_v31 = vld [vmem:[%s9928_s6 + $0x268] sm:$0xff] }
 0x242   : > { %9055 = vrcp.f32 %v4844_v12  ;;  %v5704_v14 = vpop.permute.xlu0 %5703  ;;  %3168 = vmatprep.mubr.bf16.mxu1 %v8652_v63  ;;  %v10581_v17 = vpop.f32.mrb[170].mxu0 }
 0x243   : > { %v9046_v51 = vpop.eup %9045  ;;  %9057 = vpow2.f32 %v7396_v23  ;;  %v7397_v25 = vmul.f32 -1.442695, %v3742_v22  ;;  %v6510_v57 = vmul.f32 %v5704_v14, %v5376_v15  ;;  %v7793_v6 = vpop.f32.mrb[171].mxu0  ;;  %v8677_v15 = vld [vmem:[%s9645_s9 + $0x698] ss:$12 sps:$4 sm:$0xff]  }
 0x244   : > { %5863 = vperm.xlu0 %8392, %v9046_v51   ;;  %v2954_v3 = vpop.f32.mrb[148].mxu1  ;;  %v5709_v60 = vpop.permute.xlu1 %5708  ;;  %7899 = vmatmul.mubr.msk.bf16.gmra.mrb[20].mxu0 %vm2334_vm2, %v8673_v10  ;;  %v8658_v10 = vld [vmem:[%s9645_s9 + $0x630] ss:$12 sps:$4 sm:$0xff]  }
 0x245   : > { %v9048_v56 = vpop.eup %9047  ;;  %9059 = vpow2.f32 %v7397_v25  ;;  %6700 = vst.msk [vmem:[%s10223_s12 + $0x110] sm:$0xff] %vm6665_vm3, %v6510_v57  ;;  %v2955_v36 = vadd.f32 %v2954_v3, %v799_v20  ;;  %v6511_v5 = vmul.f32 %v5709_v60, %v5377_v49  ;;  %v2956_v55 = vpop.f32.mrb[149].mxu1  ;;  %7902 = vmatprep.mubr.msk.bf16.mxu0 %vm9539_vm0, %v9538_v8  ;;  %v5380_v49 = vld [vmem:[%s10208_s8 + $0x130] sm:$0xff] }
 0x246   : > { %v9050_v4 = vpop.eup %9049  ;;  %5868 = vperm.xlu1 %8393, %v9048_v56   ;;  %v2957_v13 = vpop.f32.mrb[150].mxu1 }
 0x247   : > { %v4845_v42 = vadd.f32 1.0, %v9050_v4  ;;  %v9052_v26 = vpop.eup %9051  ;;  %v3747_v34 = vadd.f32 %v10475_v28, %v2955_v36  ;;  %6701 = vst.msk [vmem:[%s10223_s12 + $0x118] sm:$0xff] %vm6665_vm3, %v6511_v5  ;;  %v2958_v48 = vadd.f32 %v2957_v13, %v800_v2  ;;  %v2959_v21 = vpop.f32.mrb[151].mxu1  ;;  %v801_v28 = vld [vmem:[%s9928_s6 + $0x260] sm:$0xff]  ;;  %v5381_v2 = vld [vmem:[%s10208_s8 + $0x138] sm:$0xff] }
 0x248   : > { %v4846_v46 = vadd.f32 1.0, %v9052_v26  ;;  %v10595_v18 = vpop.f32.mrb[172].mxu0  ;;  %v8664_v26 = vld [vmem:[%s9645_s9 + $0x64c] ss:$12 sps:$4 sm:$0xff]  }
 0x249   : > { %9061 = vrcp.f32 %v4845_v42  ;;  %v7398_v33 = vmul.f32 -1.442695, %v3747_v34  ;;  %v3750_v24 = vadd.f32 %v10481_v30, %v2958_v48  ;;  %3169 = vmatmul.mubr.bf16.gmra.mrb[148].mxu1 %v8650_v0  ;;  %v7796_v12 = vpop.f32.mrb[173].mxu0  ;;  %v804_v0 = vld [vmem:[%s9928_s6 + $0x278] sm:$0xff] }
 0x24a   : > { %9063 = vrcp.f32 %v4846_v46  ;;  %v5714_v50 = vpop.permute.xlu0 %5713  ;;  %3176 = vmatprep.mubr.bf16.mxu1 %v8656_v59  ;;  %v10601_v14 = vpop.f32.mrb[174].mxu0 }
 0x24b   : > { %v9054_v53 = vpop.eup %9053  ;;  %9065 = vpow2.f32 %v7398_v33  ;;  %v7399_v54 = vmul.f32 -1.442695, %v3750_v24  ;;  %v6512_v61 = vmul.f32 %v5714_v50, %v5378_v19  ;;  %v7797_v25 = vpop.f32.mrb[175].mxu0  ;;  %v8681_v19 = vld [vmem:[%s9645_s9 + $0x6b0] ss:$12 sps:$4 sm:$0xff]  }
 0x24c   : > { %5873 = vperm.xlu0 %8392, %v9054_v53   ;;  %v9056_v30 = vpop.eup %9055  ;;  %v2962_v16 = vpop.f32.mrb[152].mxu1  ;;  %7903 = vmatmul.mubr.msk.bf16.gmra.mrb[24].mxu0 %vm2334_vm2, %v8677_v15  ;;  %v8662_v15 = vld [vmem:[%s9645_s9 + $0x648] ss:$12 sps:$4 sm:$0xff]  }
 0x24d   : > { %v5719_v58 = vpop.permute.xlu1 %5718  ;;  %v9058_v63 = vpop.eup %9057  ;;  %9067 = vpow2.f32 %v7399_v54  ;;  %6702 = vst.msk [vmem:[%s10223_s12 + $0x120] sm:$0xff] %vm6665_vm3, %v6512_v61  ;;  %v2963_v7 = vadd.f32 %v2962_v16, %v801_v28  ;;  %5878 = vperm.xlu1 %8393, %v9056_v30   ;;  %7906 = vmatprep.mubr.msk.bf16.mxu0 %vm9539_vm0, %v9538_v8 }
 0x24e   : > { %v6513_v40 = vmul.f32 %v5719_v58, %v5379_v62  ;;  %v2964_v1 = vpop.f32.mrb[153].mxu1  ;;  %v4847_v52 = vadd.f32 1.0, %v9058_v63  ;;  %v5382_v62 = vld [vmem:[%s10208_s8 + $0x140] sm:$0xff] }
 0x24f   : > { %v2965_v47 = vpop.f32.mrb[154].mxu1  ;;  %v9060_v44 = vpop.eup %9059  ;;  %v3755_v23 = vadd.f32 %v10495_v29, %v2963_v7  ;;  %v803_v29 = vld [vmem:[%s9928_s6 + $0x270] sm:$0xff] }
 0x250   : > { %6703 = vst.msk [vmem:[%s10223_s12 + $0x128] sm:$0xff] %vm6665_vm3, %v6513_v40  ;;  %v2966_v22 = vadd.f32 %v2965_v47, %v802_v31  ;;  %v2967_v51 = vpop.f32.mrb[155].mxu1  ;;  %9069 = vrcp.f32 %v4847_v52  ;;  %v4848_v20 = vadd.f32 1.0, %v9060_v44  ;;  %v10615_v34 = vpop.f32.mrb[176].mxu0  ;;  %v5383_v31 = vld [vmem:[%s10208_s8 + $0x148] sm:$0xff] }
 0x251   : > { %v7400_v57 = vmul.f32 -1.442695, %v3755_v23  ;;  %3177 = vmatmul.mubr.bf16.gmra.mrb[152].mxu1 %v8654_v38  ;;  %v7800_v46 = vpop.f32.mrb[177].mxu0  ;;  %v806_v38 = vld [vmem:[%s9928_s6 + $0x288] sm:$0xff]  ;;  %v8668_v44 = vld [vmem:[%s9645_s9 + $0x664] ss:$12 sps:$4 sm:$0xff]  }
 0x252   : > { %v3758_v56 = vadd.f32 %v10501_v43, %v2966_v22  ;;  %9071 = vrcp.f32 %v4848_v20  ;;  %v5724_v60 = vpop.permute.xlu0 %5723  ;;  %3184 = vmatprep.mubr.bf16.mxu1 %v8660_v45  ;;  %v10621_v50 = vpop.f32.mrb[178].mxu0 }
 0x253   : > { %v9062_v3 = vpop.eup %9061  ;;  %9073 = vpow2.f32 %v7400_v57  ;;  %v6514_v36 = vmul.f32 %v5724_v60, %v5380_v49  ;;  %v7801_v54 = vpop.f32.mrb[179].mxu0  ;;  %v8685_v49 = vld [vmem:[%s9645_s9 + $0x6c8] ss:$12 sps:$4 sm:$0xff]  }
 0x254   : > { %v7401_v4 = vmul.f32 -1.442695, %v3758_v56  ;;  %5883 = vperm.xlu0 %8392, %v9062_v3   ;;  %v9064_v43 = vpop.eup %9063  ;;  %v2970_v5 = vpop.f32.mrb[156].mxu1  ;;  %7907 = vmatmul.mubr.msk.bf16.gmra.mrb[28].mxu0 %vm2334_vm2, %v8681_v19  ;;  %v8666_v19 = vld [vmem:[%s9645_s9 + $0x660] ss:$12 sps:$4 sm:$0xff]  }
 0x255   : > { %v5729_v55 = vpop.permute.xlu1 %5728  ;;  %v9066_v59 = vpop.eup %9065  ;;  %6704 = vst.msk [vmem:[%s10223_s12 + $0x130] sm:$0xff] %vm6665_vm3, %v6514_v36  ;;  %v2971_v42 = vadd.f32 %v2970_v5, %v803_v29  ;;  %5888 = vperm.xlu1 %8393, %v9064_v43   ;;  %7910 = vmatprep.mubr.msk.bf16.mxu0 %vm9539_vm0, %v9538_v8 }
 0x256   : > { %9075 = vpow2.f32 %v7401_v4  ;;  %v6515_v13 = vmul.f32 %v5729_v55, %v5381_v2  ;;  %v2972_v39 = vpop.f32.mrb[157].mxu1  ;;  %v4849_v48 = vadd.f32 1.0, %v9066_v59  ;;  %v5384_v2 = vld [vmem:[%s10208_s8 + $0x150] sm:$0xff] }
 0x257   : > { %v2973_v21 = vpop.f32.mrb[158].mxu1  ;;  %v9068_v6 = vpop.eup %9067  ;;  %v3763_v33 = vadd.f32 %v10515_v35, %v2971_v42  ;;  %v805_v35 = vld [vmem:[%s9928_s6 + $0x280] sm:$0xff] }
 0x258   : > { %6705 = vst.msk [vmem:[%s10223_s12 + $0x138] sm:$0xff] %vm6665_vm3, %v6515_v13  ;;  %v2974_v24 = vadd.f32 %v2973_v21, %v804_v0  ;;  %v2975_v53 = vpop.f32.mrb[159].mxu1  ;;  %9077 = vrcp.f32 %v4849_v48  ;;  %v4850_v28 = vadd.f32 1.0, %v9068_v6  ;;  %v10635_v23 = vpop.f32.mrb[180].mxu0  ;;  %v5385_v0 = vld [vmem:[%s10208_s8 + $0x158] sm:$0xff] }
 0x259   : > { %v7402_v61 = vmul.f32 -1.442695, %v3763_v33  ;;  %3185 = vmatmul.mubr.bf16.gmra.mrb[156].mxu1 %v8658_v10  ;;  %v7804_v20 = vpop.f32.mrb[181].mxu0  ;;  %v808_v10 = vld [vmem:[%s9928_s6 + $0x298] sm:$0xff] }
 0x25a   : > { %v3766_v30 = vadd.f32 %v10521_v9, %v2974_v24  ;;  %v9070_v16 = vpop.eup %9069  ;;  %9079 = vrcp.f32 %v4850_v28  ;;  %v5734_v58 = vpop.permute.xlu0 %5733  ;;  %3192 = vmatprep.mubr.bf16.mxu1 %v8664_v26  ;;  %v8672_v6 = vld [vmem:[%s9645_s9 + $0x67c] ss:$12 sps:$4 sm:$0xff]  }
 0x25b   : > { %9081 = vpow2.f32 %v7402_v61  ;;  %v6516_v7 = vmul.f32 %v5734_v58, %v5382_v62  ;;  %5893 = vperm.xlu0 %8392, %v9070_v16   ;;  %v10641_v60 = vpop.f32.mrb[182].mxu0  ;;  %v8689_v62 = vld [vmem:[%s9645_s9 + $0x6e0] ss:$12 sps:$4 sm:$0xff]  }
 0x25c   : > { %v7403_v63 = vmul.f32 -1.442695, %v3766_v30  ;;  %v9072_v9 = vpop.eup %9071  ;;  %v2978_v40 = vpop.f32.mrb[160].mxu1  ;;  %7911 = vmatmul.mubr.msk.bf16.gmra.mrb[32].mxu0 %vm2334_vm2, %v8685_v49  ;;  %v8670_v49 = vld [vmem:[%s9645_s9 + $0x678] ss:$12 sps:$4 sm:$0xff]  }
 0x25d   : > { %v5739_v1 = vpop.permute.xlu1 %5738  ;;  %v9074_v45 = vpop.eup %9073  ;;  %6706 = vst.msk [vmem:[%s10223_s12 + $0x140] sm:$0xff] %vm6665_vm3, %v6516_v7  ;;  %v2979_v52 = vadd.f32 %v2978_v40, %v805_v35  ;;  %5898 = vperm.xlu1 %8393, %v9072_v9   ;;  %7914 = vmatprep.mubr.msk.bf16.mxu0 %vm9539_vm0, %v9538_v8 }
 0x25e   : > { %9083 = vpow2.f32 %v7403_v63  ;;  %v6517_v47 = vmul.f32 %v5739_v1, %v5383_v31  ;;  %v2980_v12 = vpop.f32.mrb[161].mxu1  ;;  %v4851_v22 = vadd.f32 1.0, %v9074_v45  ;;  %v7805_v4 = vpop.f32.mrb[183].mxu0  ;;  %v5386_v31 = vld [vmem:[%s10208_s8 + $0x160] sm:$0xff] }
 0x25f   : > { %v2981_v51 = vpop.f32.mrb[162].mxu1  ;;  %v3771_v57 = vadd.f32 %v10535_v32, %v2979_v52  ;;  %v807_v32 = vld [vmem:[%s9928_s6 + $0x290] sm:$0xff]  ;;  %v10655_v33 = vpop.f32.mrb[184].mxu0 }
 0x260   : > { %v9076_v25 = vpop.eup %9075  ;;  %6707 = vst.msk [vmem:[%s10223_s12 + $0x148] sm:$0xff] %vm6665_vm3, %v6517_v47  ;;  %v2982_v56 = vadd.f32 %v2981_v51, %v806_v38  ;;  %v2983_v3 = vpop.f32.mrb[163].mxu1  ;;  %9085 = vrcp.f32 %v4851_v22  ;;  %v5387_v38 = vld [vmem:[%s10208_s8 + $0x168] sm:$0xff] }
 0x261   : > { %v4852_v29 = vadd.f32 1.0, %v9076_v25  ;;  %v7404_v36 = vmul.f32 -1.442695, %v3771_v57  ;;  %3193 = vmatmul.mubr.bf16.gmra.mrb[160].mxu1 %v8662_v15  ;;  %v7808_v28 = vpop.f32.mrb[185].mxu0  ;;  %v810_v15 = vld [vmem:[%s9928_s6 + $0x2a8] sm:$0xff] }
 0x262   : > { %v3774_v43 = vadd.f32 %v10541_v37, %v2982_v56  ;;  %v9078_v5 = vpop.eup %9077  ;;  %v5744_v55 = vpop.permute.xlu0 %5743  ;;  %3200 = vmatprep.mubr.bf16.mxu1 %v8668_v44  ;;  %v8676_v25 = vld [vmem:[%s9645_s9 + $0x694] ss:$12 sps:$4 sm:$0xff]  }
 0x263   : > { %9087 = vrcp.f32 %v4852_v29  ;;  %v6518_v42 = vmul.f32 %v5744_v55, %v5384_v2  ;;  %5903 = vperm.xlu0 %8392, %v9078_v5   ;;  %v10661_v58 = vpop.f32.mrb[186].mxu0  ;;  %v8693_v2 = vld [vmem:[%s9645_s9 + $0x6f8] ss:$12 sps:$4 sm:$0xff]  }
 0x264   : > { %9089 = vpow2.f32 %v7404_v36  ;;  %v7405_v59 = vmul.f32 -1.442695, %v3774_v43  ;;  %v9080_v37 = vpop.eup %9079  ;;  %v2986_v13 = vpop.f32.mrb[164].mxu1  ;;  %7915 = vmatmul.mubr.msk.bf16.gmra.mrb[36].mxu0 %vm2334_vm2, %v8689_v62  ;;  %v8674_v62 = vld [vmem:[%s9645_s9 + $0x690] ss:$12 sps:$4 sm:$0xff]  }
 0x265   : > { %v5749_v39 = vpop.permute.xlu1 %5748  ;;  %v9082_v26 = vpop.eup %9081  ;;  %6708 = vst.msk [vmem:[%s10223_s12 + $0x150] sm:$0xff] %vm6665_vm3, %v6518_v42  ;;  %v2987_v48 = vadd.f32 %v2986_v13, %v807_v32  ;;  %5908 = vperm.xlu1 %8393, %v9080_v37   ;;  %7918 = vmatprep.mubr.msk.bf16.mxu0 %vm9539_vm0, %v9538_v8 }
 0x266   : > { %9091 = vpow2.f32 %v7405_v59  ;;  %v6519_v21 = vmul.f32 %v5749_v39, %v5385_v0  ;;  %v2988_v46 = vpop.f32.mrb[165].mxu1  ;;  %v4853_v24 = vadd.f32 1.0, %v9082_v26  ;;  %v7809_v63 = vpop.f32.mrb[187].mxu0  ;;  %v5388_v0 = vld [vmem:[%s10208_s8 + $0x170] sm:$0xff] }
 0x267   : > { %v2989_v53 = vpop.f32.mrb[166].mxu1  ;;  %v3779_v61 = vadd.f32 %v10555_v27, %v2987_v48  ;;  %v809_v27 = vld [vmem:[%s9928_s6 + $0x2a0] sm:$0xff]  ;;  %v10675_v57 = vpop.f32.mrb[188].mxu0 }
 0x268   : > { %v9084_v54 = vpop.eup %9083  ;;  %6709 = vst.msk [vmem:[%s10223_s12 + $0x158] sm:$0xff] %vm6665_vm3, %v6519_v21  ;;  %v2990_v30 = vadd.f32 %v2989_v53, %v808_v10  ;;  %v2991_v16 = vpop.f32.mrb[167].mxu1  ;;  %9093 = vrcp.f32 %v4853_v24  ;;  %v5389_v10 = vld [vmem:[%s10208_s8 + $0x178] sm:$0xff] }
 0x269   : > { %v4854_v35 = vadd.f32 1.0, %v9084_v54  ;;  %v7406_v7 = vmul.f32 -1.442695, %v3779_v61  ;;  %3201 = vmatmul.mubr.bf16.gmra.mrb[164].mxu1 %v8666_v19  ;;  %v7812_v29 = vpop.f32.mrb[189].mxu0  ;;  %v812_v19 = vld [vmem:[%s9928_s6 + $0x2b8] sm:$0xff] }
 0x26a   : > { %v3782_v9 = vadd.f32 %v10561_v41, %v2990_v30  ;;  %v9086_v40 = vpop.eup %9085  ;;  %v5754_v1 = vpop.permute.xlu0 %5753  ;;  %3208 = vmatprep.mubr.bf16.mxu1 %v8672_v6  ;;  %v8680_v54 = vld [vmem:[%s9645_s9 + $0x6ac] ss:$12 sps:$4 sm:$0xff]  }
 0x26b   : > { %9095 = vrcp.f32 %v4854_v35  ;;  %v6520_v52 = vmul.f32 %v5754_v1, %v5386_v31  ;;  %5913 = vperm.xlu0 %8392, %v9086_v40   ;;  %v10681_v55 = vpop.f32.mrb[190].mxu0  ;;  %v8697_v31 = vld [vmem:[%s9645_s9 + $0x710] ss:$12 sps:$4 sm:$0xff]  }
 0x26c   : > { %9097 = vpow2.f32 %v7406_v7  ;;  %v7407_v45 = vmul.f32 -1.442695, %v3782_v9  ;;  %v2994_v47 = vpop.f32.mrb[168].mxu1  ;;  %v7813_v59 = vpop.f32.mrb[191].mxu0  ;;  %7919 = vmatmul.mubr.msk.bf16.gmra.mrb[40].mxu0 %vm2334_vm2, %v8693_v2  ;;  %v8678_v2 = vld [vmem:[%s9645_s9 + $0x6a8] ss:$12 sps:$4 sm:$0xff]  }
 0x26d   : > { %v9088_v41 = vpop.eup %9087  ;;  %v5759_v12 = vpop.permute.xlu1 %5758  ;;  %6710 = vst.msk [vmem:[%s10223_s12 + $0x160] sm:$0xff] %vm6665_vm3, %v6520_v52  ;;  %v2995_v22 = vadd.f32 %v2994_v47, %v809_v27  ;;  %7922 = vmatprep.mubr.msk.bf16.mxu0 %vm9539_vm0, %v9538_v8 }
 0x26e   : > { %v9090_v44 = vpop.eup %9089  ;;  %9099 = vpow2.f32 %v7407_v45  ;;  %v6521_v51 = vmul.f32 %v5759_v12, %v5387_v38  ;;  %v2996_v20 = vpop.f32.mrb[169].mxu1  ;;  %5918 = vperm.xlu1 %8393, %v9088_v41   ;;  %v5390_v38 = vld [vmem:[%s10208_s8 + $0x180] sm:$0xff] }
 0x26f   : > { %v4855_v56 = vadd.f32 1.0, %v9090_v44  ;;  %v2997_v3 = vpop.f32.mrb[170].mxu1  ;;  %v3787_v36 = vadd.f32 %v10575_v11, %v2995_v22  ;;  %v811_v11 = vld [vmem:[%s9928_s6 + $0x2b0] sm:$0xff]  ;;  %v10695_v61 = vpop.f32.mrb[192].mxu0 }
 0x270   : > { %v9092_v4 = vpop.eup %9091  ;;  %6711 = vst.msk [vmem:[%s10223_s12 + $0x168] sm:$0xff] %vm6665_vm3, %v6521_v51  ;;  %v2998_v43 = vadd.f32 %v2997_v3, %v810_v15  ;;  %v2999_v5 = vpop.f32.mrb[171].mxu1  ;;  %v5391_v15 = vld [vmem:[%s10208_s8 + $0x188] sm:$0xff] }
 0x271   : > { %9101 = vrcp.f32 %v4855_v56  ;;  %v4856_v32 = vadd.f32 1.0, %v9092_v4  ;;  %v7408_v42 = vmul.f32 -1.442695, %v3787_v36  ;;  %3209 = vmatmul.mubr.bf16.gmra.mrb[168].mxu1 %v8670_v49  ;;  %v7816_v35 = vpop.f32.mrb[193].mxu0  ;;  %v814_v49 = vld [vmem:[%s9928_s6 + $0x2c8] sm:$0xff] }
 0x272   : > { %v3790_v37 = vadd.f32 %v10581_v17, %v2998_v43  ;;  %v9094_v13 = vpop.eup %9093  ;;  %v5764_v39 = vpop.permute.xlu0 %5763  ;;  %3216 = vmatprep.mubr.bf16.mxu1 %v8676_v25  ;;  %v8684_v4 = vld [vmem:[%s9645_s9 + $0x6c4] ss:$12 sps:$4 sm:$0xff]  }
 0x273   : > { %9103 = vrcp.f32 %v4856_v32  ;;  %v6522_v48 = vmul.f32 %v5764_v39, %v5388_v0  ;;  %5923 = vperm.xlu0 %8392, %v9094_v13   ;;  %v10701_v1 = vpop.f32.mrb[194].mxu0  ;;  %v8701_v0 = vld [vmem:[%s9645_s9 + $0x728] ss:$12 sps:$4 sm:$0xff]  }
 0x274   : > { %9105 = vpow2.f32 %v7408_v42  ;;  %v7409_v26 = vmul.f32 -1.442695, %v3790_v37  ;;  %v3002_v21 = vpop.f32.mrb[172].mxu1  ;;  %v7817_v45 = vpop.f32.mrb[195].mxu0  ;;  %7923 = vmatmul.mubr.msk.bf16.gmra.mrb[44].mxu0 %vm2334_vm2, %v8697_v31  ;;  %v8682_v31 = vld [vmem:[%s9645_s9 + $0x6c0] ss:$12 sps:$4 sm:$0xff]  }
 0x275   : > { %v9096_v17 = vpop.eup %9095  ;;  %v5769_v46 = vpop.permute.xlu1 %5768  ;;  %6712 = vst.msk [vmem:[%s10223_s12 + $0x170] sm:$0xff] %vm6665_vm3, %v6522_v48  ;;  %v3003_v24 = vadd.f32 %v3002_v21, %v811_v11  ;;  %7926 = vmatprep.mubr.msk.bf16.mxu0 %vm9539_vm0, %v9538_v8 }
 0x276   : > { %v9098_v6 = vpop.eup %9097  ;;  %9107 = vpow2.f32 %v7409_v26  ;;  %v6523_v53 = vmul.f32 %v5769_v46, %v5389_v10  ;;  %v3004_v28 = vpop.f32.mrb[173].mxu1  ;;  %5928 = vperm.xlu1 %8393, %v9096_v17   ;;  %v5392_v10 = vld [vmem:[%s10208_s8 + $0x190] sm:$0xff] }
 0x277   : > { %v4857_v30 = vadd.f32 1.0, %v9098_v6  ;;  %v3005_v16 = vpop.f32.mrb[174].mxu1  ;;  %v3795_v7 = vadd.f32 %v10595_v18, %v3003_v24  ;;  %v813_v18 = vld [vmem:[%s9928_s6 + $0x2c0] sm:$0xff]  ;;  %v10715_v36 = vpop.f32.mrb[196].mxu0 }
 0x278   : > { %v9100_v63 = vpop.eup %9099  ;;  %6713 = vst.msk [vmem:[%s10223_s12 + $0x178] sm:$0xff] %vm6665_vm3, %v6523_v53  ;;  %v3006_v9 = vadd.f32 %v3005_v16, %v812_v19  ;;  %v3007_v40 = vpop.f32.mrb[175].mxu1  ;;  %v5393_v19 = vld [vmem:[%s10208_s8 + $0x198] sm:$0xff] }
 0x279   : > { %9109 = vrcp.f32 %v4857_v30  ;;  %v4858_v27 = vadd.f32 1.0, %v9100_v63  ;;  %v7410_v52 = vmul.f32 -1.442695, %v3795_v7  ;;  %3217 = vmatmul.mubr.bf16.gmra.mrb[172].mxu1 %v8674_v62  ;;  %v7820_v32 = vpop.f32.mrb[197].mxu0  ;;  %v816_v62 = vld [vmem:[%s9928_s6 + $0x2d8] sm:$0xff] }
 0x27a   : > { %v3798_v41 = vadd.f32 %v10601_v14, %v3006_v9  ;;  %3224 = vmatprep.mubr.bf16.mxu1 %v8680_v54  ;;  %v10721_v39 = vpop.f32.mrb[198].mxu0  ;;  %v8688_v63 = vld [vmem:[%s9645_s9 + $0x6dc] ss:$12 sps:$4 sm:$0xff]  }
 0x27b   : > { %v9102_v47 = vpop.eup %9101  ;;  %9111 = vrcp.f32 %v4858_v27  ;;  %v5774_v12 = vpop.permute.xlu0 %5773 }
 0x27c   : > { %9113 = vpow2.f32 %v7410_v52  ;;  %v7411_v44 = vmul.f32 -1.442695, %v3798_v41  ;;  %v6524_v22 = vmul.f32 %v5774_v12, %v5390_v38  ;;  %5933 = vperm.xlu0 %8392, %v9102_v47   ;;  %v3010_v51 = vpop.f32.mrb[176].mxu1  ;;  %v7821_v26 = vpop.f32.mrb[199].mxu0  ;;  %7927 = vmatmul.mubr.msk.bf16.gmra.mrb[48].mxu0 %vm2334_vm2, %v8701_v0  ;;  %v8705_v38 = vld [vmem:[%s9645_s9 + $0x740] ss:$12 sps:$4 sm:$0xff]  }
 0x27d   : > { %v9104_v14 = vpop.eup %9103  ;;  %v5779_v20 = vpop.permute.xlu1 %5778  ;;  %v3011_v56 = vadd.f32 %v3010_v51, %v813_v18  ;;  %7930 = vmatprep.mubr.msk.bf16.mxu0 %vm9539_vm0, %v9538_v8  ;;  %v8686_v0 = vld [vmem:[%s9645_s9 + $0x6d8] ss:$12 sps:$4 sm:$0xff]  }
 0x27e   : > { %v9106_v25 = vpop.eup %9105  ;;  %9115 = vpow2.f32 %v7411_v44  ;;  %6714 = vst.msk [vmem:[%s10223_s12 + $0x180] sm:$0xff] %vm6665_vm3, %v6524_v22  ;;  %v6525_v3 = vmul.f32 %v5779_v20, %v5391_v15  ;;  %v3012_v29 = vpop.f32.mrb[177].mxu1  ;;  %5938 = vperm.xlu1 %8393, %v9104_v14   ;;  %v5394_v15 = vld [vmem:[%s10208_s8 + $0x1a0] sm:$0xff] }
 0x27f   : > { %v4859_v43 = vadd.f32 1.0, %v9106_v25  ;;  %v3013_v5 = vpop.f32.mrb[178].mxu1  ;;  %v3803_v42 = vadd.f32 %v10615_v34, %v3011_v56  ;;  %v815_v34 = vld [vmem:[%s9928_s6 + $0x2d0] sm:$0xff]  ;;  %v10735_v7 = vpop.f32.mrb[200].mxu0 }
 0x280   : > { %v9108_v59 = vpop.eup %9107  ;;  %6715 = vst.msk [vmem:[%s10223_s12 + $0x188] sm:$0xff] %vm6665_vm3, %v6525_v3  ;;  %v3014_v37 = vadd.f32 %v3013_v5, %v814_v49  ;;  %v3015_v13 = vpop.f32.mrb[179].mxu1  ;;  %v5395_v49 = vld [vmem:[%s10208_s8 + $0x1a8] sm:$0xff] }
 0x281   : > { %9117 = vrcp.f32 %v4859_v43  ;;  %v4860_v11 = vadd.f32 1.0, %v9108_v59  ;;  %v7412_v48 = vmul.f32 -1.442695, %v3803_v42  ;;  %3225 = vmatmul.mubr.bf16.gmra.mrb[176].mxu1 %v8678_v2  ;;  %v7824_v27 = vpop.f32.mrb[201].mxu0  ;;  %v818_v2 = vld [vmem:[%s9928_s6 + $0x2e8] sm:$0xff] }
 0x282   : > { %v3806_v17 = vadd.f32 %v10621_v50, %v3014_v37  ;;  %3232 = vmatprep.mubr.bf16.mxu1 %v8684_v4  ;;  %v10741_v12 = vpop.f32.mrb[202].mxu0  ;;  %v8692_v59 = vld [vmem:[%s9645_s9 + $0x6f4] ss:$12 sps:$4 sm:$0xff]  }
 0x283   : > { %v9110_v21 = vpop.eup %9109  ;;  %9119 = vrcp.f32 %v4860_v11  ;;  %v5784_v46 = vpop.permute.xlu0 %5783 }
 0x284   : > { %9121 = vpow2.f32 %v7412_v48  ;;  %v7413_v6 = vmul.f32 -1.442695, %v3806_v17  ;;  %v6526_v24 = vmul.f32 %v5784_v46, %v5392_v10  ;;  %5943 = vperm.xlu0 %8392, %v9110_v21   ;;  %v3018_v53 = vpop.f32.mrb[180].mxu1  ;;  %v7825_v44 = vpop.f32.mrb[203].mxu0  ;;  %7931 = vmatmul.mubr.msk.bf16.gmra.mrb[52].mxu0 %vm2334_vm2, %v8705_v38  ;;  %v8709_v10 = vld [vmem:[%s9645_s9 + $0x758] ss:$12 sps:$4 sm:$0xff]  }
 0x285   : > { %v9112_v50 = vpop.eup %9111  ;;  %v5789_v28 = vpop.permute.xlu1 %5788  ;;  %v3019_v30 = vadd.f32 %v3018_v53, %v815_v34  ;;  %7934 = vmatprep.mubr.msk.bf16.mxu0 %vm9539_vm0, %v9538_v8  ;;  %v8690_v38 = vld [vmem:[%s9645_s9 + $0x6f0] ss:$12 sps:$4 sm:$0xff]  }
 0x286   : > { %v9114_v54 = vpop.eup %9113  ;;  %9123 = vpow2.f32 %v7413_v6  ;;  %6716 = vst.msk [vmem:[%s10223_s12 + $0x190] sm:$0xff] %vm6665_vm3, %v6526_v24  ;;  %v6527_v16 = vmul.f32 %v5789_v28, %v5393_v19  ;;  %v3020_v35 = vpop.f32.mrb[181].mxu1  ;;  %5948 = vperm.xlu1 %8393, %v9112_v50   ;;  %v5396_v19 = vld [vmem:[%s10208_s8 + $0x1b0] sm:$0xff] }
 0x287   : > { %v4861_v9 = vadd.f32 1.0, %v9114_v54  ;;  %v3021_v40 = vpop.f32.mrb[182].mxu1  ;;  %v3811_v52 = vadd.f32 %v10635_v23, %v3019_v30  ;;  %v817_v23 = vld [vmem:[%s9928_s6 + $0x2e0] sm:$0xff]  ;;  %v10755_v42 = vpop.f32.mrb[204].mxu0 }
 0x288   : > { %v9116_v45 = vpop.eup %9115  ;;  %6717 = vst.msk [vmem:[%s10223_s12 + $0x198] sm:$0xff] %vm6665_vm3, %v6527_v16  ;;  %v3022_v41 = vadd.f32 %v3021_v40, %v816_v62  ;;  %v3023_v47 = vpop.f32.mrb[183].mxu1  ;;  %v5397_v62 = vld [vmem:[%s10208_s8 + $0x1b8] sm:$0xff] }
 0x289   : > { %9125 = vrcp.f32 %v4861_v9  ;;  %v4862_v18 = vadd.f32 1.0, %v9116_v45  ;;  %v7414_v22 = vmul.f32 -1.442695, %v3811_v52  ;;  %3233 = vmatmul.mubr.bf16.gmra.mrb[180].mxu1 %v8682_v31  ;;  %v7828_v11 = vpop.f32.mrb[205].mxu0  ;;  %v820_v31 = vld [vmem:[%s9928_s6 + $0x2f8] sm:$0xff] }
 0x28a   : > { %v3814_v14 = vadd.f32 %v10641_v60, %v3022_v41  ;;  %3240 = vmatprep.mubr.bf16.mxu1 %v8688_v63  ;;  %v10761_v46 = vpop.f32.mrb[206].mxu0  ;;  %v8696_v45 = vld [vmem:[%s9645_s9 + $0x70c] ss:$12 sps:$4 sm:$0xff]  }
 0x28b   : > { %v9118_v51 = vpop.eup %9117  ;;  %9127 = vrcp.f32 %v4862_v18  ;;  %v5794_v20 = vpop.permute.xlu0 %5793 }
 0x28c   : > { %9129 = vpow2.f32 %v7414_v22  ;;  %v7415_v25 = vmul.f32 -1.442695, %v3814_v14  ;;  %v6528_v56 = vmul.f32 %v5794_v20, %v5394_v15  ;;  %5953 = vperm.xlu0 %8392, %v9118_v51   ;;  %v3026_v3 = vpop.f32.mrb[184].mxu1  ;;  %v5799_v29 = vpop.permute.xlu1 %5798  ;;  %7935 = vmatmul.mubr.msk.bf16.gmra.mrb[56].mxu0 %vm2334_vm2, %v8709_v10  ;;  %v8713_v15 = vld [vmem:[%s9645_s9 + $0x770] ss:$12 sps:$4 sm:$0xff]  }
 0x28d   : > { %v9120_v60 = vpop.eup %9119  ;;  %v3027_v43 = vadd.f32 %v3026_v3, %v817_v23  ;;  %v6529_v5 = vmul.f32 %v5799_v29, %v5395_v49  ;;  %v3028_v32 = vpop.f32.mrb[185].mxu1  ;;  %7938 = vmatprep.mubr.msk.bf16.mxu0 %vm9539_vm0, %v9538_v8  ;;  %v5398_v49 = vld [vmem:[%s10208_s8 + $0x1c0] sm:$0xff]  ;;  %v8694_v10 = vld [vmem:[%s9645_s9 + $0x708] ss:$12 sps:$4 sm:$0xff]  }
 0x28e   : > { %v9122_v4 = vpop.eup %9121  ;;  %9131 = vpow2.f32 %v7415_v25  ;;  %6718 = vst.msk [vmem:[%s10223_s12 + $0x1a0] sm:$0xff] %vm6665_vm3, %v6528_v56  ;;  %5958 = vperm.xlu1 %8393, %v9120_v60   ;;  %v3029_v13 = vpop.f32.mrb[186].mxu1 }
 0x28f   : > { %v4863_v37 = vadd.f32 1.0, %v9122_v4  ;;  %v3819_v48 = vadd.f32 %v10655_v33, %v3027_v43  ;;  %6719 = vst.msk [vmem:[%s10223_s12 + $0x1a8] sm:$0xff] %vm6665_vm3, %v6529_v5  ;;  %v3030_v17 = vadd.f32 %v3029_v13, %v818_v2  ;;  %v3031_v21 = vpop.f32.mrb[187].mxu1  ;;  %v7829_v6 = vpop.f32.mrb[207].mxu0  ;;  %v819_v33 = vld [vmem:[%s9928_s6 + $0x2f0] sm:$0xff]  ;;  %v5399_v2 = vld [vmem:[%s10208_s8 + $0x1c8] sm:$0xff] }
 0x290   : > { %v9124_v26 = vpop.eup %9123  ;;  %v10775_v52 = vpop.f32.mrb[208].mxu0 }
 0x291   : > { %9133 = vrcp.f32 %v4863_v37  ;;  %v4864_v34 = vadd.f32 1.0, %v9124_v26  ;;  %v7416_v24 = vmul.f32 -1.442695, %v3819_v48  ;;  %v3822_v50 = vadd.f32 %v10661_v58, %v3030_v17  ;;  %3241 = vmatmul.mubr.bf16.gmra.mrb[184].mxu1 %v8686_v0  ;;  %v7832_v18 = vpop.f32.mrb[209].mxu0  ;;  %v822_v0 = vld [vmem:[%s9928_s6 + $0x308] sm:$0xff] }
 0x292   : > { %3248 = vmatprep.mubr.bf16.mxu1 %v8692_v59  ;;  %v10781_v20 = vpop.f32.mrb[210].mxu0  ;;  %v8700_v26 = vld [vmem:[%s9645_s9 + $0x724] ss:$12 sps:$4 sm:$0xff]  }
 0x293   : > { %v9126_v53 = vpop.eup %9125  ;;  %9135 = vrcp.f32 %v4864_v34  ;;  %v5804_v28 = vpop.permute.xlu0 %5803  ;;  %v7417_v54 = vmul.f32 -1.442695, %v3822_v50 }
 0x294   : > { %9137 = vpow2.f32 %v7416_v24  ;;  %v6530_v30 = vmul.f32 %v5804_v28, %v5396_v19  ;;  %5963 = vperm.xlu0 %8392, %v9126_v53   ;;  %v3034_v16 = vpop.f32.mrb[188].mxu1  ;;  %v5809_v35 = vpop.permute.xlu1 %5808  ;;  %7939 = vmatmul.mubr.msk.bf16.gmra.mrb[60].mxu0 %vm2334_vm2, %v8713_v15  ;;  %v8717_v19 = vld [vmem:[%s9645_s9 + $0x788] ss:$12 sps:$4 sm:$0xff]   ;;  %v8698_v15 = vld [vmem:[%s9645_s9 + $0x720] ss:$12 sps:$4 sm:$0xff]  }
 0x295   : > { %v9128_v58 = vpop.eup %9127  ;;  %9139 = vpow2.f32 %v7417_v54  ;;  %v3035_v9 = vadd.f32 %v3034_v16, %v819_v33  ;;  %v6531_v40 = vmul.f32 %v5809_v35, %v5397_v62  ;;  %v3036_v27 = vpop.f32.mrb[189].mxu1  ;;  %7942 = vmatprep.mubr.msk.bf16.mxu0 %vm9539_vm0, %v9538_v8  ;;  %v5400_v62 = vld [vmem:[%s10208_s8 + $0x1d0] sm:$0xff] }
 0x296   : > { %v9130_v63 = vpop.eup %9129  ;;  %6720 = vst.msk [vmem:[%s10223_s12 + $0x1b0] sm:$0xff] %vm6665_vm3, %v6530_v30  ;;  %5968 = vperm.xlu1 %8393, %v9128_v58   ;;  %v3037_v47 = vpop.f32.mrb[190].mxu1 }
 0x297   : > { %v4865_v41 = vadd.f32 1.0, %v9130_v63  ;;  %v3827_v22 = vadd.f32 %v10675_v57, %v3035_v9  ;;  %6721 = vst.msk [vmem:[%s10223_s12 + $0x1b8] sm:$0xff] %vm6665_vm3, %v6531_v40  ;;  %v3038_v14 = vadd.f32 %v3037_v47, %v820_v31  ;;  %v3039_v51 = vpop.f32.mrb[191].mxu1  ;;  %v7833_v25 = vpop.f32.mrb[211].mxu0  ;;  %v821_v57 = vld [vmem:[%s9928_s6 + $0x300] sm:$0xff]  ;;  %v5401_v31 = vld [vmem:[%s10208_s8 + $0x1d8] sm:$0xff] }
 0x298   : > { %v9132_v44 = vpop.eup %9131  ;;  %v10795_v48 = vpop.f32.mrb[212].mxu0 }
 0x299   : > { %9141 = vrcp.f32 %v4865_v41  ;;  %v4866_v23 = vadd.f32 1.0, %v9132_v44  ;;  %v7418_v56 = vmul.f32 -1.442695, %v3827_v22  ;;  %v3830_v60 = vadd.f32 %v10681_v55, %v3038_v14  ;;  %3249 = vmatmul.mubr.bf16.gmra.mrb[188].mxu1 %v8690_v38  ;;  %v7836_v34 = vpop.f32.mrb[213].mxu0  ;;  %v824_v38 = vld [vmem:[%s9928_s6 + $0x318] sm:$0xff] }
 0x29a   : > { %v5814_v29 = vpop.permute.xlu0 %5813  ;;  %3256 = vmatprep.mubr.bf16.mxu1 %v8696_v45  ;;  %v10801_v28 = vpop.f32.mrb[214].mxu0  ;;  %v8704_v44 = vld [vmem:[%s9645_s9 + $0x73c] ss:$12 sps:$4 sm:$0xff]  }
 0x29b   : > { %v9134_v3 = vpop.eup %9133  ;;  %9143 = vrcp.f32 %v4866_v23  ;;  %v7419_v4 = vmul.f32 -1.442695, %v3830_v60  ;;  %v6532_v43 = vmul.f32 %v5814_v29, %v5398_v49  ;;  %v7837_v54 = vpop.f32.mrb[215].mxu0  ;;  %v8721_v49 = vld [vmem:[%s9645_s9 + $0x7a0] ss:$12 sps:$4 sm:$0xff]  }
 0x29c   : > { %9145 = vpow2.f32 %v7418_v56  ;;  %5973 = vperm.xlu0 %8392, %v9134_v3   ;;  %v3042_v5 = vpop.f32.mrb[192].mxu1  ;;  %v5819_v32 = vpop.permute.xlu1 %5818  ;;  %7943 = vmatmul.mubr.msk.bf16.gmra.mrb[64].mxu0 %vm2334_vm2, %v8717_v19  ;;  %v8702_v19 = vld [vmem:[%s9645_s9 + $0x738] ss:$12 sps:$4 sm:$0xff]  }
 0x29d   : > { %v9136_v55 = vpop.eup %9135  ;;  %9147 = vpow2.f32 %v7419_v4  ;;  %6722 = vst.msk [vmem:[%s10223_s12 + $0x1c0] sm:$0xff] %vm6665_vm3, %v6532_v43  ;;  %v3043_v37 = vadd.f32 %v3042_v5, %v821_v57  ;;  %v6533_v13 = vmul.f32 %v5819_v32, %v5399_v2  ;;  %v3044_v11 = vpop.f32.mrb[193].mxu1  ;;  %7946 = vmatprep.mubr.msk.bf16.mxu0 %vm9539_vm0, %v9538_v8  ;;  %v5402_v2 = vld [vmem:[%s10208_s8 + $0x1e0] sm:$0xff] }
 0x29e   : > { %v9138_v59 = vpop.eup %9137  ;;  %5978 = vperm.xlu1 %8393, %v9136_v55   ;;  %v3045_v21 = vpop.f32.mrb[194].mxu1 }
 0x29f   : > { %v4867_v17 = vadd.f32 1.0, %v9138_v59  ;;  %v9140_v6 = vpop.eup %9139  ;;  %v3835_v24 = vadd.f32 %v10695_v61, %v3043_v37  ;;  %6723 = vst.msk [vmem:[%s10223_s12 + $0x1c8] sm:$0xff] %vm6665_vm3, %v6533_v13  ;;  %v3046_v50 = vadd.f32 %v3045_v21, %v822_v0  ;;  %v3047_v53 = vpop.f32.mrb[195].mxu1  ;;  %v823_v61 = vld [vmem:[%s9928_s6 + $0x310] sm:$0xff]  ;;  %v5403_v0 = vld [vmem:[%s10208_s8 + $0x1e8] sm:$0xff] }
 0x2a0   : > { %v4868_v33 = vadd.f32 1.0, %v9140_v6  ;;  %v10815_v22 = vpop.f32.mrb[216].mxu0  ;;  %v8708_v6 = vld [vmem:[%s9645_s9 + $0x754] ss:$12 sps:$4 sm:$0xff]  }
 0x2a1   : > { %9149 = vrcp.f32 %v4867_v17  ;;  %v7420_v30 = vmul.f32 -1.442695, %v3835_v24  ;;  %v3838_v58 = vadd.f32 %v10701_v1, %v3046_v50  ;;  %3257 = vmatmul.mubr.bf16.gmra.mrb[192].mxu1 %v8694_v10  ;;  %v7840_v23 = vpop.f32.mrb[217].mxu0  ;;  %v826_v10 = vld [vmem:[%s9928_s6 + $0x328] sm:$0xff] }
 0x2a2   : > { %9151 = vrcp.f32 %v4868_v33  ;;  %v5824_v35 = vpop.permute.xlu0 %5823  ;;  %3264 = vmatprep.mubr.bf16.mxu1 %v8700_v26  ;;  %v10821_v29 = vpop.f32.mrb[218].mxu0 }
 0x2a3   : > { %v9142_v16 = vpop.eup %9141  ;;  %9153 = vpow2.f32 %v7420_v30  ;;  %v7421_v63 = vmul.f32 -1.442695, %v3838_v58  ;;  %v6534_v9 = vmul.f32 %v5824_v35, %v5400_v62  ;;  %v7841_v4 = vpop.f32.mrb[219].mxu0  ;;  %v8725_v62 = vld [vmem:[%s9645_s9 + $0x7b8] ss:$12 sps:$4 sm:$0xff]  }
 0x2a4   : > { %5983 = vperm.xlu0 %8392, %v9142_v16   ;;  %v3050_v40 = vpop.f32.mrb[196].mxu1  ;;  %v5829_v27 = vpop.permute.xlu1 %5828  ;;  %7947 = vmatmul.mubr.msk.bf16.gmra.mrb[68].mxu0 %vm2334_vm2, %v8721_v49  ;;  %v8706_v49 = vld [vmem:[%s9645_s9 + $0x750] ss:$12 sps:$4 sm:$0xff]  }
 0x2a5   : > { %v9144_v1 = vpop.eup %9143  ;;  %9155 = vpow2.f32 %v7421_v63  ;;  %6724 = vst.msk [vmem:[%s10223_s12 + $0x1d0] sm:$0xff] %vm6665_vm3, %v6534_v9  ;;  %v3051_v41 = vadd.f32 %v3050_v40, %v823_v61  ;;  %v6535_v47 = vmul.f32 %v5829_v27, %v5401_v31  ;;  %v3052_v18 = vpop.f32.mrb[197].mxu1  ;;  %7950 = vmatprep.mubr.msk.bf16.mxu0 %vm9539_vm0, %v9538_v8  ;;  %v5404_v31 = vld [vmem:[%s10208_s8 + $0x1f0] sm:$0xff] }
 0x2a6   : > { %v9146_v45 = vpop.eup %9145  ;;  %5988 = vperm.xlu1 %8393, %v9144_v1   ;;  %v3053_v51 = vpop.f32.mrb[198].mxu1 }
 0x2a7   : > { %v4869_v14 = vadd.f32 1.0, %v9146_v45  ;;  %v9148_v25 = vpop.eup %9147  ;;  %v3843_v56 = vadd.f32 %v10715_v36, %v3051_v41  ;;  %6725 = vst.msk [vmem:[%s10223_s12 + $0x1d8] sm:$0xff] %vm6665_vm3, %v6535_v47  ;;  %v3054_v60 = vadd.f32 %v3053_v51, %v824_v38  ;;  %v3055_v3 = vpop.f32.mrb[199].mxu1  ;;  %v825_v36 = vld [vmem:[%s9928_s6 + $0x320] sm:$0xff]  ;;  %v5405_v38 = vld [vmem:[%s10208_s8 + $0x1f8] sm:$0xff] }
 0x2a8   : > { %v4870_v57 = vadd.f32 1.0, %v9148_v25  ;;  %v10835_v24 = vpop.f32.mrb[220].mxu0  ;;  %v8712_v25 = vld [vmem:[%s9645_s9 + $0x76c] ss:$12 sps:$4 sm:$0xff]  }
 0x2a9   : > { %9157 = vrcp.f32 %v4869_v14  ;;  %v7422_v43 = vmul.f32 -1.442695, %v3843_v56  ;;  %v3846_v55 = vadd.f32 %v10721_v39, %v3054_v60  ;;  %3265 = vmatmul.mubr.bf16.gmra.mrb[196].mxu1 %v8698_v15  ;;  %v7844_v33 = vpop.f32.mrb[221].mxu0  ;;  %v828_v15 = vld [vmem:[%s9928_s6 + $0x338] sm:$0xff] }
 0x2aa   : > { %9159 = vrcp.f32 %v4870_v57  ;;  %v5834_v32 = vpop.permute.xlu0 %5833  ;;  %3272 = vmatprep.mubr.bf16.mxu1 %v8704_v44  ;;  %v10841_v35 = vpop.f32.mrb[222].mxu0 }
 0x2ab   : > { %v9150_v5 = vpop.eup %9149  ;;  %9161 = vpow2.f32 %v7422_v43  ;;  %v7423_v59 = vmul.f32 -1.442695, %v3846_v55  ;;  %v6536_v37 = vmul.f32 %v5834_v32, %v5402_v2  ;;  %v7845_v63 = vpop.f32.mrb[223].mxu0  ;;  %v8729_v2 = vld [vmem:[%s9645_s9 + $0x7d0] ss:$12 sps:$4 sm:$0xff]  }
 0x2ac   : > { %5993 = vperm.xlu0 %8392, %v9150_v5   ;;  %v9152_v39 = vpop.eup %9151  ;;  %v3058_v13 = vpop.f32.mrb[200].mxu1  ;;  %7951 = vmatmul.mubr.msk.bf16.gmra.mrb[72].mxu0 %vm2334_vm2, %v8725_v62  ;;  %v8710_v62 = vld [vmem:[%s9645_s9 + $0x768] ss:$12 sps:$4 sm:$0xff]  }
 0x2ad   : > { %v5839_v11 = vpop.permute.xlu1 %5838  ;;  %v9154_v26 = vpop.eup %9153  ;;  %9163 = vpow2.f32 %v7423_v59  ;;  %6726 = vst.msk [vmem:[%s10223_s12 + $0x1e0] sm:$0xff] %vm6665_vm3, %v6536_v37  ;;  %v3059_v17 = vadd.f32 %v3058_v13, %v825_v36  ;;  %5998 = vperm.xlu1 %8393, %v9152_v39   ;;  %7954 = vmatprep.mubr.msk.bf16.mxu0 %vm9539_vm0, %v9538_v8 }
 0x2ae   : > { %v6537_v21 = vmul.f32 %v5839_v11, %v5403_v0  ;;  %v3060_v34 = vpop.f32.mrb[201].mxu1  ;;  %v4871_v50 = vadd.f32 1.0, %v9154_v26  ;;  %v5406_v0 = vld [vmem:[%s10208_s8 + $0x200] sm:$0xff] }
 0x2af   : > { %v3061_v53 = vpop.f32.mrb[202].mxu1  ;;  %v9156_v54 = vpop.eup %9155  ;;  %v3851_v30 = vadd.f32 %v10735_v7, %v3059_v17  ;;  %v827_v7 = vld [vmem:[%s9928_s6 + $0x330] sm:$0xff] }
 0x2b0   : > { %6727 = vst.msk [vmem:[%s10223_s12 + $0x1e8] sm:$0xff] %vm6665_vm3, %v6537_v21  ;;  %v3062_v58 = vadd.f32 %v3061_v53, %v826_v10  ;;  %v3063_v16 = vpop.f32.mrb[203].mxu1  ;;  %9165 = vrcp.f32 %v4871_v50  ;;  %v4872_v61 = vadd.f32 1.0, %v9156_v54  ;;  %v10855_v56 = vpop.f32.mrb[224].mxu0  ;;  %v5407_v10 = vld [vmem:[%s10208_s8 + $0x208] sm:$0xff] }
 0x2b1   : > { %v7424_v9 = vmul.f32 -1.442695, %v3851_v30  ;;  %3273 = vmatmul.mubr.bf16.gmra.mrb[200].mxu1 %v8702_v19  ;;  %v7848_v57 = vpop.f32.mrb[225].mxu0  ;;  %v830_v19 = vld [vmem:[%s9928_s6 + $0x348] sm:$0xff]  ;;  %v8716_v54 = vld [vmem:[%s9645_s9 + $0x784] ss:$12 sps:$4 sm:$0xff]  }
 0x2b2   : > { %v3854_v1 = vadd.f32 %v10741_v12, %v3062_v58  ;;  %9167 = vrcp.f32 %v4872_v61  ;;  %v5844_v27 = vpop.permute.xlu0 %5843  ;;  %3280 = vmatprep.mubr.bf16.mxu1 %v8708_v6  ;;  %v10861_v32 = vpop.f32.mrb[226].mxu0 }
 0x2b3   : > { %v9158_v40 = vpop.eup %9157  ;;  %9169 = vpow2.f32 %v7424_v9  ;;  %v6538_v41 = vmul.f32 %v5844_v27, %v5404_v31  ;;  %v7849_v59 = vpop.f32.mrb[227].mxu0  ;;  %v8733_v31 = vld [vmem:[%s9645_s9 + $0x7e8] ss:$12 sps:$4 sm:$0xff]  }
 0x2b4   : > { %v7425_v45 = vmul.f32 -1.442695, %v3854_v1  ;;  %6003 = vperm.xlu0 %8392, %v9158_v40   ;;  %v9160_v12 = vpop.eup %9159  ;;  %v3066_v47 = vpop.f32.mrb[204].mxu1  ;;  %7955 = vmatmul.mubr.msk.bf16.gmra.mrb[76].mxu0 %vm2334_vm2, %v8729_v2  ;;  %v8714_v2 = vld [vmem:[%s9645_s9 + $0x780] ss:$12 sps:$4 sm:$0xff]  }
 0x2b5   : > { %v5849_v18 = vpop.permute.xlu1 %5848  ;;  %v9162_v44 = vpop.eup %9161  ;;  %6728 = vst.msk [vmem:[%s10223_s12 + $0x1f0] sm:$0xff] %vm6665_vm3, %v6538_v41  ;;  %v3067_v14 = vadd.f32 %v3066_v47, %v827_v7  ;;  %6008 = vperm.xlu1 %8393, %v9160_v12   ;;  %7958 = vmatprep.mubr.msk.bf16.mxu0 %vm9539_vm0, %v9538_v8 }
 0x2b6   : > { %9171 = vpow2.f32 %v7425_v45  ;;  %v6539_v51 = vmul.f32 %v5849_v18, %v5405_v38  ;;  %v3068_v23 = vpop.f32.mrb[205].mxu1  ;;  %v4873_v60 = vadd.f32 1.0, %v9162_v44  ;;  %v5408_v38 = vld [vmem:[%s10208_s8 + $0x210] sm:$0xff] }
 0x2b7   : > { %v3069_v3 = vpop.f32.mrb[206].mxu1  ;;  %v9164_v4 = vpop.eup %9163  ;;  %v3859_v43 = vadd.f32 %v10755_v42, %v3067_v14  ;;  %v829_v42 = vld [vmem:[%s9928_s6 + $0x340] sm:$0xff] }
 0x2b8   : > { %6729 = vst.msk [vmem:[%s10223_s12 + $0x1f8] sm:$0xff] %vm6665_vm3, %v6539_v51  ;;  %v3070_v55 = vadd.f32 %v3069_v3, %v828_v15  ;;  %v3071_v5 = vpop.f32.mrb[207].mxu1  ;;  %9173 = vrcp.f32 %v4873_v60  ;;  %v4874_v36 = vadd.f32 1.0, %v9164_v4  ;;  %v10875_v30 = vpop.f32.mrb[228].mxu0  ;;  %v5409_v15 = vld [vmem:[%s10208_s8 + $0x218] sm:$0xff] }
 0x2b9   : > { %v7426_v37 = vmul.f32 -1.442695, %v3859_v43  ;;  %3281 = vmatmul.mubr.bf16.gmra.mrb[204].mxu1 %v8706_v49  ;;  %v7852_v61 = vpop.f32.mrb[229].mxu0  ;;  %v832_v49 = vld [vmem:[%s9928_s6 + $0x358] sm:$0xff] }
 0x2ba   : > { %v3862_v39 = vadd.f32 %v10761_v46, %v3070_v55  ;;  %v9166_v13 = vpop.eup %9165  ;;  %9175 = vrcp.f32 %v4874_v36  ;;  %3288 = vmatprep.mubr.bf16.mxu1 %v8712_v25  ;;  %v10881_v27 = vpop.f32.mrb[230].mxu0  ;;  %v8720_v4 = vld [vmem:[%s9645_s9 + $0x79c] ss:$12 sps:$4 sm:$0xff]  }
 0x2bb   : > { %v5854_v11 = vpop.permute.xlu0 %5853  ;;  %9177 = vpow2.f32 %v7426_v37  ;;  %6013 = vperm.xlu0 %8392, %v9166_v13   ;;  %v7853_v45 = vpop.f32.mrb[231].mxu0 }
 0x2bc   : > { %v7427_v26 = vmul.f32 -1.442695, %v3862_v39  ;;  %v6540_v17 = vmul.f32 %v5854_v11, %v5406_v0  ;;  %v9168_v46 = vpop.eup %9167  ;;  %v3074_v21 = vpop.f32.mrb[208].mxu1  ;;  %7959 = vmatmul.mubr.msk.bf16.gmra.mrb[80].mxu0 %vm2334_vm2, %v8733_v31  ;;  %v8737_v0 = vld [vmem:[%s9645_s9 + $0x800] ss:$12 sps:$4 sm:$0xff]  }
 0x2bd   : > { %v5859_v34 = vpop.permute.xlu1 %5858  ;;  %v9170_v6 = vpop.eup %9169  ;;  %v3075_v50 = vadd.f32 %v3074_v21, %v829_v42  ;;  %6018 = vperm.xlu1 %8393, %v9168_v46   ;;  %7962 = vmatprep.mubr.msk.bf16.mxu0 %vm9539_vm0, %v9538_v8  ;;  %v8718_v31 = vld [vmem:[%s9645_s9 + $0x798] ss:$12 sps:$4 sm:$0xff]  }
 0x2be   : > { %9179 = vpow2.f32 %v7427_v26  ;;  %6730 = vst.msk [vmem:[%s10223_s12 + $0x200] sm:$0xff] %vm6665_vm3, %v6540_v17  ;;  %v6541_v53 = vmul.f32 %v5859_v34, %v5407_v10  ;;  %v3076_v33 = vpop.f32.mrb[209].mxu1  ;;  %v4875_v58 = vadd.f32 1.0, %v9170_v6  ;;  %v5410_v10 = vld [vmem:[%s10208_s8 + $0x220] sm:$0xff] }
 0x2bf   : > { %v3077_v16 = vpop.f32.mrb[210].mxu1  ;;  %v3867_v9 = vadd.f32 %v10775_v52, %v3075_v50  ;;  %v831_v52 = vld [vmem:[%s9928_s6 + $0x350] sm:$0xff]  ;;  %v10895_v43 = vpop.f32.mrb[232].mxu0 }
 0x2c0   : > { %v9172_v63 = vpop.eup %9171  ;;  %6731 = vst.msk [vmem:[%s10223_s12 + $0x208] sm:$0xff] %vm6665_vm3, %v6541_v53  ;;  %v3078_v1 = vadd.f32 %v3077_v16, %v830_v19  ;;  %v3079_v40 = vpop.f32.mrb[211].mxu1  ;;  %9181 = vrcp.f32 %v4875_v58  ;;  %v5411_v19 = vld [vmem:[%s10208_s8 + $0x228] sm:$0xff] }
 0x2c1   : > { %v4876_v7 = vadd.f32 1.0, %v9172_v63  ;;  %v7428_v41 = vmul.f32 -1.442695, %v3867_v9  ;;  %3289 = vmatmul.mubr.bf16.gmra.mrb[208].mxu1 %v8710_v62  ;;  %v7856_v36 = vpop.f32.mrb[233].mxu0  ;;  %v834_v62 = vld [vmem:[%s9928_s6 + $0x368] sm:$0xff] }
 0x2c2   : > { %v3870_v12 = vadd.f32 %v10781_v20, %v3078_v1  ;;  %v9174_v47 = vpop.eup %9173  ;;  %3296 = vmatprep.mubr.bf16.mxu1 %v8716_v54  ;;  %v10901_v11 = vpop.f32.mrb[234].mxu0  ;;  %v8724_v63 = vld [vmem:[%s9645_s9 + $0x7b4] ss:$12 sps:$4 sm:$0xff]  }
 0x2c3   : > { %9183 = vrcp.f32 %v4876_v7  ;;  %v5864_v18 = vpop.permute.xlu0 %5863  ;;  %6023 = vperm.xlu0 %8392, %v9174_v47   ;;  %v7857_v26 = vpop.f32.mrb[235].mxu0 }
 0x2c4   : > { %9185 = vpow2.f32 %v7428_v41  ;;  %v7429_v44 = vmul.f32 -1.442695, %v3870_v12  ;;  %v6542_v14 = vmul.f32 %v5864_v18, %v5408_v38  ;;  %v9176_v20 = vpop.eup %9175  ;;  %v3082_v51 = vpop.f32.mrb[212].mxu1  ;;  %7963 = vmatmul.mubr.msk.bf16.gmra.mrb[84].mxu0 %vm2334_vm2, %v8737_v0  ;;  %v8741_v38 = vld [vmem:[%s9645_s9 + $0x818] ss:$12 sps:$4 sm:$0xff]  }
 0x2c5   : > { %v5869_v23 = vpop.permute.xlu1 %5868  ;;  %v9178_v25 = vpop.eup %9177  ;;  %v3083_v60 = vadd.f32 %v3082_v51, %v831_v52  ;;  %6028 = vperm.xlu1 %8393, %v9176_v20   ;;  %7966 = vmatprep.mubr.msk.bf16.mxu0 %vm9539_vm0, %v9538_v8  ;;  %v8722_v0 = vld [vmem:[%s9645_s9 + $0x7b0] ss:$12 sps:$4 sm:$0xff]  }
 0x2c6   : > { %9187 = vpow2.f32 %v7429_v44  ;;  %6732 = vst.msk [vmem:[%s10223_s12 + $0x210] sm:$0xff] %vm6665_vm3, %v6542_v14  ;;  %v6543_v3 = vmul.f32 %v5869_v23, %v5409_v15  ;;  %v3084_v57 = vpop.f32.mrb[213].mxu1  ;;  %v4877_v55 = vadd.f32 1.0, %v9178_v25  ;;  %v5412_v15 = vld [vmem:[%s10208_s8 + $0x230] sm:$0xff] }
 0x2c7   : > { %v3085_v5 = vpop.f32.mrb[214].mxu1  ;;  %v3875_v37 = vadd.f32 %v10795_v48, %v3083_v60  ;;  %v833_v48 = vld [vmem:[%s9928_s6 + $0x360] sm:$0xff]  ;;  %v10915_v9 = vpop.f32.mrb[236].mxu0 }
 0x2c8   : > { %v9180_v59 = vpop.eup %9179  ;;  %6733 = vst.msk [vmem:[%s10223_s12 + $0x218] sm:$0xff] %vm6665_vm3, %v6543_v3  ;;  %v3086_v39 = vadd.f32 %v3085_v5, %v832_v49  ;;  %v3087_v13 = vpop.f32.mrb[215].mxu1  ;;  %9189 = vrcp.f32 %v4877_v55  ;;  %v5413_v49 = vld [vmem:[%s10208_s8 + $0x238] sm:$0xff] }
 0x2c9   : > { %v4878_v42 = vadd.f32 1.0, %v9180_v59  ;;  %v7430_v17 = vmul.f32 -1.442695, %v3875_v37  ;;  %3297 = vmatmul.mubr.bf16.gmra.mrb[212].mxu1 %v8714_v2  ;;  %v7860_v7 = vpop.f32.mrb[237].mxu0  ;;  %v836_v2 = vld [vmem:[%s9928_s6 + $0x378] sm:$0xff] }
 0x2ca   : > { %v3878_v46 = vadd.f32 %v10801_v28, %v3086_v39  ;;  %v9182_v21 = vpop.eup %9181  ;;  %3304 = vmatprep.mubr.bf16.mxu1 %v8720_v4  ;;  %v10921_v18 = vpop.f32.mrb[238].mxu0  ;;  %v8728_v59 = vld [vmem:[%s9645_s9 + $0x7cc] ss:$12 sps:$4 sm:$0xff]  }
 0x2cb   : > { %9191 = vrcp.f32 %v4878_v42  ;;  %v5874_v34 = vpop.permute.xlu0 %5873  ;;  %6033 = vperm.xlu0 %8392, %v9182_v21   ;;  %v7861_v44 = vpop.f32.mrb[239].mxu0 }
 0x2cc   : > { %9193 = vpow2.f32 %v7430_v17  ;;  %v7431_v6 = vmul.f32 -1.442695, %v3878_v46  ;;  %v6544_v50 = vmul.f32 %v5874_v34, %v5410_v10  ;;  %v3090_v53 = vpop.f32.mrb[216].mxu1  ;;  %v5879_v33 = vpop.permute.xlu1 %5878  ;;  %7967 = vmatmul.mubr.msk.bf16.gmra.mrb[88].mxu0 %vm2334_vm2, %v8741_v38  ;;  %v8745_v10 = vld [vmem:[%s9645_s9 + $0x830] ss:$12 sps:$4 sm:$0xff]  }
 0x2cd   : > { %v9184_v28 = vpop.eup %9183  ;;  %v3091_v58 = vadd.f32 %v3090_v53, %v833_v48  ;;  %v6545_v16 = vmul.f32 %v5879_v33, %v5411_v19  ;;  %v3092_v61 = vpop.f32.mrb[217].mxu1  ;;  %7970 = vmatprep.mubr.msk.bf16.mxu0 %vm9539_vm0, %v9538_v8  ;;  %v5414_v19 = vld [vmem:[%s10208_s8 + $0x240] sm:$0xff]  ;;  %v8726_v38 = vld [vmem:[%s9645_s9 + $0x7c8] ss:$12 sps:$4 sm:$0xff]  }
 0x2ce   : > { %v9186_v54 = vpop.eup %9185  ;;  %9195 = vpow2.f32 %v7431_v6  ;;  %6734 = vst.msk [vmem:[%s10223_s12 + $0x220] sm:$0xff] %vm6665_vm3, %v6544_v50  ;;  %6038 = vperm.xlu1 %8393, %v9184_v28   ;;  %v3093_v40 = vpop.f32.mrb[218].mxu1 }
 0x2cf   : > { %v4879_v1 = vadd.f32 1.0, %v9186_v54  ;;  %v3883_v41 = vadd.f32 %v10815_v22, %v3091_v58  ;;  %6735 = vst.msk [vmem:[%s10223_s12 + $0x228] sm:$0xff] %vm6665_vm3, %v6545_v16  ;;  %v3094_v12 = vadd.f32 %v3093_v40, %v834_v62  ;;  %v3095_v47 = vpop.f32.mrb[219].mxu1  ;;  %v835_v22 = vld [vmem:[%s9928_s6 + $0x370] sm:$0xff]  ;;  %v10935_v37 = vpop.f32.mrb[240].mxu0  ;;  %v5415_v62 = vld [vmem:[%s10208_s8 + $0x248] sm:$0xff] }
 0x2d0   : > { %v9188_v45 = vpop.eup %9187  ;;  %v7864_v42 = vpop.f32.mrb[241].mxu0 }
 0x2d1   : > { %9197 = vrcp.f32 %v4879_v1  ;;  %v4880_v52 = vadd.f32 1.0, %v9188_v45  ;;  %v7432_v14 = vmul.f32 -1.442695, %v3883_v41  ;;  %v3886_v20 = vadd.f32 %v10821_v29, %v3094_v12  ;;  %3305 = vmatmul.mubr.bf16.gmra.mrb[216].mxu1 %v8718_v31  ;;  %v10941_v34 = vpop.f32.mrb[242].mxu0  ;;  %v838_v31 = vld [vmem:[%s9928_s6 + $0x388] sm:$0xff] }
 0x2d2   : > { %v9190_v51 = vpop.eup %9189  ;;  %3312 = vmatprep.mubr.bf16.mxu1 %v8724_v63  ;;  %v7865_v6 = vpop.f32.mrb[243].mxu0  ;;  %v8732_v45 = vld [vmem:[%s9645_s9 + $0x7e4] ss:$12 sps:$4 sm:$0xff]  }
 0x2d3   : > { %9199 = vrcp.f32 %v4880_v52  ;;  %v5884_v23 = vpop.permute.xlu0 %5883  ;;  %v7433_v25 = vmul.f32 -1.442695, %v3886_v20  ;;  %6043 = vperm.xlu0 %8392, %v9190_v51  }
 0x2d4   : > { %9201 = vpow2.f32 %v7432_v14  ;;  %v6546_v60 = vmul.f32 %v5884_v23, %v5412_v15  ;;  %v3098_v3 = vpop.f32.mrb[220].mxu1  ;;  %v5889_v57 = vpop.permute.xlu1 %5888  ;;  %7971 = vmatmul.mubr.msk.bf16.gmra.mrb[92].mxu0 %vm2334_vm2, %v8745_v10  ;;  %v8749_v15 = vld [vmem:[%s9645_s9 + $0x848] ss:$12 sps:$4 sm:$0xff]   ;;  %v8730_v10 = vld [vmem:[%s9645_s9 + $0x7e0] ss:$12 sps:$4 sm:$0xff]  }
 0x2d5   : > { %v9192_v29 = vpop.eup %9191  ;;  %9203 = vpow2.f32 %v7433_v25  ;;  %v3099_v55 = vadd.f32 %v3098_v3, %v835_v22  ;;  %v6547_v5 = vmul.f32 %v5889_v57, %v5413_v49  ;;  %v3100_v36 = vpop.f32.mrb[221].mxu1  ;;  %7974 = vmatprep.mubr.msk.bf16.mxu0 %vm9539_vm0, %v9538_v8  ;;  %v5416_v49 = vld [vmem:[%s10208_s8 + $0x250] sm:$0xff] }
 0x2d6   : > { %v9194_v4 = vpop.eup %9193  ;;  %6736 = vst.msk [vmem:[%s10223_s12 + $0x230] sm:$0xff] %vm6665_vm3, %v6546_v60  ;;  %6048 = vperm.xlu1 %8393, %v9192_v29   ;;  %v3101_v13 = vpop.f32.mrb[222].mxu1 }
 0x2d7   : > { %v4881_v39 = vadd.f32 1.0, %v9194_v4  ;;  %v3891_v17 = vadd.f32 %v10835_v24, %v3099_v55  ;;  %6737 = vst.msk [vmem:[%s10223_s12 + $0x238] sm:$0xff] %vm6665_vm3, %v6547_v5  ;;  %v3102_v46 = vadd.f32 %v3101_v13, %v836_v2  ;;  %v3103_v21 = vpop.f32.mrb[223].mxu1  ;;  %v837_v24 = vld [vmem:[%s9928_s6 + $0x380] sm:$0xff]  ;;  %v10955_v41 = vpop.f32.mrb[244].mxu0  ;;  %v5417_v2 = vld [vmem:[%s10208_s8 + $0x258] sm:$0xff] }
 0x2d8   : > { %v9196_v26 = vpop.eup %9195  ;;  %v7868_v52 = vpop.f32.mrb[245].mxu0 }
 0x2d9   : > { %9205 = vrcp.f32 %v4881_v39  ;;  %v4882_v48 = vadd.f32 1.0, %v9196_v26  ;;  %v7434_v50 = vmul.f32 -1.442695, %v3891_v17  ;;  %v3894_v28 = vadd.f32 %v10841_v35, %v3102_v46  ;;  %3313 = vmatmul.mubr.bf16.gmra.mrb[220].mxu1 %v8722_v0  ;;  %v10961_v23 = vpop.f32.mrb[246].mxu0  ;;  %v840_v0 = vld [vmem:[%s9928_s6 + $0x398] sm:$0xff] }
 0x2da   : > { %v5894_v33 = vpop.permute.xlu0 %5893  ;;  %3320 = vmatprep.mubr.bf16.mxu1 %v8728_v59  ;;  %v7869_v25 = vpop.f32.mrb[247].mxu0  ;;  %v8736_v26 = vld [vmem:[%s9645_s9 + $0x7fc] ss:$12 sps:$4 sm:$0xff]  }
 0x2db   : > { %v9198_v53 = vpop.eup %9197  ;;  %9207 = vrcp.f32 %v4882_v48  ;;  %v7435_v54 = vmul.f32 -1.442695, %v3894_v28  ;;  %v6548_v58 = vmul.f32 %v5894_v33, %v5414_v19  ;;  %v8753_v19 = vld [vmem:[%s9645_s9 + $0x860] ss:$12 sps:$4 sm:$0xff]  }
 0x2dc   : > { %9209 = vpow2.f32 %v7434_v50  ;;  %6053 = vperm.xlu0 %8392, %v9198_v53   ;;  %v3106_v16 = vpop.f32.mrb[224].mxu1  ;;  %v5899_v61 = vpop.permute.xlu1 %5898  ;;  %7975 = vmatmul.mubr.msk.bf16.gmra.mrb[96].mxu0 %vm2334_vm2, %v8749_v15  ;;  %v8734_v15 = vld [vmem:[%s9645_s9 + $0x7f8] ss:$12 sps:$4 sm:$0xff]  }
 0x2dd   : > { %v9200_v35 = vpop.eup %9199  ;;  %9211 = vpow2.f32 %v7435_v54  ;;  %6738 = vst.msk [vmem:[%s10223_s12 + $0x240] sm:$0xff] %vm6665_vm3, %v6548_v58  ;;  %v3107_v1 = vadd.f32 %v3106_v16, %v837_v24  ;;  %v6549_v40 = vmul.f32 %v5899_v61, %v5415_v62  ;;  %v3108_v7 = vpop.f32.mrb[225].mxu1  ;;  %7978 = vmatprep.mubr.msk.bf16.mxu0 %vm9539_vm0, %v9538_v8  ;;  %v5418_v62 = vld [vmem:[%s10208_s8 + $0x260] sm:$0xff] }
 0x2de   : > { %v9202_v63 = vpop.eup %9201  ;;  %6058 = vperm.xlu1 %8393, %v9200_v35   ;;  %v3109_v47 = vpop.f32.mrb[226].mxu1 }
 0x2df   : > { %v4883_v12 = vadd.f32 1.0, %v9202_v63  ;;  %v9204_v44 = vpop.eup %9203  ;;  %v3899_v14 = vadd.f32 %v10855_v56, %v3107_v1  ;;  %6739 = vst.msk [vmem:[%s10223_s12 + $0x248] sm:$0xff] %vm6665_vm3, %v6549_v40  ;;  %v3110_v20 = vadd.f32 %v3109_v47, %v838_v31  ;;  %v3111_v51 = vpop.f32.mrb[227].mxu1  ;;  %v839_v56 = vld [vmem:[%s9928_s6 + $0x390] sm:$0xff]  ;;  %v5419_v31 = vld [vmem:[%s10208_s8 + $0x268] sm:$0xff] }
 0x2e0   : > { %v4884_v22 = vadd.f32 1.0, %v9204_v44  ;;  %v10975_v17 = vpop.f32.mrb[248].mxu0  ;;  %v8740_v44 = vld [vmem:[%s9645_s9 + $0x814] ss:$12 sps:$4 sm:$0xff]  }
 0x2e1   : > { %9213 = vrcp.f32 %v4883_v12  ;;  %v7436_v60 = vmul.f32 -1.442695, %v3899_v14  ;;  %v3902_v29 = vadd.f32 %v10861_v32, %v3110_v20  ;;  %3321 = vmatmul.mubr.bf16.gmra.mrb[224].mxu1 %v8726_v38  ;;  %v7872_v48 = vpop.f32.mrb[249].mxu0  ;;  %v842_v38 = vld [vmem:[%s9928_s6 + $0x3a8] sm:$0xff] }
 0x2e2   : > { %9215 = vrcp.f32 %v4884_v22  ;;  %v5904_v57 = vpop.permute.xlu0 %5903  ;;  %3328 = vmatprep.mubr.bf16.mxu1 %v8732_v45  ;;  %v10981_v33 = vpop.f32.mrb[250].mxu0 }
 0x2e3   : > { %v9206_v3 = vpop.eup %9205  ;;  %9217 = vpow2.f32 %v7436_v60  ;;  %v7437_v4 = vmul.f32 -1.442695, %v3902_v29  ;;  %v6550_v55 = vmul.f32 %v5904_v57, %v5416_v49  ;;  %v7873_v54 = vpop.f32.mrb[251].mxu0  ;;  %v8757_v49 = vld [vmem:[%s9645_s9 + $0x878] ss:$12 sps:$4 sm:$0xff]  }
 0x2e4   : > { %6063 = vperm.xlu0 %8392, %v9206_v3   ;;  %v3114_v5 = vpop.f32.mrb[228].mxu1  ;;  %v5909_v36 = vpop.permute.xlu1 %5908  ;;  %7979 = vmatmul.mubr.msk.bf16.gmra.mrb[100].mxu0 %vm2334_vm2, %v8753_v19  ;;  %v8738_v19 = vld [vmem:[%s9645_s9 + $0x810] ss:$12 sps:$4 sm:$0xff]  }
 0x2e5   : > { %v9208_v32 = vpop.eup %9207  ;;  %9219 = vpow2.f32 %v7437_v4  ;;  %6740 = vst.msk [vmem:[%s10223_s12 + $0x250] sm:$0xff] %vm6665_vm3, %v6550_v55  ;;  %v3115_v39 = vadd.f32 %v3114_v5, %v839_v56  ;;  %v6551_v13 = vmul.f32 %v5909_v36, %v5417_v2  ;;  %v3116_v42 = vpop.f32.mrb[229].mxu1  ;;  %7982 = vmatprep.mubr.msk.bf16.mxu0 %vm9539_vm0, %v9538_v8  ;;  %v5420_v2 = vld [vmem:[%s10208_s8 + $0x270] sm:$0xff] }
 0x2e6   : > { %v9210_v59 = vpop.eup %9209  ;;  %6068 = vperm.xlu1 %8393, %v9208_v32   ;;  %v3117_v21 = vpop.f32.mrb[230].mxu1 }
 0x2e7   : > { %v4885_v46 = vadd.f32 1.0, %v9210_v59  ;;  %v9212_v6 = vpop.eup %9211  ;;  %v3907_v50 = vadd.f32 %v10875_v30, %v3115_v39  ;;  %6741 = vst.msk [vmem:[%s10223_s12 + $0x258] sm:$0xff] %vm6665_vm3, %v6551_v13  ;;  %v3118_v28 = vadd.f32 %v3117_v21, %v840_v0  ;;  %v3119_v53 = vpop.f32.mrb[231].mxu1  ;;  %v841_v30 = vld [vmem:[%s9928_s6 + $0x3a0] sm:$0xff]  ;;  %v5421_v0 = vld [vmem:[%s10208_s8 + $0x278] sm:$0xff] }
 0x2e8   : > { %v4886_v24 = vadd.f32 1.0, %v9212_v6  ;;  %v10995_v14 = vpop.f32.mrb[252].mxu0  ;;  %v8744_v6 = vld [vmem:[%s9645_s9 + $0x82c] ss:$12 sps:$4 sm:$0xff]  }
 0x2e9   : > { %9221 = vrcp.f32 %v4885_v46  ;;  %v7438_v58 = vmul.f32 -1.442695, %v3907_v50  ;;  %v3910_v35 = vadd.f32 %v10881_v27, %v3118_v28  ;;  %3329 = vmatmul.mubr.bf16.gmra.mrb[228].mxu1 %v8730_v10  ;;  %v7876_v22 = vpop.f32.mrb[253].mxu0  ;;  %v844_v10 = vld [vmem:[%s9928_s6 + $0x3b8] sm:$0xff] }
 0x2ea   : > { %9223 = vrcp.f32 %v4886_v24  ;;  %v5914_v61 = vpop.permute.xlu0 %5913  ;;  %3336 = vmatprep.mubr.bf16.mxu1 %v8736_v26  ;;  %v11001_v57 = vpop.f32.mrb[254].mxu0 }
 0x2eb   : > { %v9214_v16 = vpop.eup %9213  ;;  %9225 = vpow2.f32 %v7438_v58  ;;  %v7439_v63 = vmul.f32 -1.442695, %v3910_v35  ;;  %v6552_v1 = vmul.f32 %v5914_v61, %v5418_v62  ;;  %v7877_v4 = vpop.f32.mrb[255].mxu0  ;;  %v8761_v62 = vld [vmem:[%s9645_s9 + $0x890] ss:$12 sps:$4 sm:$0xff]  }
 0x2ec   : > { %6073 = vperm.xlu0 %8392, %v9214_v16   ;;  %v9216_v27 = vpop.eup %9215  ;;  %v3122_v40 = vpop.f32.mrb[232].mxu1  ;;  %7983 = vmatmul.mubr.msk.bf16.gmra.mrb[104].mxu0 %vm2334_vm2, %v8757_v49  ;;  %v8742_v49 = vld [vmem:[%s9645_s9 + $0x828] ss:$12 sps:$4 sm:$0xff]  }
 0x2ed   : > { %v5919_v7 = vpop.permute.xlu1 %5918  ;;  %v9218_v45 = vpop.eup %9217  ;;  %9227 = vpow2.f32 %v7439_v63  ;;  %6742 = vst.msk [vmem:[%s10223_s12 + $0x260] sm:$0xff] %vm6665_vm3, %v6552_v1  ;;  %v3123_v12 = vadd.f32 %v3122_v40, %v841_v30  ;;  %6078 = vperm.xlu1 %8393, %v9216_v27   ;;  %7986 = vmatprep.mubr.msk.bf16.mxu0 %vm9539_vm0, %v9538_v8 }
 0x2ee   : > { %v6553_v47 = vmul.f32 %v5919_v7, %v5419_v31  ;;  %v3124_v52 = vpop.f32.mrb[233].mxu1  ;;  %v4887_v20 = vadd.f32 1.0, %v9218_v45  ;;  %v5422_v31 = vld [vmem:[%s10208_s8 + $0x280] sm:$0xff] }
 0x2ef   : > { %v3125_v51 = vpop.f32.mrb[234].mxu1  ;;  %v9220_v25 = vpop.eup %9219  ;;  %v3915_v60 = vadd.f32 %v10895_v43, %v3123_v12  ;;  %v843_v43 = vld [vmem:[%s9928_s6 + $0x3b0] sm:$0xff] }
 0x2f0   : > { %6743 = vst.msk [vmem:[%s10223_s12 + $0x268] sm:$0xff] %vm6665_vm3, %v6553_v47  ;;  %v3126_v29 = vadd.f32 %v3125_v51, %v842_v38  ;;  %v3127_v3 = vpop.f32.mrb[235].mxu1  ;;  %9229 = vrcp.f32 %v4887_v20  ;;  %v4888_v56 = vadd.f32 1.0, %v9220_v25  ;;  %v11015_v50 = vpop.f32.mrb[0].mxu0  ;;  %v5423_v38 = vld [vmem:[%s10208_s8 + $0x288] sm:$0xff] }
 0x2f1   : > { %v7440_v55 = vmul.f32 -1.442695, %v3915_v60  ;;  %3337 = vmatmul.mubr.bf16.gmra.mrb[232].mxu1 %v8734_v15  ;;  %v7880_v24 = vpop.f32.mrb[1].mxu0  ;;  %v846_v15 = vld [vmem:[%s9928_s6 + $0x3c8] sm:$0xff]  ;;  %v8748_v25 = vld [vmem:[%s9645_s9 + $0x844] ss:$12 sps:$4 sm:$0xff]  }
 0x2f2   : > { %v3918_v32 = vadd.f32 %v10901_v11, %v3126_v29  ;;  %9231 = vrcp.f32 %v4888_v56  ;;  %v5924_v36 = vpop.permute.xlu0 %5923  ;;  %3344 = vmatprep.mubr.bf16.mxu1 %v8740_v44  ;;  %v11021_v61 = vpop.f32.mrb[2].mxu0 }
 0x2f3   : > { %v9222_v5 = vpop.eup %9221  ;;  %9233 = vpow2.f32 %v7440_v55  ;;  %v6554_v39 = vmul.f32 %v5924_v36, %v5420_v2  ;;  %v7881_v63 = vpop.f32.mrb[3].mxu0  ;;  %v8765_v2 = vld [vmem:[%s9645_s9 + $0x8a8] ss:$12 sps:$4 sm:$0xff]  }
 0x2f4   : > { %v7441_v59 = vmul.f32 -1.442695, %v3918_v32  ;;  %6083 = vperm.xlu0 %8392, %v9222_v5   ;;  %v9224_v11 = vpop.eup %9223  ;;  %v3130_v13 = vpop.f32.mrb[236].mxu1  ;;  %7987 = vmatmul.mubr.msk.bf16.gmra.mrb[108].mxu0 %vm2334_vm2, %v8761_v62  ;;  %v8746_v62 = vld [vmem:[%s9645_s9 + $0x840] ss:$12 sps:$4 sm:$0xff]  }
 0x2f5   : > { %v5929_v42 = vpop.permute.xlu1 %5928  ;;  %v9226_v26 = vpop.eup %9225  ;;  %6744 = vst.msk [vmem:[%s10223_s12 + $0x270] sm:$0xff] %vm6665_vm3, %v6554_v39  ;;  %v3131_v46 = vadd.f32 %v3130_v13, %v843_v43  ;;  %6088 = vperm.xlu1 %8393, %v9224_v11   ;;  %7990 = vmatprep.mubr.msk.bf16.mxu0 %vm9539_vm0, %v9538_v8 }
 0x2f6   : > { %9235 = vpow2.f32 %v7441_v59  ;;  %v6555_v21 = vmul.f32 %v5929_v42, %v5421_v0  ;;  %v3132_v48 = vpop.f32.mrb[237].mxu1  ;;  %v4889_v28 = vadd.f32 1.0, %v9226_v26  ;;  %v5424_v0 = vld [vmem:[%s10208_s8 + $0x290] sm:$0xff] }
 0x2f7   : > { %v3133_v53 = vpop.f32.mrb[238].mxu1  ;;  %v9228_v54 = vpop.eup %9227  ;;  %v3923_v58 = vadd.f32 %v10915_v9, %v3131_v46  ;;  %v845_v9 = vld [vmem:[%s9928_s6 + $0x3c0] sm:$0xff] }
 0x2f8   : > { %6745 = vst.msk [vmem:[%s10223_s12 + $0x278] sm:$0xff] %vm6665_vm3, %v6555_v21  ;;  %v3134_v35 = vadd.f32 %v3133_v53, %v844_v10  ;;  %v3135_v16 = vpop.f32.mrb[239].mxu1  ;;  %9237 = vrcp.f32 %v4889_v28  ;;  %v4890_v30 = vadd.f32 1.0, %v9228_v54  ;;  %v11035_v60 = vpop.f32.mrb[4].mxu0  ;;  %v5425_v10 = vld [vmem:[%s10208_s8 + $0x298] sm:$0xff] }
 0x2f9   : > { %v7442_v1 = vmul.f32 -1.442695, %v3923_v58  ;;  %3345 = vmatmul.mubr.bf16.gmra.mrb[236].mxu1 %v8738_v19  ;;  %v7884_v56 = vpop.f32.mrb[5].mxu0  ;;  %v848_v19 = vld [vmem:[%s9928_s6 + $0x3d8] sm:$0xff] }
 0x2fa   : > { %v3926_v27 = vadd.f32 %v10921_v18, %v3134_v35  ;;  %v9230_v40 = vpop.eup %9229  ;;  %9239 = vrcp.f32 %v4890_v30  ;;  %3352 = vmatprep.mubr.bf16.mxu1 %v8744_v6  ;;  %v11041_v36 = vpop.f32.mrb[6].mxu0  ;;  %v8752_v54 = vld [vmem:[%s9645_s9 + $0x85c] ss:$12 sps:$4 sm:$0xff]  }
 0x2fb   : > { %v5934_v7 = vpop.permute.xlu0 %5933  ;;  %9241 = vpow2.f32 %v7442_v1  ;;  %6093 = vperm.xlu0 %8392, %v9230_v40   ;;  %v7885_v59 = vpop.f32.mrb[7].mxu0 }
 0x2fc   : > { %v7443_v45 = vmul.f32 -1.442695, %v3926_v27  ;;  %v6556_v12 = vmul.f32 %v5934_v7, %v5422_v31  ;;  %v9232_v18 = vpop.eup %9231  ;;  %v3138_v47 = vpop.f32.mrb[240].mxu1  ;;  %7991 = vmatmul.mubr.msk.bf16.gmra.mrb[112].mxu0 %vm2334_vm2, %v8765_v2  ;;  %v8769_v31 = vld [vmem:[%s9645_s9 + $0x8c0] ss:$12 sps:$4 sm:$0xff]  }
 0x2fd   : > { %v5939_v52 = vpop.permute.xlu1 %5938  ;;  %v9234_v44 = vpop.eup %9233  ;;  %v3139_v20 = vadd.f32 %v3138_v47, %v845_v9  ;;  %6098 = vperm.xlu1 %8393, %v9232_v18   ;;  %7994 = vmatprep.mubr.msk.bf16.mxu0 %vm9539_vm0, %v9538_v8  ;;  %v8750_v2 = vld [vmem:[%s9645_s9 + $0x858] ss:$12 sps:$4 sm:$0xff]  }
 0x2fe   : > { %9243 = vpow2.f32 %v7443_v45  ;;  %6746 = vst.msk [vmem:[%s10223_s12 + $0x280] sm:$0xff] %vm6665_vm3, %v6556_v12  ;;  %v6557_v51 = vmul.f32 %v5939_v52, %v5423_v38  ;;  %v3140_v22 = vpop.f32.mrb[241].mxu1  ;;  %v4891_v29 = vadd.f32 1.0, %v9234_v44  ;;  %v5426_v38 = vld [vmem:[%s10208_s8 + $0x2a0] sm:$0xff] }
 0x2ff   : > { %v3141_v3 = vpop.f32.mrb[242].mxu1  ;;  %v3931_v55 = vadd.f32 %v10935_v37, %v3139_v20  ;;  %v847_v37 = vld [vmem:[%s9928_s6 + $0x3d0] sm:$0xff]  ;;  %v11055_v58 = vpop.f32.mrb[8].mxu0 }
 0x300   : > { %v9236_v4 = vpop.eup %9235  ;;  %6747 = vst.msk [vmem:[%s10223_s12 + $0x288] sm:$0xff] %vm6665_vm3, %v6557_v51  ;;  %v3142_v32 = vadd.f32 %v3141_v3, %v846_v15  ;;  %v3143_v5 = vpop.f32.mrb[243].mxu1  ;;  %9245 = vrcp.f32 %v4891_v29  ;;  %v5427_v15 = vld [vmem:[%s10208_s8 + $0x2a8] sm:$0xff] }
 0x301   : > { %v4892_v43 = vadd.f32 1.0, %v9236_v4  ;;  %v7444_v39 = vmul.f32 -1.442695, %v3931_v55  ;;  %3353 = vmatmul.mubr.bf16.gmra.mrb[240].mxu1 %v8742_v49  ;;  %v7888_v30 = vpop.f32.mrb[9].mxu0  ;;  %v850_v49 = vld [vmem:[%s9928_s6 + $0x3e8] sm:$0xff] }
 0x302   : > { %v3934_v11 = vadd.f32 %v10941_v34, %v3142_v32  ;;  %v9238_v13 = vpop.eup %9237  ;;  %3360 = vmatprep.mubr.bf16.mxu1 %v8748_v25  ;;  %v11061_v7 = vpop.f32.mrb[10].mxu0  ;;  %v8756_v4 = vld [vmem:[%s9645_s9 + $0x874] ss:$12 sps:$4 sm:$0xff]   ;;  %v8754_v30 = vld [vmem:[%s9645_s9 + $0x870] ss:$12 sps:$4 sm:$0xff]  }
 0x303   : > { %9247 = vrcp.f32 %v4892_v43  ;;  %v5944_v42 = vpop.permute.xlu0 %5943  ;;  %6103 = vperm.xlu0 %8392, %v9238_v13   ;;  %v7889_v45 = vpop.f32.mrb[11].mxu0  ;;  %v8772_v43 = vld [vmem:[%s9645_s9 + $0x8d8] ss:$0 sps:$4 sm:$0xff]  }
 0x304   : > { %9249 = vpow2.f32 %v7444_v39  ;;  %v7445_v26 = vmul.f32 -1.442695, %v3934_v11  ;;  %v6558_v46 = vmul.f32 %v5944_v42, %v5424_v0  ;;  %v9240_v34 = vpop.eup %9239  ;;  %v3146_v21 = vpop.f32.mrb[244].mxu1  ;;  %7995 = vmatmul.mubr.msk.bf16.gmra.mrb[116].mxu0 %vm2334_vm2, %v8769_v31 }
 0x305   : > { %v5949_v48 = vpop.permute.xlu1 %5948  ;;  %v9242_v6 = vpop.eup %9241  ;;  %v3147_v28 = vadd.f32 %v3146_v21, %v847_v37  ;;  %6108 = vperm.xlu1 %8393, %v9240_v34   ;;  %7998 = vmatprep.mubr.msk.bf16.mxu0 %vm9539_vm0, %v9538_v8  ;;  %v5428_v37 = vld [vmem:[%s10208_s8 + $0x2b0] sm:$0xff] }
 0x306   : > { %9251 = vpow2.f32 %v7445_v26  ;;  %6748 = vst.msk [vmem:[%s10223_s12 + $0x290] sm:$0xff] %vm6665_vm3, %v6558_v46  ;;  %v6559_v53 = vmul.f32 %v5949_v48, %v5425_v10  ;;  %v3148_v24 = vpop.f32.mrb[245].mxu1  ;;  %v4893_v35 = vadd.f32 1.0, %v9242_v6  ;;  %v851_v21 = vld [vmem:[%s9928_s6 + $0x3f0] sm:$0xff]  ;;  %v5429_v48 = vld [vmem:[%s10208_s8 + $0x2b8] sm:$0xff] }
 0x307   : > { %v3149_v16 = vpop.f32.mrb[246].mxu1  ;;  %v3939_v1 = vadd.f32 %v10955_v41, %v3147_v28  ;;  %v849_v41 = vld [vmem:[%s9928_s6 + $0x3e0] sm:$0xff]  ;;  %v11075_v55 = vpop.f32.mrb[12].mxu0  ;;  %v852_v24 = vld [vmem:[%s9928_s6 + $0x3f8] sm:$0xff] }
 0x308   : > { %v9244_v63 = vpop.eup %9243  ;;  %6749 = vst.msk [vmem:[%s10223_s12 + $0x298] sm:$0xff] %vm6665_vm3, %v6559_v53  ;;  %v3150_v27 = vadd.f32 %v3149_v16, %v848_v19  ;;  %v3151_v40 = vpop.f32.mrb[247].mxu1  ;;  %9253 = vrcp.f32 %v4893_v35 }
 0x309   : > { %v4894_v9 = vadd.f32 1.0, %v9244_v63  ;;  %v7446_v12 = vmul.f32 -1.442695, %v3939_v1  ;;  %3361 = vmatmul.mubr.bf16.gmra.mrb[244].mxu1 %v8746_v62  ;;  %v7892_v5 = vpop.f32.mrb[13].mxu0 }
 0x30a   : > { %v3942_v18 = vadd.f32 %v10961_v23, %v3150_v27  ;;  %v9246_v47 = vpop.eup %9245  ;;  %3368 = vmatprep.mubr.bf16.mxu1 %v8752_v54  ;;  %v11081_v13 = vpop.f32.mrb[14].mxu0  ;;  %v8760_v27 = vld [vmem:[%s9645_s9 + $0x88c] ss:$12 sps:$4 sm:$0xff]  }
 0x30b   : > { %9255 = vrcp.f32 %v4894_v9  ;;  %v5954_v52 = vpop.permute.xlu0 %5953  ;;  %6113 = vperm.xlu0 %8392, %v9246_v47   ;;  %v7893_v10 = vpop.f32.mrb[15].mxu0 }
 0x30c   : > { %9257 = vpow2.f32 %v7446_v12  ;;  %v7447_v44 = vmul.f32 -1.442695, %v3942_v18  ;;  %v6560_v20 = vmul.f32 %v5954_v52, %v5426_v38  ;;  %v3154_v51 = vpop.f32.mrb[248].mxu1  ;;  %7999 = vmatmul.mubr.msk.bf16.gmra.mrb[120].mxu0 %vm2334_vm2, %v8772_v43  ;;  %v5430_v52 = vld [vmem:[%s10208_s8 + $0x2c0] sm:$0xff] }
 0x30d   : > { %v9248_v23 = vpop.eup %9247  ;;  %v5959_v22 = vpop.permute.xlu1 %5958  ;;  %v3155_v29 = vadd.f32 %v3154_v51, %v849_v41  ;;  %v5431_v51 = vld [vmem:[%s10208_s8 + $0x2c8] sm:$0xff] }
 0x30e   : > { %v9250_v25 = vpop.eup %9249  ;;  %9259 = vpow2.f32 %v7447_v44  ;;  %6750 = vst.msk [vmem:[%s10223_s12 + $0x2a0] sm:$0xff] %vm6665_vm3, %v6560_v20  ;;  %v6561_v3 = vmul.f32 %v5959_v22, %v5427_v15  ;;  %v3156_v56 = vpop.f32.mrb[249].mxu1  ;;  %6118 = vperm.xlu1 %8393, %v9248_v23   ;;  %v853_v23 = vld [vmem:[%s9928_s6 + $0x400] sm:$0xff] }
 0x30f   : > { %v4895_v8 = vadd.f32 1.0, %v9250_v25  ;;  %v3157_v32 = vpop.f32.mrb[250].mxu1  ;;  %v3947_v59 = vadd.f32 %v10975_v17, %v3155_v29  ;;  %v11092_v31 = vpop.f32.mrb[16].mxu0  ;;  %v854_v56 = vld [vmem:[%s9928_s6 + $0x408] sm:$0xff] }
 0x310   : > { %v9252_v0 = vpop.eup %9251  ;;  %6751 = vst.msk [vmem:[%s10223_s12 + $0x2a8] sm:$0xff] %vm6665_vm3, %v6561_v3  ;;  %v3158_v39 = vadd.f32 %v3157_v32, %v850_v49  ;;  %v3159_v11 = vpop.f32.mrb[251].mxu1  ;;  %v8758_v32 = vld [vmem:[%s9645_s9 + $0x888] ss:$12 sps:$4 sm:$0xff]  }
 0x311   : > { %9261 = vrcp.f32 %v4895_v8  ;;  %v4896_v42 = vadd.f32 1.0, %v9252_v0  ;;  %v7448_v26 = vmul.f32 -1.442695, %v3947_v59  ;;  %3369 = vmatmul.mubr.bf16.gmra.mrb[248].mxu1 %v8750_v2  ;;  %v7896_v40 = vpop.f32.mrb[17].mxu0  ;;  %v8764_v59 = vld [vmem:[%s9645_s9 + $0x8a4] ss:$12 sps:$4 sm:$0xff]  }
 0x312   : > { %v3950_v46 = vadd.f32 %v10981_v33, %v3158_v39  ;;  %v9254_v34 = vpop.eup %9253  ;;  %3376 = vmatprep.mubr.bf16.mxu1 %v8756_v4  ;;  %v11098_v18 = vpop.f32.mrb[18].mxu0 }
 0x313   : > { %9263 = vrcp.f32 %v4896_v42  ;;  %v5964_v17 = vpop.permute.xlu0 %5963  ;;  %6123 = vperm.xlu0 %8392, %v9254_v34   ;;  %v7897_v41 = vpop.f32.mrb[19].mxu0  ;;  %v5432_v34 = vld [vmem:[%s10208_s8 + $0x2d0] sm:$0xff] }
 0x314   : > { %9265 = vpow2.f32 %v7448_v26  ;;  %v7449_v19 = vmul.f32 -1.442695, %v3950_v46  ;;  %v6562_v6 = vmul.f32 %v5964_v17, %v5428_v37  ;;  %v3162_v53 = vpop.f32.mrb[252].mxu1 }
 0x315   : > { %v9256_v28 = vpop.eup %9255  ;;  %v5969_v33 = vpop.permute.xlu1 %5968  ;;  %v3163_v54 = vadd.f32 %v3162_v53, %v851_v21 }
 0x316   : > { %v9258_v62 = vpop.eup %9257  ;;  %9267 = vpow2.f32 %v7449_v19  ;;  %6752 = vst.msk [vmem:[%s10223_s12 + $0x2b0] sm:$0xff] %vm6665_vm3, %v6562_v6  ;;  %v6563_v35 = vmul.f32 %v5969_v33, %v5429_v48  ;;  %v3164_v16 = vpop.f32.mrb[253].mxu1  ;;  %6128 = vperm.xlu1 %8393, %v9256_v28   ;;  %v855_v6 = vld [vmem:[%s9928_s6 + $0x410] sm:$0xff]  ;;  %v5433_v28 = vld [vmem:[%s10208_s8 + $0x2d8] sm:$0xff] }
 0x317   : > { %v4897_v63 = vadd.f32 1.0, %v9258_v62  ;;  %v3165_v1 = vpop.f32.mrb[254].mxu1  ;;  %v3955_v38 = vadd.f32 %v10995_v14, %v3163_v54  ;;  %v11108_v5 = vpop.f32.mrb[20].mxu0 }
 0x318   : > { %v9260_v9 = vpop.eup %9259  ;;  %6753 = vst.msk [vmem:[%s10223_s12 + $0x2b8] sm:$0xff] %vm6665_vm3, %v6563_v35  ;;  %v3166_v45 = vadd.f32 %v3165_v1, %v852_v24  ;;  %v3167_v12 = vpop.f32.mrb[255].mxu1  ;;  %v856_v35 = vld [vmem:[%s9928_s6 + $0x418] sm:$0xff]  ;;  %v8762_v1 = vld [vmem:[%s9645_s9 + $0x8a0] ss:$12 sps:$4 sm:$0xff]  }
 0x319   : > { %9269 = vrcp.f32 %v4897_v63  ;;  %v4898_v47 = vadd.f32 1.0, %v9260_v9  ;;  %v7450_v15 = vmul.f32 -1.442695, %v3955_v38  ;;  %3377 = vmatmul.mubr.bf16.gmra.mrb[252].mxu1 %v8754_v30  ;;  %v7900_v39 = vpop.f32.mrb[21].mxu0  ;;  %v8768_v38 = vld [vmem:[%s9645_s9 + $0x8bc] ss:$12 sps:$4 sm:$0xff]  }
 0x31a   : > { %v3958_v44 = vadd.f32 %v11001_v57, %v3166_v45  ;;  %3384 = vmatprep.mubr.bf16.mxu1 %v8760_v27  ;;  %v11114_v26 = vpop.f32.mrb[22].mxu0 }
 0x31b   : > { %v9262_v20 = vpop.eup %9261  ;;  %9271 = vrcp.f32 %v4898_v47  ;;  %v5974_v14 = vpop.permute.xlu0 %5973 }
 0x31c   : > { %9273 = vpow2.f32 %v7450_v15  ;;  %v7451_v22 = vmul.f32 -1.442695, %v3958_v44  ;;  %v6564_v49 = vmul.f32 %v5974_v14, %v5430_v52  ;;  %6133 = vperm.xlu0 %8392, %v9262_v20   ;;  %v3170_v29 = vpop.f32.mrb[148].mxu1  ;;  %v7901_v17 = vpop.f32.mrb[23].mxu0  ;;  %v5434_v20 = vld [vmem:[%s10208_s8 + $0x2e0] sm:$0xff] }
 0x31d   : > { %v9264_v25 = vpop.eup %9263  ;;  %v5979_v3 = vpop.permute.xlu1 %5978  ;;  %v3171_v2 = vadd.f32 %v3170_v29, %v853_v23 }
 0x31e   : > { %v9266_v57 = vpop.eup %9265  ;;  %9275 = vpow2.f32 %v7451_v22  ;;  %6754 = vst.msk [vmem:[%s10223_s12 + $0x2c0] sm:$0xff] %vm6665_vm3, %v6564_v49  ;;  %v6565_v4 = vmul.f32 %v5979_v3, %v5431_v51  ;;  %v3172_v8 = vpop.f32.mrb[149].mxu1  ;;  %6138 = vperm.xlu1 %8393, %v9264_v25   ;;  %v857_v49 = vld [vmem:[%s9928_s6 + $0x420] sm:$0xff]  ;;  %v5435_v25 = vld [vmem:[%s10208_s8 + $0x2e8] sm:$0xff] }
 0x31f   : > { %v4899_v43 = vadd.f32 1.0, %v9266_v57  ;;  %v3173_v0 = vpop.f32.mrb[150].mxu1  ;;  %v3963_v42 = vadd.f32 %v11015_v50, %v3171_v2  ;;  %v11124_v27 = vpop.f32.mrb[24].mxu0 }
 0x320   : > { %v9268_v11 = vpop.eup %9267  ;;  %6755 = vst.msk [vmem:[%s10223_s12 + $0x2c8] sm:$0xff] %vm6665_vm3, %v6565_v4  ;;  %v3174_v37 = vadd.f32 %v3173_v0, %v854_v56  ;;  %v3175_v10 = vpop.f32.mrb[151].mxu1  ;;  %v11137_v56 = vld [vmem:[%s9645_s9 + $0x8d0] sm:$0xff] }
 0x321   : > { %9277 = vrcp.f32 %v4899_v43  ;;  %v4900_v46 = vadd.f32 1.0, %v9268_v11  ;;  %v7452_v21 = vmul.f32 -1.442695, %v3963_v42  ;;  %3385 = vmatmul.mubr.bf16.gmra.mrb[148].mxu1 %v8758_v32  ;;  %v7904_v45 = vpop.f32.mrb[25].mxu0 }
 0x322   : > { %v3966_v48 = vadd.f32 %v11021_v61, %v3174_v37  ;;  %3392 = vmatprep.mubr.bf16.mxu1 %v8764_v59  ;;  %v11130_v15 = vpop.f32.mrb[26].mxu0  ;;  %v8766_v59 = vld [vmem:[%s9645_s9 + $0x8b8] ss:$12 sps:$4 sm:$0xff]   ;;  %v7227_v37 = vcombine.high %v11137_v56, %v11137_v56 }
 0x323   : > { %v9270_v19 = vpop.eup %9269  ;;  %9279 = vrcp.f32 %v4900_v46  ;;  %v5984_v50 = vpop.permute.xlu0 %5983 }
 0x324   : > { %9281 = vpow2.f32 %v7452_v21  ;;  %v7453_v53 = vmul.f32 -1.442695, %v3966_v48  ;;  %v6566_v33 = vmul.f32 %v5984_v50, %v5432_v34  ;;  %6143 = vperm.xlu0 %8392, %v9270_v19   ;;  %v3178_v62 = vpop.f32.mrb[152].mxu1  ;;  %v7905_v14 = vpop.f32.mrb[27].mxu0  ;;  %v5436_v50 = vld [vmem:[%s10208_s8 + $0x2f0] sm:$0xff] }
 0x325   : > { %v9272_v24 = vpop.eup %9271  ;;  %v5989_v54 = vpop.permute.xlu1 %5988  ;;  %v3179_v16 = vadd.f32 %v3178_v62, %v855_v6  ;;  %v5437_v62 = vld [vmem:[%s10208_s8 + $0x2f8] sm:$0xff] }
 0x326   : > { %v9274_v61 = vpop.eup %9273  ;;  %9283 = vpow2.f32 %v7453_v53  ;;  %6756 = vst.msk [vmem:[%s10223_s12 + $0x2d0] sm:$0xff] %vm6665_vm3, %v6566_v33  ;;  %v6567_v30 = vmul.f32 %v5989_v54, %v5433_v28  ;;  %v3180_v63 = vpop.f32.mrb[153].mxu1  ;;  %6148 = vperm.xlu1 %8393, %v9272_v24   ;;  %v859_v24 = vld [vmem:[%s9928_s6 + $0x430] sm:$0xff] }
 0x327   : > { %v4901_v40 = vadd.f32 1.0, %v9274_v61  ;;  %v3181_v9 = vpop.f32.mrb[154].mxu1  ;;  %v3971_v47 = vadd.f32 %v11035_v60, %v3179_v16  ;;  %v11143_v39 = vpop.f32.mrb[28].mxu0  ;;  %v860_v63 = vld [vmem:[%s9928_s6 + $0x438] sm:$0xff] }
 0x328   : > { %v9276_v12 = vpop.eup %9275  ;;  %6757 = vst.msk [vmem:[%s10223_s12 + $0x2d8] sm:$0xff] %vm6665_vm3, %v6567_v30  ;;  %v3182_v52 = vadd.f32 %v3181_v9, %v856_v35  ;;  %v3183_v41 = vpop.f32.mrb[155].mxu1 }
 0x329   : > { %9285 = vrcp.f32 %v4901_v40  ;;  %v4902_v44 = vadd.f32 1.0, %v9276_v12  ;;  %v7454_v23 = vmul.f32 -1.442695, %v3971_v47  ;;  %3393 = vmatmul.mubr.bf16.gmra.mrb[152].mxu1 %v8762_v1  ;;  %v7908_v10 = vpop.f32.mrb[29].mxu0 }
 0x32a   : > { %v3974_v51 = vadd.f32 %v11041_v36, %v3182_v52  ;;  %3400 = vmatprep.mubr.bf16.mxu1 %v8768_v38  ;;  %v858_v36 = vld [vmem:[%s9928_s6 + $0x428] sm:$0xff]  ;;  %v11150_v48 = vpop.f32.mrb[30].mxu0  ;;  %v7226_v38 = vcombine.low %v11137_v56, %v11137_v56 }
 0x32b   : > { %v9278_v22 = vpop.eup %9277  ;;  %9287 = vrcp.f32 %v4902_v44  ;;  %v5994_v60 = vpop.permute.xlu0 %5993  ;;  %v5439_v56 = vld [vmem:[%s10208_s8 + $0x308] sm:$0xff] }
 0x32c   : > { %9289 = vpow2.f32 %v7454_v23  ;;  %v7455_v29 = vmul.f32 -1.442695, %v3974_v51  ;;  %v6568_v3 = vmul.f32 %v5994_v60, %v5434_v20  ;;  %6153 = vperm.xlu0 %8392, %v9278_v22   ;;  %v3186_v2 = vpop.f32.mrb[156].mxu1  ;;  %v5999_v4 = vpop.permute.xlu1 %5998  ;;  %v5438_v22 = vld [vmem:[%s10208_s8 + $0x300] sm:$0xff] }
 0x32d   : > { %v9280_v57 = vpop.eup %9279  ;;  %v3187_v32 = vadd.f32 %v3186_v2, %v857_v49  ;;  %v6569_v43 = vmul.f32 %v5999_v4, %v5435_v25  ;;  %v3188_v0 = vpop.f32.mrb[157].mxu1 }
 0x32e   : > { %v9282_v8 = vpop.eup %9281  ;;  %9291 = vpow2.f32 %v7455_v29  ;;  %6758 = vst.msk [vmem:[%s10223_s12 + $0x2e0] sm:$0xff] %vm6665_vm3, %v6568_v3  ;;  %6158 = vperm.xlu1 %8393, %v9280_v57   ;;  %v3189_v42 = vpop.f32.mrb[158].mxu1  ;;  %v861_v3 = vld [vmem:[%s9928_s6 + $0x440] sm:$0xff] }
 0x32f   : > { %v4903_v11 = vadd.f32 1.0, %v9282_v8  ;;  %v3979_v34 = vadd.f32 %v11055_v58, %v3187_v32  ;;  %6759 = vst.msk [vmem:[%s10223_s12 + $0x2e8] sm:$0xff] %vm6665_vm3, %v6569_v43  ;;  %v3190_v17 = vadd.f32 %v3189_v42, %v858_v36  ;;  %v3191_v21 = vpop.f32.mrb[159].mxu1  ;;  %v7909_v6 = vpop.f32.mrb[31].mxu0  ;;  %v862_v32 = vld [vmem:[%s9928_s6 + $0x448] sm:$0xff] }
 0x330   : > { %v9284_v46 = vpop.eup %9283  ;;  %v11161_v45 = vpop.f32.mrb[32].mxu0  ;;  %v5440_v6 = vld [vmem:[%s10208_s8 + $0x310] sm:$0xff] }
 0x331   : > { %9293 = vrcp.f32 %v4903_v11  ;;  %v4904_v19 = vadd.f32 1.0, %v9284_v46  ;;  %v7456_v28 = vmul.f32 -1.442695, %v3979_v34  ;;  %v3982_v53 = vadd.f32 %v11061_v7, %v3190_v17  ;;  %3401 = vmatmul.mubr.bf16.gmra.mrb[156].mxu1 %v8766_v59  ;;  %v7912_v52 = vpop.f32.mrb[33].mxu0 }
 0x332   : > { %3408 = vmatprep.mubr.bf16.mxu1 %v7227_v37  ;;  %v11166_v23 = vpop.f32.mrb[34].mxu0 }
 0x333   : > { %v9286_v33 = vpop.eup %9285  ;;  %9295 = vrcp.f32 %v4904_v19  ;;  %v6004_v58 = vpop.permute.xlu0 %6003  ;;  %v7457_v54 = vmul.f32 -1.442695, %v3982_v53 }
 0x334   : > { %9297 = vpow2.f32 %v7456_v28  ;;  %v6570_v35 = vmul.f32 %v6004_v58, %v5436_v50  ;;  %6163 = vperm.xlu0 %8392, %v9286_v33   ;;  %v3194_v16 = vpop.f32.mrb[160].mxu1  ;;  %v6009_v30 = vpop.permute.xlu1 %6008 }
 0x335   : > { %v9288_v61 = vpop.eup %9287  ;;  %9299 = vpow2.f32 %v7457_v54  ;;  %v3195_v7 = vadd.f32 %v3194_v16, %v859_v24  ;;  %v6571_v40 = vmul.f32 %v6009_v30, %v5437_v62  ;;  %v3196_v9 = vpop.f32.mrb[161].mxu1  ;;  %v863_v62 = vld [vmem:[%s9928_s6 + $0x450] sm:$0xff] }
 0x336   : > { %v9290_v1 = vpop.eup %9289  ;;  %6760 = vst.msk [vmem:[%s10223_s12 + $0x2f0] sm:$0xff] %vm6665_vm3, %v6570_v35  ;;  %6168 = vperm.xlu1 %8393, %v9288_v61   ;;  %v3197_v47 = vpop.f32.mrb[162].mxu1 }
 0x337   : > { %v4905_v12 = vadd.f32 1.0, %v9290_v1  ;;  %v3987_v44 = vadd.f32 %v11075_v55, %v3195_v7  ;;  %6761 = vst.msk [vmem:[%s10223_s12 + $0x2f8] sm:$0xff] %vm6665_vm3, %v6571_v40  ;;  %v3198_v20 = vadd.f32 %v3197_v47, %v860_v63  ;;  %v3199_v14 = vpop.f32.mrb[163].mxu1  ;;  %v7913_v60 = vpop.f32.mrb[35].mxu0  ;;  %v864_v63 = vld [vmem:[%s9928_s6 + $0x458] sm:$0xff] }
 0x338   : > { %v9292_v41 = vpop.eup %9291  ;;  %v11175_v11 = vpop.f32.mrb[36].mxu0 }
 0x339   : > { %9301 = vrcp.f32 %v4905_v12  ;;  %v4906_v51 = vadd.f32 1.0, %v9292_v41  ;;  %v7458_v49 = vmul.f32 -1.442695, %v3987_v44  ;;  %v3990_v25 = vadd.f32 %v11081_v13, %v3198_v20  ;;  %3409 = vmatmul.mubr.bf16.gmra.mrb[160].mxu1 %v7226_v38  ;;  %v7916_v10 = vpop.f32.mrb[37].mxu0 }
 0x33a   : > { %v6014_v55 = vpop.permute.xlu0 %6013  ;;  %v11180_v19 = vpop.f32.mrb[38].mxu0 }
 0x33b   : > { %v9294_v29 = vpop.eup %9293  ;;  %9303 = vrcp.f32 %v4906_v51  ;;  %v7459_v57 = vmul.f32 -1.442695, %v3990_v25  ;;  %v6572_v2 = vmul.f32 %v6014_v55, %v5438_v22  ;;  %v7917_v28 = vpop.f32.mrb[39].mxu0  ;;  %v5442_v22 = vld [vmem:[%s10208_s8 + $0x320] sm:$0xff] }
 0x33c   : > { %9305 = vpow2.f32 %v7458_v49  ;;  %6173 = vperm.xlu0 %8392, %v9294_v29   ;;  %v3202_v36 = vpop.f32.mrb[164].mxu1  ;;  %v6019_v8 = vpop.permute.xlu1 %6018 }
 0x33d   : > { %v9296_v4 = vpop.eup %9295  ;;  %9307 = vpow2.f32 %v7459_v57  ;;  %6762 = vst.msk [vmem:[%s10223_s12 + $0x300] sm:$0xff] %vm6665_vm3, %v6572_v2  ;;  %v3203_v13 = vadd.f32 %v3202_v36, %v861_v3  ;;  %v6573_v0 = vmul.f32 %v6019_v8, %v5439_v56  ;;  %v3204_v59 = vpop.f32.mrb[165].mxu1  ;;  %v865_v3 = vld [vmem:[%s9928_s6 + $0x460] sm:$0xff]  ;;  %v866_v8 = vld [vmem:[%s9928_s6 + $0x468] sm:$0xff] }
 0x33e   : > { %v9298_v43 = vpop.eup %9297  ;;  %6178 = vperm.xlu1 %8393, %v9296_v4   ;;  %v3205_v37 = vpop.f32.mrb[166].mxu1 }
 0x33f   : > { %v4907_v42 = vadd.f32 1.0, %v9298_v43  ;;  %v9300_v46 = vpop.eup %9299  ;;  %v3995_v34 = vadd.f32 %v11092_v31, %v3203_v13  ;;  %6763 = vst.msk [vmem:[%s10223_s12 + $0x308] sm:$0xff] %vm6665_vm3, %v6573_v0  ;;  %v3206_v17 = vadd.f32 %v3205_v37, %v862_v32  ;;  %v3207_v21 = vpop.f32.mrb[167].mxu1  ;;  %v5441_v31 = vld [vmem:[%s10208_s8 + $0x318] sm:$0xff] }
 0x340   : > { %v4908_v50 = vadd.f32 1.0, %v9300_v46  ;;  %v11189_v9 = vpop.f32.mrb[40].mxu0 }
 0x341   : > { %9309 = vrcp.f32 %v4907_v42  ;;  %v7460_v53 = vmul.f32 -1.442695, %v3995_v34  ;;  %v3998_v33 = vadd.f32 %v11098_v18, %v3206_v17  ;;  %v7920_v47 = vpop.f32.mrb[41].mxu0 }
 0x342   : > { %9311 = vrcp.f32 %v4908_v50  ;;  %v6024_v24 = vpop.permute.xlu0 %6023  ;;  %v11194_v14 = vpop.f32.mrb[42].mxu0 }
 0x343   : > { %v9302_v58 = vpop.eup %9301  ;;  %9313 = vpow2.f32 %v7460_v53  ;;  %v7461_v54 = vmul.f32 -1.442695, %v3998_v33  ;;  %v6574_v35 = vmul.f32 %v6024_v24, %v5440_v6  ;;  %v7921_v60 = vpop.f32.mrb[43].mxu0  ;;  %v5444_v6 = vld [vmem:[%s10208_s8 + $0x330] sm:$0xff] }
 0x344   : > { %6183 = vperm.xlu0 %8392, %v9302_v58   ;;  %v3210_v16 = vpop.f32.mrb[168].mxu1  ;;  %v6029_v30 = vpop.permute.xlu1 %6028 }
 0x345   : > { %v9304_v61 = vpop.eup %9303  ;;  %9315 = vpow2.f32 %v7461_v54  ;;  %6764 = vst.msk [vmem:[%s10223_s12 + $0x310] sm:$0xff] %vm6665_vm3, %v6574_v35  ;;  %v3211_v18 = vadd.f32 %v3210_v16, %v863_v62  ;;  %v6575_v7 = vmul.f32 %v6029_v30, %v5441_v31  ;;  %v3212_v40 = vpop.f32.mrb[169].mxu1  ;;  %v867_v62 = vld [vmem:[%s9928_s6 + $0x470] sm:$0xff]  ;;  %v868_v30 = vld [vmem:[%s9928_s6 + $0x478] sm:$0xff] }
 0x346   : > { %v9306_v1 = vpop.eup %9305  ;;  %6188 = vperm.xlu1 %8393, %v9304_v61   ;;  %v3213_v12 = vpop.f32.mrb[170].mxu1 }
 0x347   : > { %v4909_v38 = vadd.f32 1.0, %v9306_v1  ;;  %v9308_v52 = vpop.eup %9307  ;;  %v4003_v41 = vadd.f32 %v11108_v5, %v3211_v18  ;;  %6765 = vst.msk [vmem:[%s10223_s12 + $0x318] sm:$0xff] %vm6665_vm3, %v6575_v7  ;;  %v3214_v44 = vadd.f32 %v3213_v12, %v864_v63  ;;  %v3215_v20 = vpop.f32.mrb[171].mxu1  ;;  %v5443_v5 = vld [vmem:[%s10208_s8 + $0x328] sm:$0xff] }
 0x348   : > { %v4910_v51 = vadd.f32 1.0, %v9308_v52  ;;  %v11203_v0 = vpop.f32.mrb[44].mxu0 }
 0x349   : > { %9317 = vrcp.f32 %v4909_v38  ;;  %v7462_v49 = vmul.f32 -1.442695, %v4003_v41  ;;  %v4006_v25 = vadd.f32 %v11114_v26, %v3214_v44  ;;  %v7924_v37 = vpop.f32.mrb[45].mxu0 }
 0x34a   : > { %9319 = vrcp.f32 %v4910_v51  ;;  %v6034_v55 = vpop.permute.xlu0 %6033  ;;  %v11208_v21 = vpop.f32.mrb[46].mxu0 }
 0x34b   : > { %v9310_v29 = vpop.eup %9309  ;;  %9321 = vpow2.f32 %v7462_v49  ;;  %v7463_v56 = vmul.f32 -1.442695, %v4006_v25  ;;  %v6576_v57 = vmul.f32 %v6034_v55, %v5442_v22  ;;  %v7925_v28 = vpop.f32.mrb[47].mxu0  ;;  %v5446_v22 = vld [vmem:[%s10208_s8 + $0x340] sm:$0xff] }
 0x34c   : > { %6193 = vperm.xlu0 %8392, %v9310_v29   ;;  %v9312_v2 = vpop.eup %9311  ;;  %v3218_v4 = vpop.f32.mrb[172].mxu1 }
 0x34d   : > { %v6039_v36 = vpop.permute.xlu1 %6038  ;;  %v9314_v32 = vpop.eup %9313  ;;  %9323 = vpow2.f32 %v7463_v56  ;;  %6766 = vst.msk [vmem:[%s10223_s12 + $0x320] sm:$0xff] %vm6665_vm3, %v6576_v57  ;;  %v3219_v26 = vadd.f32 %v3218_v4, %v865_v3  ;;  %6198 = vperm.xlu1 %8393, %v9312_v2   ;;  %v869_v3 = vld [vmem:[%s9928_s6 + $0x480] sm:$0xff] }
 0x34e   : > { %v6577_v43 = vmul.f32 %v6039_v36, %v5443_v5  ;;  %v3220_v13 = vpop.f32.mrb[173].mxu1  ;;  %v4911_v59 = vadd.f32 1.0, %v9314_v32  ;;  %v870_v36 = vld [vmem:[%s9928_s6 + $0x488] sm:$0xff] }
 0x34f   : > { %v3221_v42 = vpop.f32.mrb[174].mxu1  ;;  %v9316_v10 = vpop.eup %9315  ;;  %v4011_v46 = vadd.f32 %v11124_v27, %v3219_v26  ;;  %v5445_v27 = vld [vmem:[%s10208_s8 + $0x338] sm:$0xff] }
 0x350   : > { %6767 = vst.msk [vmem:[%s10223_s12 + $0x328] sm:$0xff] %vm6665_vm3, %v6577_v43  ;;  %v3222_v34 = vadd.f32 %v3221_v42, %v866_v8  ;;  %v3223_v17 = vpop.f32.mrb[175].mxu1  ;;  %9325 = vrcp.f32 %v4911_v59  ;;  %v4912_v50 = vadd.f32 1.0, %v9316_v10  ;;  %v11217_v7 = vpop.f32.mrb[48].mxu0 }
 0x351   : > { %v7464_v53 = vmul.f32 -1.442695, %v4011_v46  ;;  %v7928_v12 = vpop.f32.mrb[49].mxu0 }
 0x352   : > { %v4014_v33 = vadd.f32 %v11130_v15, %v3222_v34  ;;  %9327 = vrcp.f32 %v4912_v50  ;;  %v6044_v24 = vpop.permute.xlu0 %6043  ;;  %v11222_v20 = vpop.f32.mrb[50].mxu0 }
 0x353   : > { %v9318_v58 = vpop.eup %9317  ;;  %9329 = vpow2.f32 %v7464_v53  ;;  %v6578_v54 = vmul.f32 %v6044_v24, %v5444_v6  ;;  %v7929_v60 = vpop.f32.mrb[51].mxu0  ;;  %v5448_v6 = vld [vmem:[%s10208_s8 + $0x350] sm:$0xff] }
 0x354   : > { %v7465_v31 = vmul.f32 -1.442695, %v4014_v33  ;;  %6203 = vperm.xlu0 %8392, %v9318_v58   ;;  %v9320_v35 = vpop.eup %9319  ;;  %v3226_v61 = vpop.f32.mrb[176].mxu1 }
 0x355   : > { %v6049_v16 = vpop.permute.xlu1 %6048  ;;  %v9322_v63 = vpop.eup %9321  ;;  %6768 = vst.msk [vmem:[%s10223_s12 + $0x330] sm:$0xff] %vm6665_vm3, %v6578_v54  ;;  %v3227_v15 = vadd.f32 %v3226_v61, %v867_v62  ;;  %6208 = vperm.xlu1 %8393, %v9320_v35   ;;  %v871_v62 = vld [vmem:[%s9928_s6 + $0x490] sm:$0xff] }
 0x356   : > { %9331 = vpow2.f32 %v7465_v31  ;;  %v6579_v1 = vmul.f32 %v6049_v16, %v5445_v27  ;;  %v3228_v18 = vpop.f32.mrb[177].mxu1  ;;  %v4913_v40 = vadd.f32 1.0, %v9322_v63  ;;  %v872_v16 = vld [vmem:[%s9928_s6 + $0x498] sm:$0xff] }
 0x357   : > { %v3229_v38 = vpop.f32.mrb[178].mxu1  ;;  %v9324_v47 = vpop.eup %9323  ;;  %v4019_v52 = vadd.f32 %v11143_v39, %v3227_v15  ;;  %v5447_v39 = vld [vmem:[%s10208_s8 + $0x348] sm:$0xff] }
 0x358   : > { %6769 = vst.msk [vmem:[%s10223_s12 + $0x338] sm:$0xff] %vm6665_vm3, %v6579_v1  ;;  %v3230_v41 = vadd.f32 %v3229_v38, %v868_v30  ;;  %v3231_v44 = vpop.f32.mrb[179].mxu1  ;;  %9333 = vrcp.f32 %v4913_v40  ;;  %v4914_v51 = vadd.f32 1.0, %v9324_v47  ;;  %v11231_v43 = vpop.f32.mrb[52].mxu0 }
 0x359   : > { %v7466_v49 = vmul.f32 -1.442695, %v4019_v52  ;;  %v7932_v42 = vpop.f32.mrb[53].mxu0 }
 0x35a   : > { %v4022_v25 = vadd.f32 %v11150_v48, %v3230_v41  ;;  %v9326_v29 = vpop.eup %9325  ;;  %9335 = vrcp.f32 %v4914_v51  ;;  %v11236_v17 = vpop.f32.mrb[54].mxu0 }
 0x35b   : > { %v6054_v55 = vpop.permute.xlu0 %6053  ;;  %9337 = vpow2.f32 %v7466_v49  ;;  %6213 = vperm.xlu0 %8392, %v9326_v29   ;;  %v7933_v28 = vpop.f32.mrb[55].mxu0 }
 0x35c   : > { %v7467_v5 = vmul.f32 -1.442695, %v4022_v25  ;;  %v6580_v56 = vmul.f32 %v6054_v55, %v5446_v22  ;;  %v9328_v57 = vpop.eup %9327  ;;  %v3234_v2 = vpop.f32.mrb[180].mxu1  ;;  %v5450_v22 = vld [vmem:[%s10208_s8 + $0x360] sm:$0xff] }
 0x35d   : > { %v6059_v4 = vpop.permute.xlu1 %6058  ;;  %v9330_v8 = vpop.eup %9329  ;;  %v3235_v48 = vadd.f32 %v3234_v2, %v869_v3  ;;  %6218 = vperm.xlu1 %8393, %v9328_v57   ;;  %v873_v3 = vld [vmem:[%s9928_s6 + $0x4a0] sm:$0xff] }
 0x35e   : > { %9339 = vpow2.f32 %v7467_v5  ;;  %6770 = vst.msk [vmem:[%s10223_s12 + $0x340] sm:$0xff] %vm6665_vm3, %v6580_v56  ;;  %v6581_v32 = vmul.f32 %v6059_v4, %v5447_v39  ;;  %v3236_v26 = vpop.f32.mrb[181].mxu1  ;;  %v4915_v13 = vadd.f32 1.0, %v9330_v8  ;;  %v874_v4 = vld [vmem:[%s9928_s6 + $0x4a8] sm:$0xff] }
 0x35f   : > { %v3237_v59 = vpop.f32.mrb[182].mxu1  ;;  %v4027_v10 = vadd.f32 %v11161_v45, %v3235_v48  ;;  %v5449_v45 = vld [vmem:[%s10208_s8 + $0x358] sm:$0xff]  ;;  %v11245_v1 = vpop.f32.mrb[56].mxu0 }
 0x360   : > { %v9332_v37 = vpop.eup %9331  ;;  %6771 = vst.msk [vmem:[%s10223_s12 + $0x348] sm:$0xff] %vm6665_vm3, %v6581_v32  ;;  %v3238_v46 = vadd.f32 %v3237_v59, %v870_v36  ;;  %v3239_v34 = vpop.f32.mrb[183].mxu1  ;;  %9341 = vrcp.f32 %v4915_v13 }
 0x361   : > { %v4916_v50 = vadd.f32 1.0, %v9332_v37  ;;  %v7468_v53 = vmul.f32 -1.442695, %v4027_v10  ;;  %v7936_v38 = vpop.f32.mrb[57].mxu0 }
 0x362   : > { %v4030_v33 = vadd.f32 %v11166_v23, %v3238_v46  ;;  %v9334_v58 = vpop.eup %9333  ;;  %v11250_v44 = vpop.f32.mrb[58].mxu0 }
 0x363   : > { %9343 = vrcp.f32 %v4916_v50  ;;  %v6064_v24 = vpop.permute.xlu0 %6063  ;;  %6223 = vperm.xlu0 %8392, %v9334_v58   ;;  %v7937_v60 = vpop.f32.mrb[59].mxu0 }
 0x364   : > { %9345 = vpow2.f32 %v7468_v53  ;;  %v7469_v27 = vmul.f32 -1.442695, %v4030_v33  ;;  %v6582_v31 = vmul.f32 %v6064_v24, %v5448_v6  ;;  %v9336_v54 = vpop.eup %9335  ;;  %v3242_v35 = vpop.f32.mrb[184].mxu1  ;;  %v5452_v6 = vld [vmem:[%s10208_s8 + $0x370] sm:$0xff] }
 0x365   : > { %v6069_v61 = vpop.permute.xlu1 %6068  ;;  %v9338_v30 = vpop.eup %9337  ;;  %v3243_v23 = vadd.f32 %v3242_v35, %v871_v62  ;;  %6228 = vperm.xlu1 %8393, %v9336_v54   ;;  %v875_v62 = vld [vmem:[%s9928_s6 + $0x4b0] sm:$0xff] }
 0x366   : > { %9347 = vpow2.f32 %v7469_v27  ;;  %6772 = vst.msk [vmem:[%s10223_s12 + $0x350] sm:$0xff] %vm6665_vm3, %v6582_v31  ;;  %v6583_v63 = vmul.f32 %v6069_v61, %v5449_v45  ;;  %v3244_v15 = vpop.f32.mrb[185].mxu1  ;;  %v4917_v18 = vadd.f32 1.0, %v9338_v30  ;;  %v876_v61 = vld [vmem:[%s9928_s6 + $0x4b8] sm:$0xff] }
 0x367   : > { %v3245_v40 = vpop.f32.mrb[186].mxu1  ;;  %v4035_v47 = vadd.f32 %v11175_v11, %v3243_v23  ;;  %v5451_v11 = vld [vmem:[%s10208_s8 + $0x368] sm:$0xff]  ;;  %v11259_v32 = vpop.f32.mrb[60].mxu0 }
 0x368   : > { %v9340_v12 = vpop.eup %9339  ;;  %6773 = vst.msk [vmem:[%s10223_s12 + $0x358] sm:$0xff] %vm6665_vm3, %v6583_v63  ;;  %v3246_v52 = vadd.f32 %v3245_v40, %v872_v16  ;;  %v3247_v41 = vpop.f32.mrb[187].mxu1  ;;  %9349 = vrcp.f32 %v4917_v18 }
 0x369   : > { %v4918_v51 = vadd.f32 1.0, %v9340_v12  ;;  %v7470_v49 = vmul.f32 -1.442695, %v4035_v47  ;;  %v7940_v59 = vpop.f32.mrb[61].mxu0 }
 0x36a   : > { %v4038_v25 = vadd.f32 %v11180_v19, %v3246_v52  ;;  %v9342_v29 = vpop.eup %9341  ;;  %v11264_v34 = vpop.f32.mrb[62].mxu0 }
 0x36b   : > { %9351 = vrcp.f32 %v4918_v51  ;;  %v6074_v55 = vpop.permute.xlu0 %6073  ;;  %6233 = vperm.xlu0 %8392, %v9342_v29   ;;  %v7941_v28 = vpop.f32.mrb[63].mxu0 }
 0x36c   : > { %9353 = vpow2.f32 %v7470_v49  ;;  %v7471_v39 = vmul.f32 -1.442695, %v4038_v25  ;;  %v6584_v5 = vmul.f32 %v6074_v55, %v5450_v22  ;;  %v3250_v57 = vpop.f32.mrb[188].mxu1  ;;  %v6079_v2 = vpop.permute.xlu1 %6078  ;;  %v5454_v22 = vld [vmem:[%s10208_s8 + $0x380] sm:$0xff] }
 0x36d   : > { %v9344_v56 = vpop.eup %9343  ;;  %v3251_v19 = vadd.f32 %v3250_v57, %v873_v3  ;;  %v6585_v8 = vmul.f32 %v6079_v2, %v5451_v11  ;;  %v3252_v48 = vpop.f32.mrb[189].mxu1  ;;  %v877_v3 = vld [vmem:[%s9928_s6 + $0x4c0] sm:$0xff]  ;;  %v878_v2 = vld [vmem:[%s9928_s6 + $0x4c8] sm:$0xff] }
 0x36e   : > { %v9346_v36 = vpop.eup %9345  ;;  %9355 = vpow2.f32 %v7471_v39  ;;  %6774 = vst.msk [vmem:[%s10223_s12 + $0x360] sm:$0xff] %vm6665_vm3, %v6584_v5  ;;  %6238 = vperm.xlu1 %8393, %v9344_v56   ;;  %v3253_v13 = vpop.f32.mrb[190].mxu1 }
 0x36f   : > { %v4919_v26 = vadd.f32 1.0, %v9346_v36  ;;  %v4043_v37 = vadd.f32 %v11189_v9, %v3251_v19  ;;  %6775 = vst.msk [vmem:[%s10223_s12 + $0x368] sm:$0xff] %vm6665_vm3, %v6585_v8  ;;  %v3254_v10 = vadd.f32 %v3253_v13, %v874_v4  ;;  %v3255_v46 = vpop.f32.mrb[191].mxu1  ;;  %v5453_v9 = vld [vmem:[%s10208_s8 + $0x378] sm:$0xff]  ;;  %v11273_v63 = vpop.f32.mrb[64].mxu0 }
 0x370   : > { %v9348_v42 = vpop.eup %9347  ;;  %v7944_v40 = vpop.f32.mrb[65].mxu0 }
 0x371   : > { %9357 = vrcp.f32 %v4919_v26  ;;  %v4920_v50 = vadd.f32 1.0, %v9348_v42  ;;  %v7472_v53 = vmul.f32 -1.442695, %v4043_v37  ;;  %v4046_v33 = vadd.f32 %v11194_v14, %v3254_v10  ;;  %v11278_v41 = vpop.f32.mrb[66].mxu0 }
 0x372   : > { %v9350_v58 = vpop.eup %9349  ;;  %v7945_v60 = vpop.f32.mrb[67].mxu0 }
 0x373   : > { %9359 = vrcp.f32 %v4920_v50  ;;  %v6084_v24 = vpop.permute.xlu0 %6083  ;;  %v7473_v45 = vmul.f32 -1.442695, %v4046_v33  ;;  %6243 = vperm.xlu0 %8392, %v9350_v58  }
 0x374   : > { %9361 = vpow2.f32 %v7472_v53  ;;  %v6586_v27 = vmul.f32 %v6084_v24, %v5452_v6  ;;  %v3258_v54 = vpop.f32.mrb[192].mxu1  ;;  %v6089_v35 = vpop.permute.xlu1 %6088  ;;  %v5456_v6 = vld [vmem:[%s10208_s8 + $0x390] sm:$0xff] }
 0x375   : > { %v9352_v31 = vpop.eup %9351  ;;  %9363 = vpow2.f32 %v7473_v45  ;;  %v3259_v14 = vadd.f32 %v3258_v54, %v875_v62  ;;  %v6587_v30 = vmul.f32 %v6089_v35, %v5453_v9  ;;  %v3260_v23 = vpop.f32.mrb[193].mxu1  ;;  %v879_v62 = vld [vmem:[%s9928_s6 + $0x4d0] sm:$0xff]  ;;  %v880_v35 = vld [vmem:[%s9928_s6 + $0x4d8] sm:$0xff] }
 0x376   : > { %v9354_v16 = vpop.eup %9353  ;;  %6776 = vst.msk [vmem:[%s10223_s12 + $0x370] sm:$0xff] %vm6665_vm3, %v6586_v27  ;;  %6248 = vperm.xlu1 %8393, %v9352_v31   ;;  %v3261_v18 = vpop.f32.mrb[194].mxu1 }
 0x377   : > { %v4921_v15 = vadd.f32 1.0, %v9354_v16  ;;  %v4051_v12 = vadd.f32 %v11203_v0, %v3259_v14  ;;  %6777 = vst.msk [vmem:[%s10223_s12 + $0x378] sm:$0xff] %vm6665_vm3, %v6587_v30  ;;  %v3262_v47 = vadd.f32 %v3261_v18, %v876_v61  ;;  %v3263_v52 = vpop.f32.mrb[195].mxu1  ;;  %v5455_v0 = vld [vmem:[%s10208_s8 + $0x388] sm:$0xff]  ;;  %v11287_v8 = vpop.f32.mrb[68].mxu0 }
 0x378   : > { %v9356_v38 = vpop.eup %9355  ;;  %v7948_v13 = vpop.f32.mrb[69].mxu0 }
 0x379   : > { %9365 = vrcp.f32 %v4921_v15  ;;  %v4922_v51 = vadd.f32 1.0, %v9356_v38  ;;  %v7474_v49 = vmul.f32 -1.442695, %v4051_v12  ;;  %v4054_v25 = vadd.f32 %v11208_v21, %v3262_v47  ;;  %v11292_v46 = vpop.f32.mrb[70].mxu0 }
 0x37a   : > { %v6094_v55 = vpop.permute.xlu0 %6093  ;;  %v7949_v28 = vpop.f32.mrb[71].mxu0 }
 0x37b   : > { %v9358_v29 = vpop.eup %9357  ;;  %9367 = vrcp.f32 %v4922_v51  ;;  %v7475_v11 = vmul.f32 -1.442695, %v4054_v25  ;;  %v6588_v39 = vmul.f32 %v6094_v55, %v5454_v22  ;;  %v5458_v22 = vld [vmem:[%s10208_s8 + $0x3a0] sm:$0xff] }
 0x37c   : > { %9369 = vpow2.f32 %v7474_v49  ;;  %6253 = vperm.xlu0 %8392, %v9358_v29   ;;  %v3266_v56 = vpop.f32.mrb[196].mxu1  ;;  %v6099_v57 = vpop.permute.xlu1 %6098 }
 0x37d   : > { %v9360_v5 = vpop.eup %9359  ;;  %9371 = vpow2.f32 %v7475_v11  ;;  %6778 = vst.msk [vmem:[%s10223_s12 + $0x380] sm:$0xff] %vm6665_vm3, %v6588_v39  ;;  %v3267_v21 = vadd.f32 %v3266_v56, %v877_v3  ;;  %v6589_v36 = vmul.f32 %v6099_v57, %v5455_v0  ;;  %v3268_v19 = vpop.f32.mrb[197].mxu1  ;;  %v881_v3 = vld [vmem:[%s9928_s6 + $0x4e0] sm:$0xff]  ;;  %v882_v57 = vld [vmem:[%s9928_s6 + $0x4e8] sm:$0xff] }
 0x37e   : > { %v9362_v4 = vpop.eup %9361  ;;  %6258 = vperm.xlu1 %8393, %v9360_v5   ;;  %v3269_v26 = vpop.f32.mrb[198].mxu1 }
 0x37f   : > { %v4923_v48 = vadd.f32 1.0, %v9362_v4  ;;  %v9364_v59 = vpop.eup %9363  ;;  %v4059_v42 = vadd.f32 %v11217_v7, %v3267_v21  ;;  %6779 = vst.msk [vmem:[%s10223_s12 + $0x388] sm:$0xff] %vm6665_vm3, %v6589_v36  ;;  %v3270_v37 = vadd.f32 %v3269_v26, %v878_v2  ;;  %v3271_v10 = vpop.f32.mrb[199].mxu1  ;;  %v5457_v7 = vld [vmem:[%s10208_s8 + $0x398] sm:$0xff] }
 0x380   : > { %v4924_v50 = vadd.f32 1.0, %v9364_v59  ;;  %v11301_v30 = vpop.f32.mrb[72].mxu0 }
 0x381   : > { %9373 = vrcp.f32 %v4923_v48  ;;  %v7476_v53 = vmul.f32 -1.442695, %v4059_v42  ;;  %v4062_v33 = vadd.f32 %v11222_v20, %v3270_v37  ;;  %v7952_v18 = vpop.f32.mrb[73].mxu0 }
 0x382   : > { %9375 = vrcp.f32 %v4924_v50  ;;  %v6104_v24 = vpop.permute.xlu0 %6103  ;;  %v11306_v52 = vpop.f32.mrb[74].mxu0 }
 0x383   : > { %v9366_v58 = vpop.eup %9365  ;;  %9377 = vpow2.f32 %v7476_v53  ;;  %v7477_v9 = vmul.f32 -1.442695, %v4062_v33  ;;  %v6590_v45 = vmul.f32 %v6104_v24, %v5456_v6  ;;  %v7953_v60 = vpop.f32.mrb[75].mxu0  ;;  %v5460_v6 = vld [vmem:[%s10208_s8 + $0x3b0] sm:$0xff] }
 0x384   : > { %6263 = vperm.xlu0 %8392, %v9366_v58   ;;  %v3274_v31 = vpop.f32.mrb[200].mxu1  ;;  %v6109_v54 = vpop.permute.xlu1 %6108 }
 0x385   : > { %v9368_v27 = vpop.eup %9367  ;;  %9379 = vpow2.f32 %v7477_v9  ;;  %6780 = vst.msk [vmem:[%s10223_s12 + $0x390] sm:$0xff] %vm6665_vm3, %v6590_v45  ;;  %v3275_v20 = vadd.f32 %v3274_v31, %v879_v62  ;;  %v6591_v16 = vmul.f32 %v6109_v54, %v5457_v7  ;;  %v3276_v14 = vpop.f32.mrb[201].mxu1  ;;  %v883_v62 = vld [vmem:[%s9928_s6 + $0x4f0] sm:$0xff]  ;;  %v884_v54 = vld [vmem:[%s9928_s6 + $0x4f8] sm:$0xff] }
 0x386   : > { %v9370_v61 = vpop.eup %9369  ;;  %6268 = vperm.xlu1 %8393, %v9368_v27   ;;  %v3277_v15 = vpop.f32.mrb[202].mxu1 }
 0x387   : > { %v4925_v23 = vadd.f32 1.0, %v9370_v61  ;;  %v9372_v40 = vpop.eup %9371  ;;  %v4067_v38 = vadd.f32 %v11231_v43, %v3275_v20  ;;  %6781 = vst.msk [vmem:[%s10223_s12 + $0x398] sm:$0xff] %vm6665_vm3, %v6591_v16  ;;  %v3278_v12 = vadd.f32 %v3277_v15, %v880_v35  ;;  %v3279_v47 = vpop.f32.mrb[203].mxu1  ;;  %v5459_v43 = vld [vmem:[%s10208_s8 + $0x3a8] sm:$0xff] }
 0x388   : > { %v4926_v51 = vadd.f32 1.0, %v9372_v40  ;;  %v11315_v36 = vpop.f32.mrb[76].mxu0 }
 0x389   : > { %9381 = vrcp.f32 %v4925_v23  ;;  %v7478_v49 = vmul.f32 -1.442695, %v4067_v38  ;;  %v4070_v25 = vadd.f32 %v11236_v17, %v3278_v12  ;;  %v7956_v26 = vpop.f32.mrb[77].mxu0 }
 0x38a   : > { %9383 = vrcp.f32 %v4926_v51  ;;  %v6114_v55 = vpop.permute.xlu0 %6113  ;;  %v11320_v10 = vpop.f32.mrb[78].mxu0 }
 0x38b   : > { %v9374_v29 = vpop.eup %9373  ;;  %9385 = vpow2.f32 %v7478_v49  ;;  %v7479_v0 = vmul.f32 -1.442695, %v4070_v25  ;;  %v6592_v11 = vmul.f32 %v6114_v55, %v5458_v22  ;;  %v7957_v28 = vpop.f32.mrb[79].mxu0  ;;  %v5462_v22 = vld [vmem:[%s10208_s8 + $0x3c0] sm:$0xff] }
 0x38c   : > { %6273 = vperm.xlu0 %8392, %v9374_v29   ;;  %v9376_v39 = vpop.eup %9375  ;;  %v3282_v5 = vpop.f32.mrb[204].mxu1 }
 0x38d   : > { %v6119_v56 = vpop.permute.xlu1 %6118  ;;  %v9378_v2 = vpop.eup %9377  ;;  %9387 = vpow2.f32 %v7479_v0  ;;  %6782 = vst.msk [vmem:[%s10223_s12 + $0x3a0] sm:$0xff] %vm6665_vm3, %v6592_v11  ;;  %v3283_v17 = vadd.f32 %v3282_v5, %v881_v3  ;;  %6278 = vperm.xlu1 %8393, %v9376_v39   ;;  %v885_v3 = vld [vmem:[%s9928_s6 + $0x500] sm:$0xff] }
 0x38e   : > { %v6593_v4 = vmul.f32 %v6119_v56, %v5459_v43  ;;  %v3284_v21 = vpop.f32.mrb[205].mxu1  ;;  %v4927_v19 = vadd.f32 1.0, %v9378_v2  ;;  %v886_v56 = vld [vmem:[%s9928_s6 + $0x508] sm:$0xff] }
 0x38f   : > { %v3285_v48 = vpop.f32.mrb[206].mxu1  ;;  %v9380_v13 = vpop.eup %9379  ;;  %v4075_v59 = vadd.f32 %v11245_v1, %v3283_v17  ;;  %v5461_v1 = vld [vmem:[%s10208_s8 + $0x3b8] sm:$0xff] }
 0x390   : > { %6783 = vst.msk [vmem:[%s10223_s12 + $0x3a8] sm:$0xff] %vm6665_vm3, %v6593_v4  ;;  %v3286_v42 = vadd.f32 %v3285_v48, %v882_v57  ;;  %v3287_v37 = vpop.f32.mrb[207].mxu1  ;;  %9389 = vrcp.f32 %v4927_v19  ;;  %v4928_v50 = vadd.f32 1.0, %v9380_v13  ;;  %v11329_v16 = vpop.f32.mrb[80].mxu0 }
 0x391   : > { %v7480_v53 = vmul.f32 -1.442695, %v4075_v59  ;;  %v7960_v15 = vpop.f32.mrb[81].mxu0 }
 0x392   : > { %v4078_v33 = vadd.f32 %v11250_v44, %v3286_v42  ;;  %9391 = vrcp.f32 %v4928_v50  ;;  %v6124_v24 = vpop.permute.xlu0 %6123  ;;  %v11334_v47 = vpop.f32.mrb[82].mxu0 }
 0x393   : > { %v9382_v58 = vpop.eup %9381  ;;  %9393 = vpow2.f32 %v7480_v53  ;;  %v6594_v9 = vmul.f32 %v6124_v24, %v5460_v6  ;;  %v7961_v60 = vpop.f32.mrb[83].mxu0  ;;  %v5464_v6 = vld [vmem:[%s10208_s8 + $0x3d0] sm:$0xff] }
 0x394   : > { %v7481_v7 = vmul.f32 -1.442695, %v4078_v33  ;;  %6283 = vperm.xlu0 %8392, %v9382_v58   ;;  %v9384_v45 = vpop.eup %9383  ;;  %v3290_v27 = vpop.f32.mrb[208].mxu1 }
 0x395   : > { %v6129_v31 = vpop.permute.xlu1 %6128  ;;  %v9386_v35 = vpop.eup %9385  ;;  %6784 = vst.msk [vmem:[%s10223_s12 + $0x3b0] sm:$0xff] %vm6665_vm3, %v6594_v9  ;;  %v3291_v44 = vadd.f32 %v3290_v27, %v883_v62  ;;  %6288 = vperm.xlu1 %8393, %v9384_v45   ;;  %v887_v62 = vld [vmem:[%s9928_s6 + $0x510] sm:$0xff] }
 0x396   : > { %9395 = vpow2.f32 %v7481_v7  ;;  %v6595_v61 = vmul.f32 %v6129_v31, %v5461_v1  ;;  %v3292_v20 = vpop.f32.mrb[209].mxu1  ;;  %v4929_v14 = vadd.f32 1.0, %v9386_v35  ;;  %v888_v31 = vld [vmem:[%s9928_s6 + $0x518] sm:$0xff] }
 0x397   : > { %v3293_v23 = vpop.f32.mrb[210].mxu1  ;;  %v9388_v18 = vpop.eup %9387  ;;  %v4083_v40 = vadd.f32 %v11259_v32, %v3291_v44  ;;  %v5463_v32 = vld [vmem:[%s10208_s8 + $0x3c8] sm:$0xff] }
 0x398   : > { %6785 = vst.msk [vmem:[%s10223_s12 + $0x3b8] sm:$0xff] %vm6665_vm3, %v6595_v61  ;;  %v3294_v38 = vadd.f32 %v3293_v23, %v884_v54  ;;  %v3295_v12 = vpop.f32.mrb[211].mxu1  ;;  %9397 = vrcp.f32 %v4929_v14  ;;  %v4930_v51 = vadd.f32 1.0, %v9388_v18  ;;  %v11343_v4 = vpop.f32.mrb[84].mxu0 }
 0x399   : > { %v7482_v49 = vmul.f32 -1.442695, %v4083_v40  ;;  %v7964_v48 = vpop.f32.mrb[85].mxu0 }
 0x39a   : > { %v4086_v25 = vadd.f32 %v11264_v34, %v3294_v38  ;;  %v9390_v29 = vpop.eup %9389  ;;  %9399 = vrcp.f32 %v4930_v51  ;;  %v11348_v37 = vpop.f32.mrb[86].mxu0 }
 0x39b   : > { %v6134_v55 = vpop.permute.xlu0 %6133  ;;  %9401 = vpow2.f32 %v7482_v49  ;;  %6293 = vperm.xlu0 %8392, %v9390_v29   ;;  %v7965_v28 = vpop.f32.mrb[87].mxu0 }
 0x39c   : > { %v7483_v43 = vmul.f32 -1.442695, %v4086_v25  ;;  %v6596_v0 = vmul.f32 %v6134_v55, %v5462_v22  ;;  %v9392_v11 = vpop.eup %9391  ;;  %v3298_v39 = vpop.f32.mrb[212].mxu1  ;;  %v5466_v22 = vld [vmem:[%s10208_s8 + $0x3e0] sm:$0xff] }
 0x39d   : > { %v6139_v5 = vpop.permute.xlu1 %6138  ;;  %v9394_v57 = vpop.eup %9393  ;;  %v3299_v34 = vadd.f32 %v3298_v39, %v885_v3  ;;  %6298 = vperm.xlu1 %8393, %v9392_v11   ;;  %v889_v3 = vld [vmem:[%s9928_s6 + $0x520] sm:$0xff] }
 0x39e   : > { %9403 = vpow2.f32 %v7483_v43  ;;  %6786 = vst.msk [vmem:[%s10223_s12 + $0x3c0] sm:$0xff] %vm6665_vm3, %v6596_v0  ;;  %v6597_v2 = vmul.f32 %v6139_v5, %v5463_v32  ;;  %v3300_v17 = vpop.f32.mrb[213].mxu1  ;;  %v4931_v21 = vadd.f32 1.0, %v9394_v57  ;;  %v890_v5 = vld [vmem:[%s9928_s6 + $0x528] sm:$0xff] }
 0x39f   : > { %v3301_v19 = vpop.f32.mrb[214].mxu1  ;;  %v4091_v13 = vadd.f32 %v11273_v63, %v3299_v34  ;;  %v5465_v63 = vld [vmem:[%s10208_s8 + $0x3d8] sm:$0xff]  ;;  %v11357_v61 = vpop.f32.mrb[88].mxu0 }
 0x3a0   : > { %v9396_v26 = vpop.eup %9395  ;;  %6787 = vst.msk [vmem:[%s10223_s12 + $0x3c8] sm:$0xff] %vm6665_vm3, %v6597_v2  ;;  %v3302_v59 = vadd.f32 %v3301_v19, %v886_v56  ;;  %v3303_v42 = vpop.f32.mrb[215].mxu1  ;;  %9405 = vrcp.f32 %v4931_v21 }
 0x3a1   : > { %v4932_v50 = vadd.f32 1.0, %v9396_v26  ;;  %v7484_v53 = vmul.f32 -1.442695, %v4091_v13  ;;  %v7968_v23 = vpop.f32.mrb[89].mxu0 }
 0x3a2   : > { %v4094_v33 = vadd.f32 %v11278_v41, %v3302_v59  ;;  %v9398_v58 = vpop.eup %9397  ;;  %v11362_v12 = vpop.f32.mrb[90].mxu0 }
 0x3a3   : > { %9407 = vrcp.f32 %v4932_v50  ;;  %v6144_v24 = vpop.permute.xlu0 %6143  ;;  %6303 = vperm.xlu0 %8392, %v9398_v58   ;;  %v7969_v60 = vpop.f32.mrb[91].mxu0 }
 0x3a4   : > { %9409 = vpow2.f32 %v7484_v53  ;;  %v7485_v1 = vmul.f32 -1.442695, %v4094_v33  ;;  %v6598_v7 = vmul.f32 %v6144_v24, %v5464_v6  ;;  %v9400_v9 = vpop.eup %9399  ;;  %v3306_v45 = vpop.f32.mrb[216].mxu1  ;;  %v5468_v6 = vld [vmem:[%s10208_s8 + $0x3f0] sm:$0xff] }
 0x3a5   : > { %v6149_v27 = vpop.permute.xlu1 %6148  ;;  %v9402_v54 = vpop.eup %9401  ;;  %v3307_v41 = vadd.f32 %v3306_v45, %v887_v62  ;;  %6308 = vperm.xlu1 %8393, %v9400_v9   ;;  %v891_v62 = vld [vmem:[%s9928_s6 + $0x530] sm:$0xff] }
 0x3a6   : > { %9411 = vpow2.f32 %v7485_v1  ;;  %6788 = vst.msk [vmem:[%s10223_s12 + $0x3d0] sm:$0xff] %vm6665_vm3, %v6598_v7  ;;  %v6599_v35 = vmul.f32 %v6149_v27, %v5465_v63  ;;  %v3308_v44 = vpop.f32.mrb[217].mxu1  ;;  %v4933_v20 = vadd.f32 1.0, %v9402_v54  ;;  %v892_v27 = vld [vmem:[%s9928_s6 + $0x538] sm:$0xff] }
 0x3a7   : > { %v3309_v14 = vpop.f32.mrb[218].mxu1  ;;  %v4099_v18 = vadd.f32 %v11287_v8, %v3307_v41  ;;  %v5467_v8 = vld [vmem:[%s10208_s8 + $0x3e8] sm:$0xff]  ;;  %v11371_v2 = vpop.f32.mrb[92].mxu0 }
 0x3a8   : > { %v9404_v15 = vpop.eup %9403  ;;  %6789 = vst.msk [vmem:[%s10223_s12 + $0x3d8] sm:$0xff] %vm6665_vm3, %v6599_v35  ;;  %v3310_v40 = vadd.f32 %v3309_v14, %v888_v31  ;;  %v3311_v38 = vpop.f32.mrb[219].mxu1  ;;  %9413 = vrcp.f32 %v4933_v20 }
 0x3a9   : > { %v4934_v51 = vadd.f32 1.0, %v9404_v15  ;;  %v7486_v49 = vmul.f32 -1.442695, %v4099_v18  ;;  %v7972_v19 = vpop.f32.mrb[93].mxu0 }
 0x3aa   : > { %v4102_v25 = vadd.f32 %v11292_v46, %v3310_v40  ;;  %v9406_v29 = vpop.eup %9405  ;;  %v11376_v42 = vpop.f32.mrb[94].mxu0 }
 0x3ab   : > { %9415 = vrcp.f32 %v4934_v51  ;;  %v6154_v55 = vpop.permute.xlu0 %6153  ;;  %6313 = vperm.xlu0 %8392, %v9406_v29   ;;  %v7973_v28 = vpop.f32.mrb[95].mxu0 }
 0x3ac   : > { %9417 = vpow2.f32 %v7486_v49  ;;  %v7487_v32 = vmul.f32 -1.442695, %v4102_v25  ;;  %v6600_v43 = vmul.f32 %v6154_v55, %v5466_v22  ;;  %v3314_v11 = vpop.f32.mrb[220].mxu1  ;;  %v5470_v22 = vld [vmem:[%s10208_s8 + $0x400] sm:$0xff] }
 0x3ad   : > { %v9408_v0 = vpop.eup %9407  ;;  %v6159_v39 = vpop.permute.xlu1 %6158  ;;  %v3315_v46 = vadd.f32 %v3314_v11, %v889_v3  ;;  %v893_v3 = vld [vmem:[%s9928_s6 + $0x540] sm:$0xff] }
 0x3ae   : > { %v9410_v56 = vpop.eup %9409  ;;  %9419 = vpow2.f32 %v7487_v32  ;;  %6790 = vst.msk [vmem:[%s10223_s12 + $0x3e0] sm:$0xff] %vm6665_vm3, %v6600_v43  ;;  %v6601_v57 = vmul.f32 %v6159_v39, %v5467_v8  ;;  %v3316_v34 = vpop.f32.mrb[221].mxu1  ;;  %6318 = vperm.xlu1 %8393, %v9408_v0   ;;  %v894_v39 = vld [vmem:[%s9928_s6 + $0x548] sm:$0xff] }
 0x3af   : > { %v4935_v17 = vadd.f32 1.0, %v9410_v56  ;;  %v3317_v21 = vpop.f32.mrb[222].mxu1  ;;  %v4107_v26 = vadd.f32 %v11301_v30, %v3315_v46  ;;  %v5469_v30 = vld [vmem:[%s10208_s8 + $0x3f8] sm:$0xff]  ;;  %v11385_v35 = vpop.f32.mrb[96].mxu0 }
 0x3b0   : > { %v9412_v48 = vpop.eup %9411  ;;  %6791 = vst.msk [vmem:[%s10223_s12 + $0x3e8] sm:$0xff] %vm6665_vm3, %v6601_v57  ;;  %v3318_v13 = vadd.f32 %v3317_v21, %v890_v5  ;;  %v3319_v59 = vpop.f32.mrb[223].mxu1 }
 0x3b1   : > { %9421 = vrcp.f32 %v4935_v17  ;;  %v4936_v50 = vadd.f32 1.0, %v9412_v48  ;;  %v7488_v53 = vmul.f32 -1.442695, %v4107_v26  ;;  %v7976_v14 = vpop.f32.mrb[97].mxu0 }
 0x3b2   : > { %v4110_v33 = vadd.f32 %v11306_v52, %v3318_v13  ;;  %v9414_v58 = vpop.eup %9413  ;;  %v11390_v38 = vpop.f32.mrb[98].mxu0 }
 0x3b3   : > { %9423 = vrcp.f32 %v4936_v50  ;;  %v6164_v24 = vpop.permute.xlu0 %6163  ;;  %6323 = vperm.xlu0 %8392, %v9414_v58   ;;  %v7977_v60 = vpop.f32.mrb[99].mxu0 }
 0x3b4   : > { %9425 = vpow2.f32 %v7488_v53  ;;  %v7489_v63 = vmul.f32 -1.442695, %v4110_v33  ;;  %v6602_v1 = vmul.f32 %v6164_v24, %v5468_v6  ;;  %v3322_v9 = vpop.f32.mrb[224].mxu1  ;;  %v5472_v6 = vld [vmem:[%s10208_s8 + $0x410] sm:$0xff] }
 0x3b5   : > { %v9416_v7 = vpop.eup %9415  ;;  %v6169_v45 = vpop.permute.xlu1 %6168  ;;  %v3323_v52 = vadd.f32 %v3322_v9, %v891_v62  ;;  %v895_v62 = vld [vmem:[%s9928_s6 + $0x550] sm:$0xff] }
 0x3b6   : > { %v9418_v31 = vpop.eup %9417  ;;  %9427 = vpow2.f32 %v7489_v63  ;;  %6792 = vst.msk [vmem:[%s10223_s12 + $0x3f0] sm:$0xff] %vm6665_vm3, %v6602_v1  ;;  %v6603_v54 = vmul.f32 %v6169_v45, %v5469_v30  ;;  %v3324_v41 = vpop.f32.mrb[225].mxu1  ;;  %6328 = vperm.xlu1 %8393, %v9416_v7   ;;  %v896_v45 = vld [vmem:[%s9928_s6 + $0x558] sm:$0xff] }
 0x3b7   : > { %v4937_v44 = vadd.f32 1.0, %v9418_v31  ;;  %v3325_v20 = vpop.f32.mrb[226].mxu1  ;;  %v4115_v15 = vadd.f32 %v11315_v36, %v3323_v52  ;;  %v5471_v36 = vld [vmem:[%s10208_s8 + $0x408] sm:$0xff]  ;;  %v11399_v57 = vpop.f32.mrb[100].mxu0 }
 0x3b8   : > { %v9420_v23 = vpop.eup %9419  ;;  %6793 = vst.msk [vmem:[%s10223_s12 + $0x3f8] sm:$0xff] %vm6665_vm3, %v6603_v54  ;;  %v3326_v18 = vadd.f32 %v3325_v20, %v892_v27  ;;  %v3327_v40 = vpop.f32.mrb[227].mxu1 }
 0x3b9   : > { %9429 = vrcp.f32 %v4937_v44  ;;  %v4938_v51 = vadd.f32 1.0, %v9420_v23  ;;  %v7490_v49 = vmul.f32 -1.442695, %v4115_v15  ;;  %v7980_v21 = vpop.f32.mrb[101].mxu0 }
 0x3ba   : > { %v4118_v25 = vadd.f32 %v11320_v10, %v3326_v18  ;;  %v11404_v59 = vpop.f32.mrb[102].mxu0 }
 0x3bb   : > { %v9422_v29 = vpop.eup %9421  ;;  %9431 = vrcp.f32 %v4938_v51  ;;  %v6174_v55 = vpop.permute.xlu0 %6173 }
 0x3bc   : > { %9433 = vpow2.f32 %v7490_v49  ;;  %v7491_v8 = vmul.f32 -1.442695, %v4118_v25  ;;  %v6604_v32 = vmul.f32 %v6174_v55, %v5470_v22  ;;  %6333 = vperm.xlu0 %8392, %v9422_v29   ;;  %v3330_v0 = vpop.f32.mrb[228].mxu1  ;;  %v7981_v28 = vpop.f32.mrb[103].mxu0  ;;  %v5474_v22 = vld [vmem:[%s10208_s8 + $0x420] sm:$0xff] }
 0x3bd   : > { %v9424_v43 = vpop.eup %9423  ;;  %v6179_v11 = vpop.permute.xlu1 %6178  ;;  %v3331_v10 = vadd.f32 %v3330_v0, %v893_v3  ;;  %v897_v3 = vld [vmem:[%s9928_s6 + $0x560] sm:$0xff] }
 0x3be   : > { %v9426_v5 = vpop.eup %9425  ;;  %9435 = vpow2.f32 %v7491_v8  ;;  %6794 = vst.msk [vmem:[%s10223_s12 + $0x400] sm:$0xff] %vm6665_vm3, %v6604_v32  ;;  %v6605_v56 = vmul.f32 %v6179_v11, %v5471_v36  ;;  %v3332_v46 = vpop.f32.mrb[229].mxu1  ;;  %6338 = vperm.xlu1 %8393, %v9424_v43   ;;  %v898_v11 = vld [vmem:[%s9928_s6 + $0x568] sm:$0xff] }
 0x3bf   : > { %v4939_v34 = vadd.f32 1.0, %v9426_v5  ;;  %v3333_v17 = vpop.f32.mrb[230].mxu1  ;;  %v4123_v48 = vadd.f32 %v11329_v16, %v3331_v10  ;;  %v5473_v16 = vld [vmem:[%s10208_s8 + $0x418] sm:$0xff]  ;;  %v11413_v54 = vpop.f32.mrb[104].mxu0 }
 0x3c0   : > { %v9428_v19 = vpop.eup %9427  ;;  %6795 = vst.msk [vmem:[%s10223_s12 + $0x408] sm:$0xff] %vm6665_vm3, %v6605_v56  ;;  %v3334_v26 = vadd.f32 %v3333_v17, %v894_v39  ;;  %v3335_v13 = vpop.f32.mrb[231].mxu1 }
 0x3c1   : > { %9437 = vrcp.f32 %v4939_v34  ;;  %v4940_v50 = vadd.f32 1.0, %v9428_v19  ;;  %v7492_v53 = vmul.f32 -1.442695, %v4123_v48  ;;  %v7984_v20 = vpop.f32.mrb[105].mxu0 }
 0x3c2   : > { %v4126_v33 = vadd.f32 %v11334_v47, %v3334_v26  ;;  %v11418_v40 = vpop.f32.mrb[106].mxu0 }
 0x3c3   : > { %v9430_v58 = vpop.eup %9429  ;;  %9439 = vrcp.f32 %v4940_v50  ;;  %v6184_v24 = vpop.permute.xlu0 %6183 }
 0x3c4   : > { %9441 = vpow2.f32 %v7492_v53  ;;  %v7493_v30 = vmul.f32 -1.442695, %v4126_v33  ;;  %v6606_v63 = vmul.f32 %v6184_v24, %v5472_v6  ;;  %6343 = vperm.xlu0 %8392, %v9430_v58   ;;  %v3338_v7 = vpop.f32.mrb[232].mxu1  ;;  %v7985_v60 = vpop.f32.mrb[107].mxu0  ;;  %v5476_v6 = vld [vmem:[%s10208_s8 + $0x430] sm:$0xff] }
 0x3c5   : > { %v9432_v1 = vpop.eup %9431  ;;  %v6189_v9 = vpop.permute.xlu1 %6188  ;;  %v3339_v47 = vadd.f32 %v3338_v7, %v895_v62  ;;  %v899_v62 = vld [vmem:[%s9928_s6 + $0x570] sm:$0xff] }
 0x3c6   : > { %v9434_v27 = vpop.eup %9433  ;;  %9443 = vpow2.f32 %v7493_v30  ;;  %6796 = vst.msk [vmem:[%s10223_s12 + $0x410] sm:$0xff] %vm6665_vm3, %v6606_v63  ;;  %v6607_v31 = vmul.f32 %v6189_v9, %v5473_v16  ;;  %v3340_v52 = vpop.f32.mrb[233].mxu1  ;;  %6348 = vperm.xlu1 %8393, %v9432_v1   ;;  %v900_v9 = vld [vmem:[%s9928_s6 + $0x578] sm:$0xff] }
 0x3c7   : > { %v4941_v41 = vadd.f32 1.0, %v9434_v27  ;;  %v3341_v44 = vpop.f32.mrb[234].mxu1  ;;  %v4131_v23 = vadd.f32 %v11343_v4, %v3339_v47  ;;  %v5475_v4 = vld [vmem:[%s10208_s8 + $0x428] sm:$0xff]  ;;  %v11427_v56 = vpop.f32.mrb[108].mxu0 }
 0x3c8   : > { %v9436_v14 = vpop.eup %9435  ;;  %6797 = vst.msk [vmem:[%s10223_s12 + $0x418] sm:$0xff] %vm6665_vm3, %v6607_v31  ;;  %v3342_v15 = vadd.f32 %v3341_v44, %v896_v45  ;;  %v3343_v18 = vpop.f32.mrb[235].mxu1 }
 0x3c9   : > { %9445 = vrcp.f32 %v4941_v41  ;;  %v4942_v51 = vadd.f32 1.0, %v9436_v14  ;;  %v7494_v49 = vmul.f32 -1.442695, %v4131_v23  ;;  %v7988_v17 = vpop.f32.mrb[109].mxu0 }
 0x3ca   : > { %v4134_v25 = vadd.f32 %v11348_v37, %v3342_v15  ;;  %v11432_v13 = vpop.f32.mrb[110].mxu0 }
 0x3cb   : > { %v9438_v29 = vpop.eup %9437  ;;  %9447 = vrcp.f32 %v4942_v51  ;;  %v6194_v55 = vpop.permute.xlu0 %6193 }
 0x3cc   : > { %9449 = vpow2.f32 %v7494_v49  ;;  %v7495_v36 = vmul.f32 -1.442695, %v4134_v25  ;;  %v6608_v8 = vmul.f32 %v6194_v55, %v5474_v22  ;;  %6353 = vperm.xlu0 %8392, %v9438_v29   ;;  %v3346_v43 = vpop.f32.mrb[236].mxu1  ;;  %v6199_v0 = vpop.permute.xlu1 %6198  ;;  %v5478_v22 = vld [vmem:[%s10208_s8 + $0x440] sm:$0xff] }
 0x3cd   : > { %v9440_v32 = vpop.eup %9439  ;;  %v3347_v37 = vadd.f32 %v3346_v43, %v897_v3  ;;  %v6609_v5 = vmul.f32 %v6199_v0, %v5475_v4  ;;  %v3348_v10 = vpop.f32.mrb[237].mxu1  ;;  %v901_v3 = vld [vmem:[%s9928_s6 + $0x580] sm:$0xff]  ;;  %v902_v0 = vld [vmem:[%s9928_s6 + $0x588] sm:$0xff] }
 0x3ce   : > { %v9442_v39 = vpop.eup %9441  ;;  %9451 = vpow2.f32 %v7495_v36  ;;  %6798 = vst.msk [vmem:[%s10223_s12 + $0x420] sm:$0xff] %vm6665_vm3, %v6608_v8  ;;  %6358 = vperm.xlu1 %8393, %v9440_v32   ;;  %v3349_v34 = vpop.f32.mrb[238].mxu1 }
 0x3cf   : > { %v4943_v46 = vadd.f32 1.0, %v9442_v39  ;;  %v4139_v19 = vadd.f32 %v11357_v61, %v3347_v37  ;;  %6799 = vst.msk [vmem:[%s10223_s12 + $0x428] sm:$0xff] %vm6665_vm3, %v6609_v5  ;;  %v3350_v48 = vadd.f32 %v3349_v34, %v898_v11  ;;  %v3351_v26 = vpop.f32.mrb[239].mxu1  ;;  %v7989_v28 = vpop.f32.mrb[111].mxu0  ;;  %v5477_v61 = vld [vmem:[%s10208_s8 + $0x438] sm:$0xff] }
 0x3d0   : > { %v9444_v21 = vpop.eup %9443  ;;  %v11441_v31 = vpop.f32.mrb[112].mxu0 }
 0x3d1   : > { %9453 = vrcp.f32 %v4943_v46  ;;  %v4944_v50 = vadd.f32 1.0, %v9444_v21  ;;  %v7496_v53 = vmul.f32 -1.442695, %v4139_v19  ;;  %v4142_v33 = vadd.f32 %v11362_v12, %v3350_v48  ;;  %v7992_v44 = vpop.f32.mrb[113].mxu0 }
 0x3d2   : > { %v11446_v18 = vpop.f32.mrb[114].mxu0 }
 0x3d3   : > { %v9446_v58 = vpop.eup %9445  ;;  %9455 = vrcp.f32 %v4944_v50  ;;  %v6204_v24 = vpop.permute.xlu0 %6203  ;;  %v7497_v16 = vmul.f32 -1.442695, %v4142_v33 }
 0x3d4   : > { %9457 = vpow2.f32 %v7496_v53  ;;  %v6610_v30 = vmul.f32 %v6204_v24, %v5476_v6  ;;  %6363 = vperm.xlu0 %8392, %v9446_v58   ;;  %v3354_v1 = vpop.f32.mrb[240].mxu1  ;;  %v6209_v7 = vpop.permute.xlu1 %6208  ;;  %v5480_v6 = vld [vmem:[%s10208_s8 + $0x450] sm:$0xff] }
 0x3d5   : > { %v9448_v63 = vpop.eup %9447  ;;  %9459 = vpow2.f32 %v7497_v16  ;;  %v3355_v12 = vadd.f32 %v3354_v1, %v899_v62  ;;  %v6611_v27 = vmul.f32 %v6209_v7, %v5477_v61  ;;  %v3356_v47 = vpop.f32.mrb[241].mxu1  ;;  %v903_v62 = vld [vmem:[%s9928_s6 + $0x590] sm:$0xff]  ;;  %v904_v7 = vld [vmem:[%s9928_s6 + $0x598] sm:$0xff] }
 0x3d6   : > { %v9450_v45 = vpop.eup %9449  ;;  %6800 = vst.msk [vmem:[%s10223_s12 + $0x430] sm:$0xff] %vm6665_vm3, %v6610_v30  ;;  %6368 = vperm.xlu1 %8393, %v9448_v63   ;;  %v3357_v41 = vpop.f32.mrb[242].mxu1 }
 0x3d7   : > { %v4945_v52 = vadd.f32 1.0, %v9450_v45  ;;  %v4147_v14 = vadd.f32 %v11371_v2, %v3355_v12  ;;  %6801 = vst.msk [vmem:[%s10223_s12 + $0x438] sm:$0xff] %vm6665_vm3, %v6611_v27  ;;  %v3358_v23 = vadd.f32 %v3357_v41, %v900_v9  ;;  %v3359_v15 = vpop.f32.mrb[243].mxu1  ;;  %v7993_v60 = vpop.f32.mrb[115].mxu0  ;;  %v5479_v2 = vld [vmem:[%s10208_s8 + $0x448] sm:$0xff] }
 0x3d8   : > { %v9452_v20 = vpop.eup %9451  ;;  %v11455_v5 = vpop.f32.mrb[116].mxu0 }
 0x3d9   : > { %9461 = vrcp.f32 %v4945_v52  ;;  %v4946_v51 = vadd.f32 1.0, %v9452_v20  ;;  %v7498_v49 = vmul.f32 -1.442695, %v4147_v14  ;;  %v4150_v25 = vadd.f32 %v11376_v42, %v3358_v23  ;;  %v7996_v34 = vpop.f32.mrb[117].mxu0 }
 0x3da   : > { %v6214_v55 = vpop.permute.xlu0 %6213  ;;  %v11460_v26 = vpop.f32.mrb[118].mxu0 }
 0x3db   : > { %v9454_v29 = vpop.eup %9453  ;;  %9463 = vrcp.f32 %v4946_v51  ;;  %v7499_v4 = vmul.f32 -1.442695, %v4150_v25  ;;  %v6612_v36 = vmul.f32 %v6214_v55, %v5478_v22  ;;  %v7997_v28 = vpop.f32.mrb[119].mxu0  ;;  %v5482_v22 = vld [vmem:[%s10208_s8 + $0x460] sm:$0xff] }
 0x3dc   : > { %9465 = vpow2.f32 %v7498_v49  ;;  %6373 = vperm.xlu0 %8392, %v9454_v29   ;;  %v3362_v32 = vpop.f32.mrb[244].mxu1  ;;  %v6219_v43 = vpop.permute.xlu1 %6218 }
 0x3dd   : > { %v9456_v8 = vpop.eup %9455  ;;  %9467 = vpow2.f32 %v7499_v4  ;;  %6802 = vst.msk [vmem:[%s10223_s12 + $0x440] sm:$0xff] %vm6665_vm3, %v6612_v36  ;;  %v3363_v42 = vadd.f32 %v3362_v32, %v901_v3  ;;  %v6613_v39 = vmul.f32 %v6219_v43, %v5479_v2  ;;  %v3364_v37 = vpop.f32.mrb[245].mxu1  ;;  %v905_v3 = vld [vmem:[%s9928_s6 + $0x5a0] sm:$0xff]  ;;  %v5483_v2 = vld [vmem:[%s10208_s8 + $0x468] sm:$0xff] }
 0x3de   : > { %v9458_v11 = vpop.eup %9457  ;;  %6378 = vperm.xlu1 %8393, %v9456_v8   ;;  %v3365_v46 = vpop.f32.mrb[246].mxu1  ;;  %v906_v43 = vld [vmem:[%s9928_s6 + $0x5a8] sm:$0xff] }
 0x3df   : > { %v4947_v10 = vadd.f32 1.0, %v9458_v11  ;;  %v9460_v17 = vpop.eup %9459  ;;  %v4155_v21 = vadd.f32 %v11385_v35, %v3363_v42  ;;  %6803 = vst.msk [vmem:[%s10223_s12 + $0x448] sm:$0xff] %vm6665_vm3, %v6613_v39  ;;  %v3366_v19 = vadd.f32 %v3365_v46, %v902_v0  ;;  %v3367_v48 = vpop.f32.mrb[247].mxu1  ;;  %v5481_v35 = vld [vmem:[%s10208_s8 + $0x458] sm:$0xff] }
 0x3e0   : > { %v4948_v50 = vadd.f32 1.0, %v9460_v17  ;;  %v11469_v27 = vpop.f32.mrb[120].mxu0 }
 0x3e1   : > { %9469 = vrcp.f32 %v4947_v10  ;;  %v7500_v53 = vmul.f32 -1.442695, %v4155_v21  ;;  %v4158_v33 = vadd.f32 %v11390_v38, %v3366_v19  ;;  %v8000_v41 = vpop.f32.mrb[121].mxu0  ;;  %v5484_v19 = vld [vmem:[%s10208_s8 + $0x470] sm:$0xff] }
 0x3e2   : > { %9471 = vrcp.f32 %v4948_v50  ;;  %v6224_v24 = vpop.permute.xlu0 %6223  ;;  %v4205_v15 = vpop.f32.mrb[122].mxu0 }
 0x3e3   : > { %v9462_v58 = vpop.eup %9461  ;;  %9473 = vpow2.f32 %v7500_v53  ;;  %v7501_v61 = vmul.f32 -1.442695, %v4158_v33  ;;  %v6614_v16 = vmul.f32 %v6224_v24, %v5480_v6  ;;  %v8001_v60 = vpop.f32.mrb[123].mxu0  ;;  %v907_v53 = vld [vmem:[%s9928_s6 + $0x5b0] sm:$0xff]  ;;  %v5485_v33 = vld [vmem:[%s10208_s8 + $0x478] sm:$0xff]  ;;  %v5487_v15 = vld [vmem:[%s10208_s8 + $0x488] sm:$0xff] }
 0x3e4   : > { %6383 = vperm.xlu0 %8392, %v9462_v58   ;;  %v3370_v63 = vpop.f32.mrb[248].mxu1  ;;  %v6229_v1 = vpop.permute.xlu1 %6228 }
 0x3e5   : > { %v9464_v30 = vpop.eup %9463  ;;  %9475 = vpow2.f32 %v7501_v61  ;;  %6804 = vst.msk [vmem:[%s10223_s12 + $0x450] sm:$0xff] %vm6665_vm3, %v6614_v16  ;;  %v3371_v38 = vadd.f32 %v3370_v63, %v903_v62  ;;  %v6615_v45 = vmul.f32 %v6229_v1, %v5481_v35  ;;  %v3372_v12 = vpop.f32.mrb[249].mxu1  ;;  %v908_v61 = vld [vmem:[%s9928_s6 + $0x5b8] sm:$0xff] }
 0x3e6   : > { %v9466_v9 = vpop.eup %9465  ;;  %6388 = vperm.xlu1 %8393, %v9464_v30   ;;  %v3373_v52 = vpop.f32.mrb[250].mxu1 }
 0x3e7   : > { %v4949_v47 = vadd.f32 1.0, %v9466_v9  ;;  %v9468_v44 = vpop.eup %9467  ;;  %v4163_v20 = vadd.f32 %v11399_v57, %v3371_v38  ;;  %6805 = vst.msk [vmem:[%s10223_s12 + $0x458] sm:$0xff] %vm6665_vm3, %v6615_v45  ;;  %v3374_v14 = vadd.f32 %v3373_v52, %v904_v7  ;;  %v3375_v23 = vpop.f32.mrb[251].mxu1  ;;  %v5486_v52 = vld [vmem:[%s10208_s8 + $0x480] sm:$0xff] }
 0x3e8   : > { %v4950_v51 = vadd.f32 1.0, %v9468_v44  ;;  %v909_v23 = vld [vmem:[%s9928_s6 + $0x5c0] sm:$0xff] }
 0x3e9   : > { %9477 = vrcp.f32 %v4949_v47  ;;  %v7502_v49 = vmul.f32 -1.442695, %v4163_v20  ;;  %v4166_v25 = vadd.f32 %v11404_v59, %v3374_v14 }
 0x3ea   : > { %9479 = vrcp.f32 %v4950_v51  ;;  %v6234_v55 = vpop.permute.xlu0 %6233 }
 0x3eb   : > { %v9470_v29 = vpop.eup %9469  ;;  %9481 = vpow2.f32 %v7502_v49  ;;  %v7503_v57 = vmul.f32 -1.442695, %v4166_v25  ;;  %v6616_v4 = vmul.f32 %v6234_v55, %v5482_v22  ;;  %v910_v25 = vld [vmem:[%s9928_s6 + $0x5c8] sm:$0xff] }
 0x3ec   : > { %6393 = vperm.xlu0 %8392, %v9470_v29   ;;  %v9472_v36 = vpop.eup %9471  ;;  %v3378_v8 = vpop.f32.mrb[252].mxu1 }
 0x3ed   : > { %v6239_v32 = vpop.permute.xlu1 %6238  ;;  %v9474_v0 = vpop.eup %9473  ;;  %9483 = vpow2.f32 %v7503_v57  ;;  %6806 = vst.msk [vmem:[%s10223_s12 + $0x460] sm:$0xff] %vm6665_vm3, %v6616_v4  ;;  %v3379_v59 = vadd.f32 %v3378_v8, %v905_v3  ;;  %6398 = vperm.xlu1 %8393, %v9472_v36  }
 0x3ee   : > { %v6617_v11 = vmul.f32 %v6239_v32, %v5483_v2  ;;  %v3380_v42 = vpop.f32.mrb[253].mxu1  ;;  %v4951_v39 = vadd.f32 1.0, %v9474_v0  ;;  %v5488_v0 = vld [vmem:[%s10208_s8 + $0x490] sm:$0xff] }
 0x3ef   : > { %v3381_v37 = vpop.f32.mrb[254].mxu1  ;;  %v9476_v10 = vpop.eup %9475  ;;  %v4171_v46 = vadd.f32 %v11413_v54, %v3379_v59 }
 0x3f0   : > { %6807 = vst.msk [vmem:[%s10223_s12 + $0x468] sm:$0xff] %vm6665_vm3, %v6617_v11  ;;  %v3382_v34 = vadd.f32 %v3381_v37, %v906_v43  ;;  %v3383_v17 = vpop.f32.mrb[255].mxu1  ;;  %9485 = vrcp.f32 %v4951_v39  ;;  %v4952_v21 = vadd.f32 1.0, %v9476_v10  ;;  %v911_v37 = vld [vmem:[%s9928_s6 + $0x5d0] sm:$0xff]  ;;  %v5489_v10 = vld [vmem:[%s10208_s8 + $0x498] sm:$0xff] }
 0x3f1   : > { %v7504_v48 = vmul.f32 -1.442695, %v4171_v46 }
 0x3f2   : > { %v4174_v50 = vadd.f32 %v11418_v40, %v3382_v34  ;;  %9487 = vrcp.f32 %v4952_v21  ;;  %v6244_v28 = vpop.permute.xlu0 %6243 }
 0x3f3   : > { %v9478_v6 = vpop.eup %9477  ;;  %9489 = vpow2.f32 %v7504_v48  ;;  %v6618_v54 = vmul.f32 %v6244_v28, %v5484_v19  ;;  %v912_v19 = vld [vmem:[%s9928_s6 + $0x5d8] sm:$0xff] }
 0x3f4   : > { %v7505_v58 = vmul.f32 -1.442695, %v4174_v50  ;;  %6403 = vperm.xlu0 %8392, %v9478_v6   ;;  %v9480_v24 = vpop.eup %9479  ;;  %v3386_v62 = vpop.f32.mrb[148].mxu1 }
 0x3f5   : > { %v6249_v35 = vpop.permute.xlu1 %6248  ;;  %v9482_v16 = vpop.eup %9481  ;;  %6808 = vst.msk [vmem:[%s10223_s12 + $0x470] sm:$0xff] %vm6665_vm3, %v6618_v54  ;;  %v3387_v40 = vadd.f32 %v3386_v62, %v907_v53  ;;  %6408 = vperm.xlu1 %8393, %v9480_v24  }
 0x3f6   : > { %9491 = vpow2.f32 %v7505_v58  ;;  %v6619_v30 = vmul.f32 %v6249_v35, %v5485_v33  ;;  %v3388_v63 = vpop.f32.mrb[149].mxu1  ;;  %v4953_v1 = vadd.f32 1.0, %v9482_v16  ;;  %v5490_v35 = vld [vmem:[%s10208_s8 + $0x4a0] sm:$0xff] }
 0x3f7   : > { %v3389_v7 = vpop.f32.mrb[150].mxu1  ;;  %v9484_v9 = vpop.eup %9483  ;;  %v4179_v38 = vadd.f32 %v11427_v56, %v3387_v40  ;;  %v913_v63 = vld [vmem:[%s9928_s6 + $0x5e0] sm:$0xff] }
 0x3f8   : > { %6809 = vst.msk [vmem:[%s10223_s12 + $0x478] sm:$0xff] %vm6665_vm3, %v6619_v30  ;;  %v3390_v45 = vadd.f32 %v3389_v7, %v908_v61  ;;  %v3391_v12 = vpop.f32.mrb[151].mxu1  ;;  %9493 = vrcp.f32 %v4953_v1  ;;  %v4954_v47 = vadd.f32 1.0, %v9484_v9  ;;  %v5491_v1 = vld [vmem:[%s10208_s8 + $0x4a8] sm:$0xff] }
 0x3f9   : > { %v7506_v41 = vmul.f32 -1.442695, %v4179_v38 }
 0x3fa   : > { %v4182_v44 = vadd.f32 %v11432_v13, %v3390_v45  ;;  %v9486_v20 = vpop.eup %9485  ;;  %9495 = vrcp.f32 %v4954_v47 }
 0x3fb   : > { %v6254_v14 = vpop.permute.xlu0 %6253  ;;  %9497 = vpow2.f32 %v7506_v41  ;;  %6413 = vperm.xlu0 %8392, %v9486_v20  }
 0x3fc   : > { %v7507_v51 = vmul.f32 -1.442695, %v4182_v44  ;;  %v6620_v56 = vmul.f32 %v6254_v14, %v5486_v52  ;;  %v9488_v22 = vpop.eup %9487  ;;  %v3394_v60 = vpop.f32.mrb[152].mxu1 }
 0x3fd   : > { %v6259_v49 = vpop.permute.xlu1 %6258  ;;  %v9490_v29 = vpop.eup %9489  ;;  %v3395_v13 = vadd.f32 %v3394_v60, %v909_v23  ;;  %6418 = vperm.xlu1 %8393, %v9488_v22  }
 0x3fe   : > { %9499 = vpow2.f32 %v7507_v51  ;;  %6810 = vst.msk [vmem:[%s10223_s12 + $0x480] sm:$0xff] %vm6665_vm3, %v6620_v56  ;;  %v6621_v55 = vmul.f32 %v6259_v49, %v5487_v15  ;;  %v3396_v3 = vpop.f32.mrb[153].mxu1  ;;  %v4955_v2 = vadd.f32 1.0, %v9490_v29  ;;  %v5492_v51 = vld [vmem:[%s10208_s8 + $0x4b0] sm:$0xff]  ;;  %v5493_v49 = vld [vmem:[%s10208_s8 + $0x4b8] sm:$0xff] }
 0x3ff   : > { %v3397_v57 = vpop.f32.mrb[154].mxu1  ;;  %v4187_v36 = vadd.f32 %v11441_v31, %v3395_v13 }
 0x400   : > { %v9492_v4 = vpop.eup %9491  ;;  %6811 = vst.msk [vmem:[%s10223_s12 + $0x488] sm:$0xff] %vm6665_vm3, %v6621_v55  ;;  %v3398_v8 = vadd.f32 %v3397_v57, %v910_v25  ;;  %v3399_v32 = vpop.f32.mrb[155].mxu1  ;;  %9501 = vrcp.f32 %v4955_v2 }
 0x401   : > { %v4956_v43 = vadd.f32 1.0, %v9492_v4  ;;  %v7508_v59 = vmul.f32 -1.442695, %v4187_v36  ;;  %v5494_v4 = vld [vmem:[%s10208_s8 + $0x4c0] sm:$0xff]  ;;  %v5495_v32 = vld [vmem:[%s10208_s8 + $0x4c8] sm:$0xff] }
 0x402   : > { %v4190_v11 = vadd.f32 %v11446_v18, %v3398_v8  ;;  %v9494_v42 = vpop.eup %9493 }
 0x403   : > { %9503 = vrcp.f32 %v4956_v43  ;;  %v6264_v39 = vpop.permute.xlu0 %6263  ;;  %6423 = vperm.xlu0 %8392, %v9494_v42  }
 0x404   : > { %9505 = vpow2.f32 %v7508_v59  ;;  %v7509_v46 = vmul.f32 -1.442695, %v4190_v11  ;;  %v6622_v31 = vmul.f32 %v6264_v39, %v5488_v0  ;;  %v9496_v34 = vpop.eup %9495  ;;  %v3402_v17 = vpop.f32.mrb[156].mxu1 }
 0x405   : > { %v6269_v21 = vpop.permute.xlu1 %6268  ;;  %v9498_v48 = vpop.eup %9497  ;;  %v3403_v18 = vadd.f32 %v3402_v17, %v911_v37  ;;  %6428 = vperm.xlu1 %8393, %v9496_v34   ;;  %v5496_v37 = vld [vmem:[%s10208_s8 + $0x4d0] sm:$0xff] }
 0x406   : > { %9507 = vpow2.f32 %v7509_v46  ;;  %6812 = vst.msk [vmem:[%s10223_s12 + $0x490] sm:$0xff] %vm6665_vm3, %v6622_v31  ;;  %v6623_v50 = vmul.f32 %v6269_v21, %v5489_v10  ;;  %v3404_v6 = vpop.f32.mrb[157].mxu1  ;;  %v4957_v28 = vadd.f32 1.0, %v9498_v48  ;;  %v5497_v31 = vld [vmem:[%s10208_s8 + $0x4d8] sm:$0xff]  ;;  %v5498_v48 = vld [vmem:[%s10208_s8 + $0x4e0] sm:$0xff] }
 0x407   : > { %v3405_v53 = vpop.f32.mrb[158].mxu1  ;;  %v4195_v58 = vadd.f32 %v11455_v5, %v3403_v18  ;;  %v5499_v6 = vld [vmem:[%s10208_s8 + $0x4e8] sm:$0xff] }
 0x408   : > { %v9500_v33 = vpop.eup %9499  ;;  %6813 = vst.msk [vmem:[%s10223_s12 + $0x498] sm:$0xff] %vm6665_vm3, %v6623_v50  ;;  %v3406_v54 = vadd.f32 %v3405_v53, %v912_v19  ;;  %v3407_v24 = vpop.f32.mrb[159].mxu1  ;;  %9509 = vrcp.f32 %v4957_v28 }
 0x409   : > { %v4958_v62 = vadd.f32 1.0, %v9500_v33  ;;  %v7510_v61 = vmul.f32 -1.442695, %v4195_v58  ;;  %v5500_v58 = vld [vmem:[%s10208_s8 + $0x4f0] sm:$0xff]  ;;  %v5501_v24 = vld [vmem:[%s10208_s8 + $0x4f8] sm:$0xff] }
 0x40a   : > { %v4198_v16 = vadd.f32 %v11460_v26, %v3406_v54  ;;  %v9502_v40 = vpop.eup %9501 }
 0x40b   : > { %9511 = vrcp.f32 %v4958_v62  ;;  %v6274_v30 = vpop.permute.xlu0 %6273  ;;  %6433 = vperm.xlu0 %8392, %v9502_v40  }
 0x40c   : > { %9513 = vpow2.f32 %v7510_v61  ;;  %v7511_v7 = vmul.f32 -1.442695, %v4198_v16  ;;  %v6624_v9 = vmul.f32 %v6274_v30, %v5490_v35  ;;  %v3410_v38 = vpop.f32.mrb[160].mxu1  ;;  %v6279_v45 = vpop.permute.xlu1 %6278  ;;  %v5502_v16 = vld [vmem:[%s10208_s8 + $0x500] sm:$0xff]  ;;  %v5503_v30 = vld [vmem:[%s10208_s8 + $0x508] sm:$0xff] }
 0x40d   : > { %v9504_v5 = vpop.eup %9503  ;;  %v3411_v47 = vadd.f32 %v3410_v38, %v913_v63  ;;  %v6625_v26 = vmul.f32 %v6279_v45, %v5491_v1  ;;  %v3412_v52 = vpop.f32.mrb[161].mxu1  ;;  %v5505_v38 = vld [vmem:[%s10208_s8 + $0x518] sm:$0xff] }
 0x40e   : > { %v9506_v12 = vpop.eup %9505  ;;  %9515 = vpow2.f32 %v7511_v7  ;;  %6814 = vst.msk [vmem:[%s10223_s12 + $0x4a0] sm:$0xff] %vm6665_vm3, %v6624_v9  ;;  %6438 = vperm.xlu1 %8393, %v9504_v5   ;;  %v3413_v44 = vpop.f32.mrb[162].mxu1  ;;  %v5504_v9 = vld [vmem:[%s10208_s8 + $0x510] sm:$0xff] }
 0x40f   : > { %v4959_v41 = vadd.f32 1.0, %v9506_v12  ;;  %v4203_v14 = vadd.f32 %v11469_v27, %v3411_v47  ;;  %6815 = vst.msk [vmem:[%s10223_s12 + $0x4a8] sm:$0xff] %vm6665_vm3, %v6625_v26  ;;  %v3414_v23 = vpop.f32.mrb[163].mxu1  ;;  %v5506_v26 = vld [vmem:[%s10208_s8 + $0x520] sm:$0xff] }
 0x410   : > { %v9508_v20 = vpop.eup %9507  ;;  %v5508_v23 = vld [vmem:[%s10208_s8 + $0x530] sm:$0xff] }
 0x411   : > { %9517 = vrcp.f32 %v4959_v41  ;;  %v4960_v15 = vadd.f32 1.0, %v9508_v20  ;;  %v7512_v56 = vmul.f32 -1.442695, %v4203_v14  ;;  %v5507_v41 = vld [vmem:[%s10208_s8 + $0x528] sm:$0xff] }
 0x412   : > { %v9510_v22 = vpop.eup %9509 }
 0x413   : > { %9519 = vrcp.f32 %v4960_v15  ;;  %v6284_v60 = vpop.permute.xlu0 %6283  ;;  %6443 = vperm.xlu0 %8392, %v9510_v22  }
 0x414   : > { %9521 = vpow2.f32 %v7512_v56  ;;  %v6626_v25 = vmul.f32 %v6284_v60, %v5492_v51  ;;  %v6289_v27 = vpop.permute.xlu1 %6288  ;;  %v5509_v51 = vld [vmem:[%s10208_s8 + $0x538] sm:$0xff] }
 0x415   : > { %v9512_v29 = vpop.eup %9511  ;;  %v6627_v55 = vmul.f32 %v6289_v27, %v5493_v49  ;;  %v5510_v49 = vld [vmem:[%s10208_s8 + $0x540] sm:$0xff] }
 0x416   : > { %v9514_v13 = vpop.eup %9513  ;;  %6816 = vst.msk [vmem:[%s10223_s12 + $0x4b0] sm:$0xff] %vm6665_vm3, %v6626_v25  ;;  %6448 = vperm.xlu1 %8393, %v9512_v29   ;;  %v5511_v29 = vld [vmem:[%s10208_s8 + $0x548] sm:$0xff] }
 0x417   : > { %v4961_v3 = vadd.f32 1.0, %v9514_v13  ;;  %6817 = vst.msk [vmem:[%s10223_s12 + $0x4b8] sm:$0xff] %vm6665_vm3, %v6627_v55 }
 0x418   : > { %v9516_v2 = vpop.eup %9515 }
 0x419   : > { %9523 = vrcp.f32 %v4961_v3  ;;  %v4962_v57 = vadd.f32 1.0, %v9516_v2  ;;  %v5512_v3 = vld [vmem:[%s10208_s8 + $0x550] sm:$0xff] }
 0x41a   : > { %v6294_v8 = vpop.permute.xlu0 %6293 }
 0x41b   : > { %v9518_v36 = vpop.eup %9517  ;;  %9525 = vrcp.f32 %v4962_v57  ;;  %v6628_v43 = vmul.f32 %v6294_v8, %v5494_v4  ;;  %v5513_v57 = vld [vmem:[%s10208_s8 + $0x558] sm:$0xff] }
 0x41c   : > { %6453 = vperm.xlu0 %8392, %v9518_v36   ;;  %v6299_v59 = vpop.permute.xlu1 %6298 }
 0x41d   : > { %v9520_v0 = vpop.eup %9519  ;;  %6818 = vst.msk [vmem:[%s10223_s12 + $0x4c0] sm:$0xff] %vm6665_vm3, %v6628_v43  ;;  %v6629_v42 = vmul.f32 %v6299_v59, %v5495_v32  ;;  %v5514_v32 = vld [vmem:[%s10208_s8 + $0x560] sm:$0xff] }
 0x41e   : > { %v9522_v11 = vpop.eup %9521  ;;  %6458 = vperm.xlu1 %8393, %v9520_v0   ;;  %v5515_v0 = vld [vmem:[%s10208_s8 + $0x568] sm:$0xff] }
 0x41f   : > { %v4963_v39 = vadd.f32 1.0, %v9522_v11  ;;  %6819 = vst.msk [vmem:[%s10223_s12 + $0x4c8] sm:$0xff] %vm6665_vm3, %v6629_v42 }
 0x421   : > { %9527 = vrcp.f32 %v4963_v39  ;;  %v5516_v39 = vld [vmem:[%s10208_s8 + $0x570] sm:$0xff] }
 0x422   : > { %v6304_v46 = vpop.permute.xlu0 %6303 }
 0x423   : > { %v9524_v10 = vpop.eup %9523  ;;  %v6630_v34 = vmul.f32 %v6304_v46, %v5496_v37 }
 0x424   : > { %6463 = vperm.xlu0 %8392, %v9524_v10   ;;  %v6309_v21 = vpop.permute.xlu1 %6308  ;;  %v5517_v10 = vld [vmem:[%s10208_s8 + $0x578] sm:$0xff] }
 0x425   : > { %v9526_v17 = vpop.eup %9525  ;;  %6820 = vst.msk [vmem:[%s10223_s12 + $0x4d0] sm:$0xff] %vm6665_vm3, %v6630_v34  ;;  %v6631_v19 = vmul.f32 %v6309_v21, %v5497_v31 }
 0x426   : > { %6468 = vperm.xlu1 %8393, %v9526_v17   ;;  %v5518_v17 = vld [vmem:[%s10208_s8 + $0x580] sm:$0xff] }
 0x427   : > { %6821 = vst.msk [vmem:[%s10223_s12 + $0x4d8] sm:$0xff] %vm6665_vm3, %v6631_v19  ;;  %v5519_v19 = vld [vmem:[%s10208_s8 + $0x588] sm:$0xff] }
 0x42a   : > { %v6314_v50 = vpop.permute.xlu0 %6313 }
 0x42b   : > { %v9528_v18 = vpop.eup %9527  ;;  %v6632_v28 = vmul.f32 %v6314_v50, %v5498_v48 }
 0x42c   : > { %6473 = vperm.xlu0 %8392, %v9528_v18  }
 0x42d   : > { %v6319_v53 = vpop.permute.xlu1 %6318  ;;  %6822 = vst.msk [vmem:[%s10223_s12 + $0x4e0] sm:$0xff] %vm6665_vm3, %v6632_v28 }
 0x42e   : > { %v6633_v33 = vmul.f32 %v6319_v53, %v5499_v6  ;;  %v5520_v6 = vld [vmem:[%s10208_s8 + $0x590] sm:$0xff]  ;;  %v5521_v53 = vld [vmem:[%s10208_s8 + $0x598] sm:$0xff] }
 0x430   : > { %6823 = vst.msk [vmem:[%s10223_s12 + $0x4e8] sm:$0xff] %vm6665_vm3, %v6633_v33 }
 0x432   : > { %v6324_v54 = vpop.permute.xlu0 %6323 }
 0x433   : > { %v6634_v62 = vmul.f32 %v6324_v54, %v5500_v58 }
 0x435   : > { %v6329_v35 = vpop.permute.xlu1 %6328  ;;  %6824 = vst.msk [vmem:[%s10223_s12 + $0x4f0] sm:$0xff] %vm6665_vm3, %v6634_v62 }
 0x436   : > { %v6635_v61 = vmul.f32 %v6329_v35, %v5501_v24  ;;  %v5522_v24 = vld [vmem:[%s10208_s8 + $0x5a0] sm:$0xff]  ;;  %v5523_v35 = vld [vmem:[%s10208_s8 + $0x5a8] sm:$0xff] }
 0x438   : > { %6825 = vst.msk [vmem:[%s10223_s12 + $0x4f8] sm:$0xff] %vm6665_vm3, %v6635_v61 }
 0x43b   : > { %v6334_v40 = vpop.permute.xlu0 %6333 }
 0x43c   : > { %v6636_v63 = vmul.f32 %v6334_v40, %v5502_v16 }
 0x43d   : > { %v6339_v1 = vpop.permute.xlu1 %6338 }
 0x43e   : > { %6826 = vst.msk [vmem:[%s10223_s12 + $0x500] sm:$0xff] %vm6665_vm3, %v6636_v63  ;;  %v6637_v7 = vmul.f32 %v6339_v1, %v5503_v30  ;;  %v5524_v30 = vld [vmem:[%s10208_s8 + $0x5b0] sm:$0xff]  ;;  %v5525_v1 = vld [vmem:[%s10208_s8 + $0x5b8] sm:$0xff] }
 0x440   : > { %6827 = vst.msk [vmem:[%s10223_s12 + $0x508] sm:$0xff] %vm6665_vm3, %v6637_v7 }
 0x443   : > { %v6344_v5 = vpop.permute.xlu0 %6343 }
 0x444   : > { %v6638_v45 = vmul.f32 %v6344_v5, %v5504_v9 }
 0x445   : > { %v6349_v12 = vpop.permute.xlu1 %6348 }
 0x446   : > { %6828 = vst.msk [vmem:[%s10223_s12 + $0x510] sm:$0xff] %vm6665_vm3, %v6638_v45  ;;  %v6639_v47 = vmul.f32 %v6349_v12, %v5505_v38  ;;  %v5526_v38 = vld [vmem:[%s10208_s8 + $0x5c0] sm:$0xff]  ;;  %v5527_v12 = vld [vmem:[%s10208_s8 + $0x5c8] sm:$0xff] }
 0x448   : > { %6829 = vst.msk [vmem:[%s10223_s12 + $0x518] sm:$0xff] %vm6665_vm3, %v6639_v47 }
 0x44b   : > { %v6354_v52 = vpop.permute.xlu0 %6353 }
 0x44c   : > { %v6640_v44 = vmul.f32 %v6354_v52, %v5506_v26 }
 0x44d   : > { %v6359_v20 = vpop.permute.xlu1 %6358 }
 0x44e   : > { %6830 = vst.msk [vmem:[%s10223_s12 + $0x520] sm:$0xff] %vm6665_vm3, %v6640_v44  ;;  %v6641_v14 = vmul.f32 %v6359_v20, %v5507_v41  ;;  %v5528_v41 = vld [vmem:[%s10208_s8 + $0x5d0] sm:$0xff]  ;;  %v5529_v20 = vld [vmem:[%s10208_s8 + $0x5d8] sm:$0xff] }
 0x450   : > { %6831 = vst.msk [vmem:[%s10223_s12 + $0x528] sm:$0xff] %vm6665_vm3, %v6641_v14 }
 0x453   : > { %v6364_v15 = vpop.permute.xlu0 %6363 }
 0x454   : > { %v6642_v56 = vmul.f32 %v6364_v15, %v5508_v23 }
 0x455   : > { %v6369_v22 = vpop.permute.xlu1 %6368 }
 0x456   : > { %6832 = vst.msk [vmem:[%s10223_s12 + $0x530] sm:$0xff] %vm6665_vm3, %v6642_v56  ;;  %v6643_v60 = vmul.f32 %v6369_v22, %v5509_v51  ;;  %v5530_v51 = vld [vmem:[%s10208_s8 + $0x5e0] sm:$0xff] }
 0x458   : > { %6833 = vst.msk [vmem:[%s10223_s12 + $0x538] sm:$0xff] %vm6665_vm3, %v6643_v60 }
 0x45b   : > { %v6374_v25 = vpop.permute.xlu0 %6373 }
 0x45c   : > { %v6644_v27 = vmul.f32 %v6374_v25, %v5510_v49 }
 0x45d   : > { %v6379_v13 = vpop.permute.xlu1 %6378 }
 0x45e   : > { %6834 = vst.msk [vmem:[%s10223_s12 + $0x540] sm:$0xff] %vm6665_vm3, %v6644_v27  ;;  %v6645_v55 = vmul.f32 %v6379_v13, %v5511_v29 }
 0x460   : > { %6835 = vst.msk [vmem:[%s10223_s12 + $0x548] sm:$0xff] %vm6665_vm3, %v6645_v55 }
 0x463   : > { %v6384_v2 = vpop.permute.xlu0 %6383 }
 0x464   : > { %v6646_v4 = vmul.f32 %v6384_v2, %v5512_v3 }
 0x465   : > { %v6389_v36 = vpop.permute.xlu1 %6388 }
 0x466   : > { %6836 = vst.msk [vmem:[%s10223_s12 + $0x550] sm:$0xff] %vm6665_vm3, %v6646_v4  ;;  %v6647_v8 = vmul.f32 %v6389_v36, %v5513_v57 }
 0x468   : > { %6837 = vst.msk [vmem:[%s10223_s12 + $0x558] sm:$0xff] %vm6665_vm3, %v6647_v8 }
 0x46b   : > { %v6394_v43 = vpop.permute.xlu0 %6393 }
 0x46c   : > { %v6648_v59 = vmul.f32 %v6394_v43, %v5514_v32  ;;  %v6399_v11 = vpop.permute.xlu1 %6398 }
 0x46d   : > { %v6649_v42 = vmul.f32 %v6399_v11, %v5515_v0 }
 0x46e   : > { %6838 = vst.msk [vmem:[%s10223_s12 + $0x560] sm:$0xff] %vm6665_vm3, %v6648_v59 }
 0x46f   : > { %6839 = vst.msk [vmem:[%s10223_s12 + $0x568] sm:$0xff] %vm6665_vm3, %v6649_v42 }
 0x473   : > { %v6404_v37 = vpop.permute.xlu0 %6403 }
 0x474   : > { %v6650_v46 = vmul.f32 %v6404_v37, %v5516_v39  ;;  %v6409_v31 = vpop.permute.xlu1 %6408 }
 0x475   : > { %v6651_v34 = vmul.f32 %v6409_v31, %v5517_v10 }
 0x476   : > { %6840 = vst.msk [vmem:[%s10223_s12 + $0x570] sm:$0xff] %vm6665_vm3, %v6650_v46 }
 0x477   : > { %6841 = vst.msk [vmem:[%s10223_s12 + $0x578] sm:$0xff] %vm6665_vm3, %v6651_v34 }
 0x47a   : > { %v6414_v21 = vpop.permute.xlu0 %6413 }
 0x47b   : > { %v6652_v48 = vmul.f32 %v6414_v21, %v5518_v17 }
 0x47c   : > { %v6419_v18 = vpop.permute.xlu1 %6418 }
 0x47d   : > { %6842 = vst.msk [vmem:[%s10223_s12 + $0x580] sm:$0xff] %vm6665_vm3, %v6652_v48  ;;  %v6653_v50 = vmul.f32 %v6419_v18, %v5519_v19 }
 0x47f   : > { %6843 = vst.msk [vmem:[%s10223_s12 + $0x588] sm:$0xff] %vm6665_vm3, %v6653_v50 }
 0x482   : > { %v6424_v28 = vpop.permute.xlu0 %6423 }
 0x483   : > { %v6654_v33 = vmul.f32 %v6424_v28, %v5520_v6 }
 0x484   : > { %v6429_v58 = vpop.permute.xlu1 %6428 }
 0x485   : > { %6844 = vst.msk [vmem:[%s10223_s12 + $0x590] sm:$0xff] %vm6665_vm3, %v6654_v33  ;;  %v6655_v54 = vmul.f32 %v6429_v58, %v5521_v53 }
 0x487   : > { %6845 = vst.msk [vmem:[%s10223_s12 + $0x598] sm:$0xff] %vm6665_vm3, %v6655_v54 }
 0x48a   : > { %v6434_v62 = vpop.permute.xlu0 %6433 }
 0x48b   : > { %v6656_v61 = vmul.f32 %v6434_v62, %v5522_v24 }
 0x48d   : > { %v6439_v16 = vpop.permute.xlu1 %6438  ;;  %6846 = vst.msk [vmem:[%s10223_s12 + $0x5a0] sm:$0xff] %vm6665_vm3, %v6656_v61 }
 0x48e   : > { %v6657_v40 = vmul.f32 %v6439_v16, %v5523_v35 }
 0x490   : > { %6847 = vst.msk [vmem:[%s10223_s12 + $0x5a8] sm:$0xff] %vm6665_vm3, %v6657_v40 }
 0x492   : > { %v6444_v63 = vpop.permute.xlu0 %6443 }
 0x493   : > { %v6658_v7 = vmul.f32 %v6444_v63, %v5524_v30 }
 0x495   : > { %v6449_v9 = vpop.permute.xlu1 %6448  ;;  %6848 = vst.msk [vmem:[%s10223_s12 + $0x5b0] sm:$0xff] %vm6665_vm3, %v6658_v7 }
 0x496   : > { %v6659_v5 = vmul.f32 %v6449_v9, %v5525_v1 }
 0x498   : > { %6849 = vst.msk [vmem:[%s10223_s12 + $0x5b8] sm:$0xff] %vm6665_vm3, %v6659_v5 }
 0x49b   : > { %v6454_v45 = vpop.permute.xlu0 %6453 }
 0x49c   : > { %v6660_v47 = vmul.f32 %v6454_v45, %v5526_v38 }
 0x49d   : > { %v6459_v26 = vpop.permute.xlu1 %6458 }
 0x49e   : > { %6850 = vst.msk [vmem:[%s10223_s12 + $0x5c0] sm:$0xff] %vm6665_vm3, %v6660_v47  ;;  %v6661_v52 = vmul.f32 %v6459_v26, %v5527_v12 }
 0x4a0   : > { %6851 = vst.msk [vmem:[%s10223_s12 + $0x5c8] sm:$0xff] %vm6665_vm3, %v6661_v52 }
 0x4a3   : > { %v6464_v44 = vpop.permute.xlu0 %6463 }
 0x4a4   : > { %v6662_v14 = vmul.f32 %v6464_v44, %v5528_v41 }
 0x4a5   : > { %v6469_v23 = vpop.permute.xlu1 %6468 }
 0x4a6   : > { %6852 = vst.msk [vmem:[%s10223_s12 + $0x5d0] sm:$0xff] %vm6665_vm3, %v6662_v14  ;;  %v6663_v15 = vmul.f32 %v6469_v23, %v5529_v20 }
 0x4a8   : > { %6853 = vst.msk [vmem:[%s10223_s12 + $0x5d8] sm:$0xff] %vm6665_vm3, %v6663_v15 }
 0x4ab   : > { %v6474_v56 = vpop.permute.xlu0 %6473 }
 0x4ac   : > { %v6664_v22 = vmul.f32 %v6474_v56, %v5530_v51 }
 0x4ae   : > { %6854 = vst.msk [vmem:[%s10223_s12 + $0x5e0] sm:$0xff] %vm6665_vm3, %v6664_v22 }
 0x4af PF: > { %s14_s15 = sadd.s32 1, %s9535_s15  }
 0x4b0   : > { %p11_p4 = scmp.ge.s32.totalorder %s14_s15, 4  }
 0x4b2   :  { %13 = sbr.rel (!%p11_p4) target bundleno = 1 (0x1), region = 72 }

</bundles_post_ra>
